<compile_context>
chip_gen: v6e
topology: v6e:2x2x1
jax: 0.10.0
libtpu: 0.0.40
codegen_flags: <defaults>
</compile_context>

<pallas_src>
import math

import jax
import jax.numpy as jnp
from jax.experimental import pallas as pl
from jax.experimental.pallas import tpu as pltpu

D_MODEL = 32
N_HEADS = 4
D_K = D_MODEL // N_HEADS
D_FF = 64
N_LAYERS = 2
EPS = 1e-6

# ---- static lane-offset layout of the fused per-layer weight slab (rows = D_MODEL) ----------
_D3 = 3 * D_MODEL
W_SA_QKV = slice(0, _D3)                                   # fused self-attn QKV (Q pre-scaled)
W_SA_WO = slice(_D3, _D3 + D_MODEL)                        # self-attn output proj
W_CA_WQ = slice(_D3 + D_MODEL, _D3 + 2 * D_MODEL)          # cross-attn Q (pre-scaled)
W_CA_WKV = slice(_D3 + 2 * D_MODEL, _D3 + 4 * D_MODEL)     # fused cross-attn KV
W_CA_WO = slice(_D3 + 4 * D_MODEL, _D3 + 5 * D_MODEL)      # cross-attn output proj
W_FF_W1 = slice(_D3 + 5 * D_MODEL, _D3 + 5 * D_MODEL + D_FF)
W_LANES = _D3 + 5 * D_MODEL + D_FF                         # 320

# ---- static lane-offset layout of the fused per-layer bias slab -----------------------------
B_SA_QKV = W_SA_QKV
B_SA_O = W_SA_WO
B_CA_Q = W_CA_WQ
B_CA_KV = W_CA_WKV
B_CA_O = W_CA_WO
B_FF1 = W_FF_W1
B_FF2 = slice(W_LANES, W_LANES + D_MODEL)
B_LANES = W_LANES + D_MODEL                                # 352


# ----------------------------- fused decoder kernel ------------------------------------------
def _decoder_kernel(x_ref, mem_ref, sbias_ref, tbias_ref,
                    w_ref, ff2_ref, b_ref, ln_ref, o_ref):
    # One grid step == BB batch elements (BB = B on 1-TC chips, 1 on 2-TC chips).
    BB, Tt, _ = tbias_ref.shape
    x = x_ref[...].astype(jnp.float32)        # (BB*Tt, D)  lane/sublane-dense
    sbias = sbias_ref[...]                    # (BB, Tt, S) additive mask bias (f32)
    tbias = tbias_ref[...]                    # (BB, Tt, Tt)
    ln = ln_ref[...]                          # (3L+1, 2, D) f32

    def layer_norm(v, idx):
        # SublayerConnection's LayerNorm: unbiased std (N-1), eps added to std. Exact divide.
        a = ln[idx, 0]
        b = ln[idx, 1]
        mean = jnp.mean(v, axis=-1, keepdims=True)
        var = jnp.sum((v - mean) ** 2, axis=-1, keepdims=True) * (1.0 / (D_MODEL - 1))
        return a * (v - mean) / (jnp.sqrt(var) + EPS) + b

    def softmax_rows(s):
        s = s - jnp.max(s, axis=-1, keepdims=True)
        p = jnp.exp(s)
        return p * pl.reciprocal(jnp.sum(p, axis=-1, keepdims=True), approx=True)

    def mm(a, w):                             # bf16 MXU operands, f32 accumulation
        return jnp.dot(a.astype(jnp.bfloat16), w, preferred_element_type=jnp.float32)

    def attend(q, k, v, bias, wo):
        # q: (Tq, D); k, v: (Tk, D); bias: (Tq, Tk) additive; wo: (D, D) bf16.
        qb = q.astype(jnp.bfloat16)
        kT = k.T.astype(jnp.bfloat16)         # ONE transpose per attention (not per head)
        vb = v.astype(jnp.bfloat16)
        heads = []
        for h in range(N_HEADS):              # heads = lane slices; fully unrolled
            sl = slice(h * D_K, (h + 1) * D_K)
            s = jnp.dot(qb[:, sl], kT[sl, :], preferred_element_type=jnp.float32) + bias
            p = softmax_rows(s)
            heads.append(jnp.dot(p.astype(jnp.bfloat16), vb[:, sl],
                                 preferred_element_type=jnp.float32))
        cat = jnp.concatenate(heads, axis=-1).astype(jnp.bfloat16)   # (Tq, D) lane concat
        return jnp.dot(cat, wo, preferred_element_type=jnp.float32)  # single fused out-proj

    def rows(bb):
        return slice(bb * Tt, (bb + 1) * Tt)

    for l in range(N_LAYERS):
        wl = w_ref[l]                         # (D, 320) bf16 fused weight slab
        fl = ff2_ref[l]                       # (D_FF, D) bf16
        bl = b_ref[l]                         # (352,) f32 fused bias slab

        # --- sublayer 0: masked self-attention (batched fused QKV projection) ---
        nx = layer_norm(x, 3 * l + 0)
        qkv = mm(nx, wl[:, W_SA_QKV]) + bl[B_SA_QKV]
        sa = jnp.concatenate(
            [attend(qkv[rows(bb), 0:D_MODEL],
                    qkv[rows(bb), D_MODEL:2 * D_MODEL],
                    qkv[rows(bb), 2 * D_MODEL:3 * D_MODEL],
                    tbias[bb], wl[:, W_SA_WO]) for bb in range(BB)], axis=0)
        x = x + sa + bl[B_SA_O]

        # --- sublayer 1: cross-attention over encoder memory (fused KV projection) ---
        nx = layer_norm(x, 3 * l + 1)
        q = mm(nx, wl[:, W_CA_WQ]) + bl[B_CA_Q]
        ca_outs = []
        for bb in range(BB):
            kv = mm(mem_ref[bb], wl[:, W_CA_WKV]) + bl[B_CA_KV]
            ca_outs.append(attend(q[rows(bb)], kv[:, 0:D_MODEL], kv[:, D_MODEL:],
                                  sbias[bb], wl[:, W_CA_WO]))
        x = x + jnp.concatenate(ca_outs, axis=0) + bl[B_CA_O]

        # --- sublayer 2: position-wise feed-forward (batched over all BB*Tt rows) ---
        nx = layer_norm(x, 3 * l + 2)
        h1 = jnp.maximum(mm(nx, wl[:, W_FF_W1]) + bl[B_FF1], 0.0)
        x = x + mm(h1, fl) + bl[B_FF2]

    o_ref[...] = layer_norm(x, 3 * N_LAYERS).astype(o_ref.dtype)


# ----------------------------- pallas_call wrapper --------------------------------------------
def _two_tensorcores_per_chip():
    try:
        kind = jax.devices()[0].device_kind.lower()
    except Exception:
        return False
    return ("v7" in kind) or ("v4" in kind)   # v7x / v4-megacore: 2 TCs share the chip


def decoder(packed, x, memory, src_mask, tgt_mask):
    B, Tt, D = x.shape
    S = memory.shape[1]

    # Static 0/1 masks -> additive biases, computed ONCE outside the kernel.
    sbias = jnp.where(src_mask == 0, -1e9, 0.0).astype(jnp.float32)
    tbias = jnp.where(tgt_mask == 0, -1e9, 0.0).astype(jnp.float32)
    x2 = x.reshape(B * Tt, D)                 # lane/sublane-dense activation slab

    # 1-TC chips (v5e/v6e): collapse the batch into one grid step (fewer, bigger matmuls).
    # 2-TC chips (v7x): keep grid=(B,) parallel so each core takes one batch element.
    bb = 1 if (_two_tensorcores_per_chip() and B > 1) else B
    grid = (B // bb,)

    def full(shape):
        nd = len(shape)
        return pl.BlockSpec(tuple(shape), lambda i, _n=nd: (0,) * _n)

    out = pl.pallas_call(
        _decoder_kernel,
        out_shape=jax.ShapeDtypeStruct((B * Tt, D), x.dtype),
        grid=grid,
        in_specs=[
            pl.BlockSpec((bb * Tt, D), lambda i: (i, 0)),
            pl.BlockSpec((bb, S, D), lambda i: (i, 0, 0)),
            pl.BlockSpec((bb, Tt, S), lambda i: (i, 0, 0)),
            pl.BlockSpec((bb, Tt, Tt), lambda i: (i, 0, 0)),
            full(packed["w_d"].shape), full(packed["w_ff2"].shape),
            full(packed["b"].shape), full(packed["ln"].shape),
        ],
        out_specs=pl.BlockSpec((bb * Tt, D), lambda i: (i, 0)),
        compiler_params=pltpu.CompilerParams(dimension_semantics=("parallel",)),
    )(x2, memory, sbias, tbias, packed["w_d"], packed["w_ff2"], packed["b"], packed["ln"])
    return out.reshape(B, Tt, D)


# ----------------------------- params: PyTorch layout + one-time packing ---------------------
def _lin_params(key, dout, din):
    w = jax.random.normal(key, (dout, din), jnp.float32) * 0.02
    b = jnp.zeros((dout,), jnp.float32)
    return w, b


def _attn_params(key):
    ks = jax.random.split(key, 4)
    p = {}
    for name, k in zip(("q", "k", "v", "o"), ks):
        w, b = _lin_params(k, D_MODEL, D_MODEL)
        p["w" + name], p["b" + name] = w, b
    return p


def init_params(key):
    layers = []
    for _ in range(N_LAYERS):
        key, k_self, k_src, k_ff1, k_ff2 = jax.random.split(key, 5)
        w1, b1 = _lin_params(k_ff1, D_FF, D_MODEL)
        w2, b2 = _lin_params(k_ff2, D_MODEL, D_FF)
        layers.append({
            "self_attn": _attn_params(k_self),
            "src_attn": _attn_params(k_src),
            "ff": {"w1": w1, "b1": b1, "w2": w2, "b2": b2},
            "ln0_a": jnp.ones((D_MODEL,), jnp.float32), "ln0_b": jnp.zeros((D_MODEL,), jnp.float32),
            "ln1_a": jnp.ones((D_MODEL,), jnp.float32), "ln1_b": jnp.zeros((D_MODEL,), jnp.float32),
            "ln2_a": jnp.ones((D_MODEL,), jnp.float32), "ln2_b": jnp.zeros((D_MODEL,), jnp.float32),
        })
    return {
        "layers": layers,
        "norm_a": jnp.ones((D_MODEL,), jnp.float32),
        "norm_b": jnp.zeros((D_MODEL,), jnp.float32),
    }


def pack_params(params):
    """One-time fuse/transpose/scale/stack of the PyTorch-layout params into 4 kernel slabs."""
    scale = 1.0 / math.sqrt(D_K)              # folded into Q weights AND Q biases
    w_rows, ff2_rows, b_rows = [], [], []
    for lp in params["layers"]:
        sa, ca, ff = lp["self_attn"], lp["src_attn"], lp["ff"]
        w_rows.append(jnp.concatenate([
            sa["wq"].T * scale, sa["wk"].T, sa["wv"].T,     # fused self-attn QKV
            sa["wo"].T,
            ca["wq"].T * scale,
            ca["wk"].T, ca["wv"].T,                         # fused cross-attn KV
            ca["wo"].T,
            ff["w1"].T,
        ], axis=1))                                         # (D, 320)
        ff2_rows.append(ff["w2"].T)                         # (D_FF, D)
        b_rows.append(jnp.concatenate([
            sa["bq"] * scale, sa["bk"], sa["bv"],
            sa["bo"],
            ca["bq"] * scale, ca["bk"], ca["bv"],
            ca["bo"],
            ff["b1"], ff["b2"],
        ]))                                                 # (352,)
    ln_rows = []
    for lp in params["layers"]:
        for s in range(3):
            ln_rows.append(jnp.stack([lp["ln%d_a" % s], lp["ln%d_b" % s]]))
    ln_rows.append(jnp.stack([params["norm_a"], params["norm_b"]]))
    return {
        "w_d": jnp.stack(w_rows).astype(jnp.bfloat16),      # (L, D, 320) bf16
        "w_ff2": jnp.stack(ff2_rows).astype(jnp.bfloat16),  # (L, D_FF, D) bf16
        "b": jnp.stack(b_rows),                             # (L, 352) f32
        "ln": jnp.stack(ln_rows),                           # (3L+1, 2, D) f32
    }


# ----------------------------- pure-JAX reference (for validation) ---------------------------
def _ln_ref(x, a, b):
    mean = jnp.mean(x, axis=-1, keepdims=True)
    var = jnp.sum((x - mean) ** 2, axis=-1, keepdims=True) / (x.shape[-1] - 1)
    return a * (x - mean) / (jnp.sqrt(var) + EPS) + b


def _lin_ref(x, w, b):
    return x @ w.T + b


def _mha_ref(p, xq, xkv, mask):
    B, Tq, D = xq.shape
    Tk = xkv.shape[1]
    q = _lin_ref(xq, p["wq"], p["bq"]).reshape(B, Tq, N_HEADS, D_K).transpose(0, 2, 1, 3)
    k = _lin_ref(xkv, p["wk"], p["bk"]).reshape(B, Tk, N_HEADS, D_K).transpose(0, 2, 1, 3)
    v = _lin_ref(xkv, p["wv"], p["bv"]).reshape(B, Tk, N_HEADS, D_K).transpose(0, 2, 1, 3)
    s = jnp.einsum("bhqd,bhkd->bhqk", q, k) / math.sqrt(D_K)
    s = jnp.where(mask[:, None] == 0, -1e9, s)
    a = jax.nn.softmax(s, axis=-1)
    o = jnp.einsum("bhqk,bhkd->bhqd", a, v).transpose(0, 2, 1, 3).reshape(B, Tq, D)
    return _lin_ref(o, p["wo"], p["bo"])


def decoder_ref(params, x, memory, src_mask, tgt_mask):
    for lp in params["layers"]:
        nx = _ln_ref(x, lp["ln0_a"], lp["ln0_b"])
        x = x + _mha_ref(lp["self_attn"], nx, nx, tgt_mask)
        nx = _ln_ref(x, lp["ln1_a"], lp["ln1_b"])
        x = x + _mha_ref(lp["src_attn"], nx, memory, src_mask)
        nx = _ln_ref(x, lp["ln2_a"], lp["ln2_b"])
        h = jnp.maximum(_lin_ref(nx, lp["ff"]["w1"], lp["ff"]["b1"]), 0.0)
        x = x + _lin_ref(h, lp["ff"]["w2"], lp["ff"]["b2"])
    return _ln_ref(x, params["norm_a"], params["norm_b"])


# ----------------------------------------------------------------------------------------------
if __name__ == "__main__":
    B, T_TGT, S_SRC = 2, 8, 10

    root = jax.random.PRNGKey(0)
    k_params, k_x, k_mem = jax.random.split(root, 3)

    params = init_params(k_params)
    packed = pack_params(params)

    x = jax.random.normal(k_x, (B, T_TGT, D_MODEL), jnp.float32)
    memory = jax.random.normal(k_mem, (B, S_SRC, D_MODEL), jnp.float32)

    # src_mask = all-ones; tgt_mask = causal subsequent mask (nonzero = attend).
    src_mask = jnp.ones((B, T_TGT, S_SRC), jnp.float32)
    tgt_mask = jnp.broadcast_to(
        jnp.tril(jnp.ones((T_TGT, T_TGT), jnp.float32)), (B, T_TGT, T_TGT))

    out = jax.block_until_ready(decoder(packed, x, memory, src_mask, tgt_mask))
    assert out.shape == (B, T_TGT, D_MODEL)

    # Validate against the exact f32 reference (bf16 MXU operands + approx softmax recip).
    ref = decoder_ref(params, x, memory, src_mask, tgt_mask)
    err = float(jnp.max(jnp.abs(out - ref)))
    assert err < 3e-2, f"max abs error vs pure-JAX reference: {err}"

    print("KERNEL_OK")
</pallas_src>

<mosaic_0001>
module attributes {stable_mosaic.version = 11 : i64} {
  func.func @_decoder_kernel(%arg0: i32, %arg1: memref<16x32xf32, #tpu.memory_space<vmem>>, %arg2: memref<2x10x32xf32, #tpu.memory_space<vmem>>, %arg3: memref<2x8x10xf32, #tpu.memory_space<vmem>>, %arg4: memref<2x8x8xf32, #tpu.memory_space<vmem>>, %arg5: memref<2x32x320xbf16, #tpu.memory_space<vmem>>, %arg6: memref<2x64x32xbf16, #tpu.memory_space<vmem>>, %arg7: memref<2x352xf32, #tpu.memory_space<vmem>>, %arg8: memref<7x2x32xf32, #tpu.memory_space<vmem>>, %arg9: memref<16x32xf32, #tpu.memory_space<vmem>>) attributes {dimension_semantics = [#tpu.dimension_semantics<parallel>], iteration_bounds = array<i64: 1>, scalar_prefetch = 0 : i64, scratch_operands = 0 : i64, tpu.core_type = #tpu.core_type<tc>, window_params = [{transform_indices = @transform_0, window_bounds = array<i64: 16, 32>}, {transform_indices = @transform_1, window_bounds = array<i64: 2, 10, 32>}, {transform_indices = @transform_2, window_bounds = array<i64: 2, 8, 10>}, {transform_indices = @transform_3, window_bounds = array<i64: 2, 8, 8>}, {pipeline_mode = #tpu.pipeline_mode<synchronous>, transform_indices = @transform_4, window_bounds = array<i64: 2, 32, 320>}, {pipeline_mode = #tpu.pipeline_mode<synchronous>, transform_indices = @transform_5, window_bounds = array<i64: 2, 64, 32>}, {pipeline_mode = #tpu.pipeline_mode<synchronous>, transform_indices = @transform_6, window_bounds = array<i64: 2, 352>}, {pipeline_mode = #tpu.pipeline_mode<synchronous>, transform_indices = @transform_7, window_bounds = array<i64: 7, 2, 32>}, {transform_indices = @transform_8, window_bounds = array<i64: 16, 32>}]} {
    %c0 = arith.constant 0 : index
    %c0_0 = arith.constant 0 : index
    %0 = vector.load %arg1[%c0, %c0_0] : memref<16x32xf32, #tpu.memory_space<vmem>>, vector<16x32xf32>
    %c0_1 = arith.constant 0 : index
    %c0_2 = arith.constant 0 : index
    %c0_3 = arith.constant 0 : index
    %1 = vector.load %arg3[%c0_1, %c0_2, %c0_3] : memref<2x8x10xf32, #tpu.memory_space<vmem>>, vector<2x8x10xf32>
    %c0_4 = arith.constant 0 : index
    %c0_5 = arith.constant 0 : index
    %c0_6 = arith.constant 0 : index
    %2 = vector.load %arg4[%c0_4, %c0_5, %c0_6] : memref<2x8x8xf32, #tpu.memory_space<vmem>>, vector<2x8x8xf32>
    %c0_7 = arith.constant 0 : index
    %c0_8 = arith.constant 0 : index
    %c0_9 = arith.constant 0 : index
    %3 = vector.load %arg8[%c0_7, %c0_8, %c0_9] : memref<7x2x32xf32, #tpu.memory_space<vmem>>, vector<7x2x32xf32>
    %c0_10 = arith.constant 0 : index
    %c0_11 = arith.constant 0 : index
    %c0_12 = arith.constant 0 : index
    %4 = vector.load %arg5[%c0_10, %c0_11, %c0_12] : memref<2x32x320xbf16, #tpu.memory_space<vmem>>, vector<1x32x320xbf16>
    %5 = vector.shape_cast %4 : vector<1x32x320xbf16> to vector<32x320xbf16>
    %c0_13 = arith.constant 0 : index
    %c0_14 = arith.constant 0 : index
    %c0_15 = arith.constant 0 : index
    %6 = vector.load %arg6[%c0_13, %c0_14, %c0_15] : memref<2x64x32xbf16, #tpu.memory_space<vmem>>, vector<1x64x32xbf16>
    %7 = vector.shape_cast %6 : vector<1x64x32xbf16> to vector<64x32xbf16>
    %c0_16 = arith.constant 0 : index
    %c0_17 = arith.constant 0 : index
    %8 = vector.load %arg7[%c0_16, %c0_17] : memref<2x352xf32, #tpu.memory_space<vmem>>, vector<1x352xf32>
    %9 = vector.shape_cast %8 : vector<1x352xf32> to vector<352xf32>
    %10 = vector.extract_strided_slice %3 {offsets = [0, 0, 0], sizes = [1, 1, 32], strides = [1, 1, 1]} : vector<7x2x32xf32> to vector<1x1x32xf32>
    %11 = vector.shape_cast %10 : vector<1x1x32xf32> to vector<32xf32>
    %12 = vector.extract_strided_slice %3 {offsets = [0, 1, 0], sizes = [1, 1, 32], strides = [1, 1, 1]} : vector<7x2x32xf32> to vector<1x1x32xf32>
    %13 = vector.shape_cast %12 : vector<1x1x32xf32> to vector<32xf32>
    %cst = arith.constant dense<0.000000e+00> : vector<16xf32>
    %14 = vector.multi_reduction <add>, %0, %cst [1] : vector<16x32xf32> to vector<16xf32>
    %15 = vector.shape_cast %14 : vector<16xf32> to vector<16x1xf32>
    %cst_18 = arith.constant 3.200000e+01 : f32
    %16 = vector.broadcast %cst_18 : f32 to vector<16x1xf32>
    %17 = arith.divf %15, %16 : vector<16x1xf32>
    %18 = vector.broadcast %17 : vector<16x1xf32> to vector<16x32xf32>
    %19 = arith.subf %0, %18 : vector<16x32xf32>
    %20 = arith.mulf %19, %19 : vector<16x32xf32>
    %cst_19 = arith.constant dense<0.000000e+00> : vector<16xf32>
    %21 = vector.multi_reduction <add>, %20, %cst_19 [1] : vector<16x32xf32> to vector<16xf32>
    %22 = vector.shape_cast %21 : vector<16xf32> to vector<16x1xf32>
    %cst_20 = arith.constant 0.0322580636 : f32
    %23 = vector.broadcast %cst_20 : f32 to vector<16x1xf32>
    %24 = arith.mulf %22, %23 : vector<16x1xf32>
    %25 = vector.broadcast %17 : vector<16x1xf32> to vector<16x32xf32>
    %26 = arith.subf %0, %25 : vector<16x32xf32>
    %27 = vector.shape_cast %11 : vector<32xf32> to vector<1x32xf32>
    %28 = vector.broadcast %27 : vector<1x32xf32> to vector<16x32xf32>
    %29 = arith.mulf %28, %26 : vector<16x32xf32>
    %30 = math.sqrt %24 : vector<16x1xf32>
    %cst_21 = arith.constant 9.99999997E-7 : f32
    %31 = vector.broadcast %cst_21 : f32 to vector<16x1xf32>
    %32 = arith.addf %30, %31 : vector<16x1xf32>
    %33 = vector.broadcast %32 : vector<16x1xf32> to vector<16x32xf32>
    %34 = arith.divf %29, %33 : vector<16x32xf32>
    %35 = vector.shape_cast %13 : vector<32xf32> to vector<1x32xf32>
    %36 = vector.broadcast %35 : vector<1x32xf32> to vector<16x32xf32>
    %37 = arith.addf %34, %36 : vector<16x32xf32>
    %38 = vector.extract_strided_slice %5 {offsets = [0, 0], sizes = [32, 96], strides = [1, 1]} : vector<32x320xbf16> to vector<32x96xbf16>
    %39 = arith.truncf %37 : vector<16x32xf32> to vector<16x32xbf16>
    %cst_22 = arith.constant dense<0.000000e+00> : vector<16x96xf32>
    %40 = tpu.matmul %39, %38, %cst_22 {dimension_numbers = #tpu.dot_dimension_numbers<[1], [0], [0], [1], [0, 0, 1, 1], [], []>} : vector<16x32xbf16>, vector<32x96xbf16>, vector<16x96xf32> -> vector<16x96xf32>
    %41 = vector.extract_strided_slice %9 {offsets = [0], sizes = [96], strides = [1]} : vector<352xf32> to vector<96xf32>
    %42 = vector.shape_cast %41 : vector<96xf32> to vector<1x96xf32>
    %43 = vector.broadcast %42 : vector<1x96xf32> to vector<16x96xf32>
    %44 = arith.addf %40, %43 : vector<16x96xf32>
    %45 = vector.extract_strided_slice %44 {offsets = [0, 0], sizes = [8, 32], strides = [1, 1]} : vector<16x96xf32> to vector<8x32xf32>
    %46 = vector.extract_strided_slice %44 {offsets = [0, 32], sizes = [8, 32], strides = [1, 1]} : vector<16x96xf32> to vector<8x32xf32>
    %47 = vector.extract_strided_slice %44 {offsets = [0, 64], sizes = [8, 32], strides = [1, 1]} : vector<16x96xf32> to vector<8x32xf32>
    %48 = vector.extract_strided_slice %2 {offsets = [0, 0, 0], sizes = [1, 8, 8], strides = [1, 1, 1]} : vector<2x8x8xf32> to vector<1x8x8xf32>
    %49 = vector.shape_cast %48 : vector<1x8x8xf32> to vector<8x8xf32>
    %50 = vector.extract_strided_slice %5 {offsets = [0, 96], sizes = [32, 32], strides = [1, 1]} : vector<32x320xbf16> to vector<32x32xbf16>
    %51 = arith.truncf %45 : vector<8x32xf32> to vector<8x32xbf16>
    %52 = tpu.transpose %46, [1, 0] : vector<8x32xf32> -> vector<32x8xf32>
    %53 = arith.truncf %52 : vector<32x8xf32> to vector<32x8xbf16>
    %54 = arith.truncf %47 : vector<8x32xf32> to vector<8x32xbf16>
    %55 = vector.extract_strided_slice %51 {offsets = [0, 0], sizes = [8, 8], strides = [1, 1]} : vector<8x32xbf16> to vector<8x8xbf16>
    %56 = vector.extract_strided_slice %53 {offsets = [0, 0], sizes = [8, 8], strides = [1, 1]} : vector<32x8xbf16> to vector<8x8xbf16>
    %cst_23 = arith.constant dense<0.000000e+00> : vector<8x8xf32>
    %57 = tpu.matmul %55, %56, %cst_23 {dimension_numbers = #tpu.dot_dimension_numbers<[1], [0], [0], [1], [0, 0, 1, 1], [], []>} : vector<8x8xbf16>, vector<8x8xbf16>, vector<8x8xf32> -> vector<8x8xf32>
    %58 = arith.addf %57, %49 : vector<8x8xf32>
    %cst_24 = arith.constant dense<0xFF800000> : vector<8xf32>
    %59 = vector.multi_reduction <maximumf>, %58, %cst_24 [1] : vector<8x8xf32> to vector<8xf32>
    %60 = vector.shape_cast %59 : vector<8xf32> to vector<8x1xf32>
    %61 = vector.broadcast %60 : vector<8x1xf32> to vector<8x8xf32>
    %62 = arith.subf %58, %61 : vector<8x8xf32>
    %63 = math.exp %62 : vector<8x8xf32>
    %cst_25 = arith.constant dense<0.000000e+00> : vector<8xf32>
    %64 = vector.multi_reduction <add>, %63, %cst_25 [1] : vector<8x8xf32> to vector<8xf32>
    %65 = vector.shape_cast %64 : vector<8xf32> to vector<8x1xf32>
    %66 = tpu.reciprocal %65 {approx = true} : vector<8x1xf32> -> vector<8x1xf32>
    %67 = vector.broadcast %66 : vector<8x1xf32> to vector<8x8xf32>
    %68 = arith.mulf %63, %67 : vector<8x8xf32>
    %69 = arith.truncf %68 : vector<8x8xf32> to vector<8x8xbf16>
    %70 = vector.extract_strided_slice %54 {offsets = [0, 0], sizes = [8, 8], strides = [1, 1]} : vector<8x32xbf16> to vector<8x8xbf16>
    %cst_26 = arith.constant dense<0.000000e+00> : vector<8x8xf32>
    %71 = tpu.matmul %69, %70, %cst_26 {dimension_numbers = #tpu.dot_dimension_numbers<[1], [0], [0], [1], [0, 0, 1, 1], [], []>} : vector<8x8xbf16>, vector<8x8xbf16>, vector<8x8xf32> -> vector<8x8xf32>
    %72 = vector.extract_strided_slice %51 {offsets = [0, 8], sizes = [8, 8], strides = [1, 1]} : vector<8x32xbf16> to vector<8x8xbf16>
    %73 = vector.extract_strided_slice %53 {offsets = [8, 0], sizes = [8, 8], strides = [1, 1]} : vector<32x8xbf16> to vector<8x8xbf16>
    %cst_27 = arith.constant dense<0.000000e+00> : vector<8x8xf32>
    %74 = tpu.matmul %72, %73, %cst_27 {dimension_numbers = #tpu.dot_dimension_numbers<[1], [0], [0], [1], [0, 0, 1, 1], [], []>} : vector<8x8xbf16>, vector<8x8xbf16>, vector<8x8xf32> -> vector<8x8xf32>
    %75 = arith.addf %74, %49 : vector<8x8xf32>
    %cst_28 = arith.constant dense<0xFF800000> : vector<8xf32>
    %76 = vector.multi_reduction <maximumf>, %75, %cst_28 [1] : vector<8x8xf32> to vector<8xf32>
    %77 = vector.shape_cast %76 : vector<8xf32> to vector<8x1xf32>
    %78 = vector.broadcast %77 : vector<8x1xf32> to vector<8x8xf32>
    %79 = arith.subf %75, %78 : vector<8x8xf32>
    %80 = math.exp %79 : vector<8x8xf32>
    %cst_29 = arith.constant dense<0.000000e+00> : vector<8xf32>
    %81 = vector.multi_reduction <add>, %80, %cst_29 [1] : vector<8x8xf32> to vector<8xf32>
    %82 = vector.shape_cast %81 : vector<8xf32> to vector<8x1xf32>
    %83 = tpu.reciprocal %82 {approx = true} : vector<8x1xf32> -> vector<8x1xf32>
    %84 = vector.broadcast %83 : vector<8x1xf32> to vector<8x8xf32>
    %85 = arith.mulf %80, %84 : vector<8x8xf32>
    %86 = arith.truncf %85 : vector<8x8xf32> to vector<8x8xbf16>
    %87 = vector.extract_strided_slice %54 {offsets = [0, 8], sizes = [8, 8], strides = [1, 1]} : vector<8x32xbf16> to vector<8x8xbf16>
    %cst_30 = arith.constant dense<0.000000e+00> : vector<8x8xf32>
    %88 = tpu.matmul %86, %87, %cst_30 {dimension_numbers = #tpu.dot_dimension_numbers<[1], [0], [0], [1], [0, 0, 1, 1], [], []>} : vector<8x8xbf16>, vector<8x8xbf16>, vector<8x8xf32> -> vector<8x8xf32>
    %89 = vector.extract_strided_slice %51 {offsets = [0, 16], sizes = [8, 8], strides = [1, 1]} : vector<8x32xbf16> to vector<8x8xbf16>
    %90 = vector.extract_strided_slice %53 {offsets = [16, 0], sizes = [8, 8], strides = [1, 1]} : vector<32x8xbf16> to vector<8x8xbf16>
    %cst_31 = arith.constant dense<0.000000e+00> : vector<8x8xf32>
    %91 = tpu.matmul %89, %90, %cst_31 {dimension_numbers = #tpu.dot_dimension_numbers<[1], [0], [0], [1], [0, 0, 1, 1], [], []>} : vector<8x8xbf16>, vector<8x8xbf16>, vector<8x8xf32> -> vector<8x8xf32>
    %92 = arith.addf %91, %49 : vector<8x8xf32>
    %cst_32 = arith.constant dense<0xFF800000> : vector<8xf32>
    %93 = vector.multi_reduction <maximumf>, %92, %cst_32 [1] : vector<8x8xf32> to vector<8xf32>
    %94 = vector.shape_cast %93 : vector<8xf32> to vector<8x1xf32>
    %95 = vector.broadcast %94 : vector<8x1xf32> to vector<8x8xf32>
    %96 = arith.subf %92, %95 : vector<8x8xf32>
    %97 = math.exp %96 : vector<8x8xf32>
    %cst_33 = arith.constant dense<0.000000e+00> : vector<8xf32>
    %98 = vector.multi_reduction <add>, %97, %cst_33 [1] : vector<8x8xf32> to vector<8xf32>
    %99 = vector.shape_cast %98 : vector<8xf32> to vector<8x1xf32>
    %100 = tpu.reciprocal %99 {approx = true} : vector<8x1xf32> -> vector<8x1xf32>
    %101 = vector.broadcast %100 : vector<8x1xf32> to vector<8x8xf32>
    %102 = arith.mulf %97, %101 : vector<8x8xf32>
    %103 = arith.truncf %102 : vector<8x8xf32> to vector<8x8xbf16>
    %104 = vector.extract_strided_slice %54 {offsets = [0, 16], sizes = [8, 8], strides = [1, 1]} : vector<8x32xbf16> to vector<8x8xbf16>
    %cst_34 = arith.constant dense<0.000000e+00> : vector<8x8xf32>
    %105 = tpu.matmul %103, %104, %cst_34 {dimension_numbers = #tpu.dot_dimension_numbers<[1], [0], [0], [1], [0, 0, 1, 1], [], []>} : vector<8x8xbf16>, vector<8x8xbf16>, vector<8x8xf32> -> vector<8x8xf32>
    %106 = vector.extract_strided_slice %51 {offsets = [0, 24], sizes = [8, 8], strides = [1, 1]} : vector<8x32xbf16> to vector<8x8xbf16>
    %107 = vector.extract_strided_slice %53 {offsets = [24, 0], sizes = [8, 8], strides = [1, 1]} : vector<32x8xbf16> to vector<8x8xbf16>
    %cst_35 = arith.constant dense<0.000000e+00> : vector<8x8xf32>
    %108 = tpu.matmul %106, %107, %cst_35 {dimension_numbers = #tpu.dot_dimension_numbers<[1], [0], [0], [1], [0, 0, 1, 1], [], []>} : vector<8x8xbf16>, vector<8x8xbf16>, vector<8x8xf32> -> vector<8x8xf32>
    %109 = arith.addf %108, %49 : vector<8x8xf32>
    %cst_36 = arith.constant dense<0xFF800000> : vector<8xf32>
    %110 = vector.multi_reduction <maximumf>, %109, %cst_36 [1] : vector<8x8xf32> to vector<8xf32>
    %111 = vector.shape_cast %110 : vector<8xf32> to vector<8x1xf32>
    %112 = vector.broadcast %111 : vector<8x1xf32> to vector<8x8xf32>
    %113 = arith.subf %109, %112 : vector<8x8xf32>
    %114 = math.exp %113 : vector<8x8xf32>
    %cst_37 = arith.constant dense<0.000000e+00> : vector<8xf32>
    %115 = vector.multi_reduction <add>, %114, %cst_37 [1] : vector<8x8xf32> to vector<8xf32>
    %116 = vector.shape_cast %115 : vector<8xf32> to vector<8x1xf32>
    %117 = tpu.reciprocal %116 {approx = true} : vector<8x1xf32> -> vector<8x1xf32>
    %118 = vector.broadcast %117 : vector<8x1xf32> to vector<8x8xf32>
    %119 = arith.mulf %114, %118 : vector<8x8xf32>
    %120 = arith.truncf %119 : vector<8x8xf32> to vector<8x8xbf16>
    %121 = vector.extract_strided_slice %54 {offsets = [0, 24], sizes = [8, 8], strides = [1, 1]} : vector<8x32xbf16> to vector<8x8xbf16>
    %cst_38 = arith.constant dense<0.000000e+00> : vector<8x8xf32>
    %122 = tpu.matmul %120, %121, %cst_38 {dimension_numbers = #tpu.dot_dimension_numbers<[1], [0], [0], [1], [0, 0, 1, 1], [], []>} : vector<8x8xbf16>, vector<8x8xbf16>, vector<8x8xf32> -> vector<8x8xf32>
    %123 = tpu.concatenate %71, %88, %105, %122 in 1 : vector<8x8xf32>, vector<8x8xf32>, vector<8x8xf32>, vector<8x8xf32> -> vector<8x32xf32>
    %124 = arith.truncf %123 : vector<8x32xf32> to vector<8x32xbf16>
    %cst_39 = arith.constant dense<0.000000e+00> : vector<8x32xf32>
    %125 = tpu.matmul %124, %50, %cst_39 {dimension_numbers = #tpu.dot_dimension_numbers<[1], [0], [0], [1], [0, 0, 1, 1], [], []>} : vector<8x32xbf16>, vector<32x32xbf16>, vector<8x32xf32> -> vector<8x32xf32>
    %126 = vector.extract_strided_slice %44 {offsets = [8, 0], sizes = [8, 32], strides = [1, 1]} : vector<16x96xf32> to vector<8x32xf32>
    %127 = vector.extract_strided_slice %44 {offsets = [8, 32], sizes = [8, 32], strides = [1, 1]} : vector<16x96xf32> to vector<8x32xf32>
    %128 = vector.extract_strided_slice %44 {offsets = [8, 64], sizes = [8, 32], strides = [1, 1]} : vector<16x96xf32> to vector<8x32xf32>
    %129 = vector.extract_strided_slice %2 {offsets = [1, 0, 0], sizes = [1, 8, 8], strides = [1, 1, 1]} : vector<2x8x8xf32> to vector<1x8x8xf32>
    %130 = vector.shape_cast %129 : vector<1x8x8xf32> to vector<8x8xf32>
    %131 = vector.extract_strided_slice %5 {offsets = [0, 96], sizes = [32, 32], strides = [1, 1]} : vector<32x320xbf16> to vector<32x32xbf16>
    %132 = arith.truncf %126 : vector<8x32xf32> to vector<8x32xbf16>
    %133 = tpu.transpose %127, [1, 0] : vector<8x32xf32> -> vector<32x8xf32>
    %134 = arith.truncf %133 : vector<32x8xf32> to vector<32x8xbf16>
    %135 = arith.truncf %128 : vector<8x32xf32> to vector<8x32xbf16>
    %136 = vector.extract_strided_slice %132 {offsets = [0, 0], sizes = [8, 8], strides = [1, 1]} : vector<8x32xbf16> to vector<8x8xbf16>
    %137 = vector.extract_strided_slice %134 {offsets = [0, 0], sizes = [8, 8], strides = [1, 1]} : vector<32x8xbf16> to vector<8x8xbf16>
    %cst_40 = arith.constant dense<0.000000e+00> : vector<8x8xf32>
    %138 = tpu.matmul %136, %137, %cst_40 {dimension_numbers = #tpu.dot_dimension_numbers<[1], [0], [0], [1], [0, 0, 1, 1], [], []>} : vector<8x8xbf16>, vector<8x8xbf16>, vector<8x8xf32> -> vector<8x8xf32>
    %139 = arith.addf %138, %130 : vector<8x8xf32>
    %cst_41 = arith.constant dense<0xFF800000> : vector<8xf32>
    %140 = vector.multi_reduction <maximumf>, %139, %cst_41 [1] : vector<8x8xf32> to vector<8xf32>
    %141 = vector.shape_cast %140 : vector<8xf32> to vector<8x1xf32>
    %142 = vector.broadcast %141 : vector<8x1xf32> to vector<8x8xf32>
    %143 = arith.subf %139, %142 : vector<8x8xf32>
    %144 = math.exp %143 : vector<8x8xf32>
    %cst_42 = arith.constant dense<0.000000e+00> : vector<8xf32>
    %145 = vector.multi_reduction <add>, %144, %cst_42 [1] : vector<8x8xf32> to vector<8xf32>
    %146 = vector.shape_cast %145 : vector<8xf32> to vector<8x1xf32>
    %147 = tpu.reciprocal %146 {approx = true} : vector<8x1xf32> -> vector<8x1xf32>
    %148 = vector.broadcast %147 : vector<8x1xf32> to vector<8x8xf32>
    %149 = arith.mulf %144, %148 : vector<8x8xf32>
    %150 = arith.truncf %149 : vector<8x8xf32> to vector<8x8xbf16>
    %151 = vector.extract_strided_slice %135 {offsets = [0, 0], sizes = [8, 8], strides = [1, 1]} : vector<8x32xbf16> to vector<8x8xbf16>
    %cst_43 = arith.constant dense<0.000000e+00> : vector<8x8xf32>
    %152 = tpu.matmul %150, %151, %cst_43 {dimension_numbers = #tpu.dot_dimension_numbers<[1], [0], [0], [1], [0, 0, 1, 1], [], []>} : vector<8x8xbf16>, vector<8x8xbf16>, vector<8x8xf32> -> vector<8x8xf32>
    %153 = vector.extract_strided_slice %132 {offsets = [0, 8], sizes = [8, 8], strides = [1, 1]} : vector<8x32xbf16> to vector<8x8xbf16>
    %154 = vector.extract_strided_slice %134 {offsets = [8, 0], sizes = [8, 8], strides = [1, 1]} : vector<32x8xbf16> to vector<8x8xbf16>
    %cst_44 = arith.constant dense<0.000000e+00> : vector<8x8xf32>
    %155 = tpu.matmul %153, %154, %cst_44 {dimension_numbers = #tpu.dot_dimension_numbers<[1], [0], [0], [1], [0, 0, 1, 1], [], []>} : vector<8x8xbf16>, vector<8x8xbf16>, vector<8x8xf32> -> vector<8x8xf32>
    %156 = arith.addf %155, %130 : vector<8x8xf32>
    %cst_45 = arith.constant dense<0xFF800000> : vector<8xf32>
    %157 = vector.multi_reduction <maximumf>, %156, %cst_45 [1] : vector<8x8xf32> to vector<8xf32>
    %158 = vector.shape_cast %157 : vector<8xf32> to vector<8x1xf32>
    %159 = vector.broadcast %158 : vector<8x1xf32> to vector<8x8xf32>
    %160 = arith.subf %156, %159 : vector<8x8xf32>
    %161 = math.exp %160 : vector<8x8xf32>
    %cst_46 = arith.constant dense<0.000000e+00> : vector<8xf32>
    %162 = vector.multi_reduction <add>, %161, %cst_46 [1] : vector<8x8xf32> to vector<8xf32>
    %163 = vector.shape_cast %162 : vector<8xf32> to vector<8x1xf32>
    %164 = tpu.reciprocal %163 {approx = true} : vector<8x1xf32> -> vector<8x1xf32>
    %165 = vector.broadcast %164 : vector<8x1xf32> to vector<8x8xf32>
    %166 = arith.mulf %161, %165 : vector<8x8xf32>
    %167 = arith.truncf %166 : vector<8x8xf32> to vector<8x8xbf16>
    %168 = vector.extract_strided_slice %135 {offsets = [0, 8], sizes = [8, 8], strides = [1, 1]} : vector<8x32xbf16> to vector<8x8xbf16>
    %cst_47 = arith.constant dense<0.000000e+00> : vector<8x8xf32>
    %169 = tpu.matmul %167, %168, %cst_47 {dimension_numbers = #tpu.dot_dimension_numbers<[1], [0], [0], [1], [0, 0, 1, 1], [], []>} : vector<8x8xbf16>, vector<8x8xbf16>, vector<8x8xf32> -> vector<8x8xf32>
    %170 = vector.extract_strided_slice %132 {offsets = [0, 16], sizes = [8, 8], strides = [1, 1]} : vector<8x32xbf16> to vector<8x8xbf16>
    %171 = vector.extract_strided_slice %134 {offsets = [16, 0], sizes = [8, 8], strides = [1, 1]} : vector<32x8xbf16> to vector<8x8xbf16>
    %cst_48 = arith.constant dense<0.000000e+00> : vector<8x8xf32>
    %172 = tpu.matmul %170, %171, %cst_48 {dimension_numbers = #tpu.dot_dimension_numbers<[1], [0], [0], [1], [0, 0, 1, 1], [], []>} : vector<8x8xbf16>, vector<8x8xbf16>, vector<8x8xf32> -> vector<8x8xf32>
    %173 = arith.addf %172, %130 : vector<8x8xf32>
    %cst_49 = arith.constant dense<0xFF800000> : vector<8xf32>
    %174 = vector.multi_reduction <maximumf>, %173, %cst_49 [1] : vector<8x8xf32> to vector<8xf32>
    %175 = vector.shape_cast %174 : vector<8xf32> to vector<8x1xf32>
    %176 = vector.broadcast %175 : vector<8x1xf32> to vector<8x8xf32>
    %177 = arith.subf %173, %176 : vector<8x8xf32>
    %178 = math.exp %177 : vector<8x8xf32>
    %cst_50 = arith.constant dense<0.000000e+00> : vector<8xf32>
    %179 = vector.multi_reduction <add>, %178, %cst_50 [1] : vector<8x8xf32> to vector<8xf32>
    %180 = vector.shape_cast %179 : vector<8xf32> to vector<8x1xf32>
    %181 = tpu.reciprocal %180 {approx = true} : vector<8x1xf32> -> vector<8x1xf32>
    %182 = vector.broadcast %181 : vector<8x1xf32> to vector<8x8xf32>
    %183 = arith.mulf %178, %182 : vector<8x8xf32>
    %184 = arith.truncf %183 : vector<8x8xf32> to vector<8x8xbf16>
    %185 = vector.extract_strided_slice %135 {offsets = [0, 16], sizes = [8, 8], strides = [1, 1]} : vector<8x32xbf16> to vector<8x8xbf16>
    %cst_51 = arith.constant dense<0.000000e+00> : vector<8x8xf32>
    %186 = tpu.matmul %184, %185, %cst_51 {dimension_numbers = #tpu.dot_dimension_numbers<[1], [0], [0], [1], [0, 0, 1, 1], [], []>} : vector<8x8xbf16>, vector<8x8xbf16>, vector<8x8xf32> -> vector<8x8xf32>
    %187 = vector.extract_strided_slice %132 {offsets = [0, 24], sizes = [8, 8], strides = [1, 1]} : vector<8x32xbf16> to vector<8x8xbf16>
    %188 = vector.extract_strided_slice %134 {offsets = [24, 0], sizes = [8, 8], strides = [1, 1]} : vector<32x8xbf16> to vector<8x8xbf16>
    %cst_52 = arith.constant dense<0.000000e+00> : vector<8x8xf32>
    %189 = tpu.matmul %187, %188, %cst_52 {dimension_numbers = #tpu.dot_dimension_numbers<[1], [0], [0], [1], [0, 0, 1, 1], [], []>} : vector<8x8xbf16>, vector<8x8xbf16>, vector<8x8xf32> -> vector<8x8xf32>
    %190 = arith.addf %189, %130 : vector<8x8xf32>
    %cst_53 = arith.constant dense<0xFF800000> : vector<8xf32>
    %191 = vector.multi_reduction <maximumf>, %190, %cst_53 [1] : vector<8x8xf32> to vector<8xf32>
    %192 = vector.shape_cast %191 : vector<8xf32> to vector<8x1xf32>
    %193 = vector.broadcast %192 : vector<8x1xf32> to vector<8x8xf32>
    %194 = arith.subf %190, %193 : vector<8x8xf32>
    %195 = math.exp %194 : vector<8x8xf32>
    %cst_54 = arith.constant dense<0.000000e+00> : vector<8xf32>
    %196 = vector.multi_reduction <add>, %195, %cst_54 [1] : vector<8x8xf32> to vector<8xf32>
    %197 = vector.shape_cast %196 : vector<8xf32> to vector<8x1xf32>
    %198 = tpu.reciprocal %197 {approx = true} : vector<8x1xf32> -> vector<8x1xf32>
    %199 = vector.broadcast %198 : vector<8x1xf32> to vector<8x8xf32>
    %200 = arith.mulf %195, %199 : vector<8x8xf32>
    %201 = arith.truncf %200 : vector<8x8xf32> to vector<8x8xbf16>
    %202 = vector.extract_strided_slice %135 {offsets = [0, 24], sizes = [8, 8], strides = [1, 1]} : vector<8x32xbf16> to vector<8x8xbf16>
    %cst_55 = arith.constant dense<0.000000e+00> : vector<8x8xf32>
    %203 = tpu.matmul %201, %202, %cst_55 {dimension_numbers = #tpu.dot_dimension_numbers<[1], [0], [0], [1], [0, 0, 1, 1], [], []>} : vector<8x8xbf16>, vector<8x8xbf16>, vector<8x8xf32> -> vector<8x8xf32>
    %204 = tpu.concatenate %152, %169, %186, %203 in 1 : vector<8x8xf32>, vector<8x8xf32>, vector<8x8xf32>, vector<8x8xf32> -> vector<8x32xf32>
    %205 = arith.truncf %204 : vector<8x32xf32> to vector<8x32xbf16>
    %cst_56 = arith.constant dense<0.000000e+00> : vector<8x32xf32>
    %206 = tpu.matmul %205, %131, %cst_56 {dimension_numbers = #tpu.dot_dimension_numbers<[1], [0], [0], [1], [0, 0, 1, 1], [], []>} : vector<8x32xbf16>, vector<32x32xbf16>, vector<8x32xf32> -> vector<8x32xf32>
    %207 = tpu.concatenate %125, %206 in 0 : vector<8x32xf32>, vector<8x32xf32> -> vector<16x32xf32>
    %208 = arith.addf %0, %207 : vector<16x32xf32>
    %209 = vector.extract_strided_slice %9 {offsets = [96], sizes = [32], strides = [1]} : vector<352xf32> to vector<32xf32>
    %210 = vector.shape_cast %209 : vector<32xf32> to vector<1x32xf32>
    %211 = vector.broadcast %210 : vector<1x32xf32> to vector<16x32xf32>
    %212 = arith.addf %208, %211 : vector<16x32xf32>
    %213 = vector.extract_strided_slice %3 {offsets = [1, 0, 0], sizes = [1, 1, 32], strides = [1, 1, 1]} : vector<7x2x32xf32> to vector<1x1x32xf32>
    %214 = vector.shape_cast %213 : vector<1x1x32xf32> to vector<32xf32>
    %215 = vector.extract_strided_slice %3 {offsets = [1, 1, 0], sizes = [1, 1, 32], strides = [1, 1, 1]} : vector<7x2x32xf32> to vector<1x1x32xf32>
    %216 = vector.shape_cast %215 : vector<1x1x32xf32> to vector<32xf32>
    %cst_57 = arith.constant dense<0.000000e+00> : vector<16xf32>
    %217 = vector.multi_reduction <add>, %212, %cst_57 [1] : vector<16x32xf32> to vector<16xf32>
    %218 = vector.shape_cast %217 : vector<16xf32> to vector<16x1xf32>
    %cst_58 = arith.constant 3.200000e+01 : f32
    %219 = vector.broadcast %cst_58 : f32 to vector<16x1xf32>
    %220 = arith.divf %218, %219 : vector<16x1xf32>
    %221 = vector.broadcast %220 : vector<16x1xf32> to vector<16x32xf32>
    %222 = arith.subf %212, %221 : vector<16x32xf32>
    %223 = arith.mulf %222, %222 : vector<16x32xf32>
    %cst_59 = arith.constant dense<0.000000e+00> : vector<16xf32>
    %224 = vector.multi_reduction <add>, %223, %cst_59 [1] : vector<16x32xf32> to vector<16xf32>
    %225 = vector.shape_cast %224 : vector<16xf32> to vector<16x1xf32>
    %cst_60 = arith.constant 0.0322580636 : f32
    %226 = vector.broadcast %cst_60 : f32 to vector<16x1xf32>
    %227 = arith.mulf %225, %226 : vector<16x1xf32>
    %228 = vector.broadcast %220 : vector<16x1xf32> to vector<16x32xf32>
    %229 = arith.subf %212, %228 : vector<16x32xf32>
    %230 = vector.shape_cast %214 : vector<32xf32> to vector<1x32xf32>
    %231 = vector.broadcast %230 : vector<1x32xf32> to vector<16x32xf32>
    %232 = arith.mulf %231, %229 : vector<16x32xf32>
    %233 = math.sqrt %227 : vector<16x1xf32>
    %cst_61 = arith.constant 9.99999997E-7 : f32
    %234 = vector.broadcast %cst_61 : f32 to vector<16x1xf32>
    %235 = arith.addf %233, %234 : vector<16x1xf32>
    %236 = vector.broadcast %235 : vector<16x1xf32> to vector<16x32xf32>
    %237 = arith.divf %232, %236 : vector<16x32xf32>
    %238 = vector.shape_cast %216 : vector<32xf32> to vector<1x32xf32>
    %239 = vector.broadcast %238 : vector<1x32xf32> to vector<16x32xf32>
    %240 = arith.addf %237, %239 : vector<16x32xf32>
    %241 = vector.extract_strided_slice %5 {offsets = [0, 128], sizes = [32, 32], strides = [1, 1]} : vector<32x320xbf16> to vector<32x32xbf16>
    %242 = arith.truncf %240 : vector<16x32xf32> to vector<16x32xbf16>
    %cst_62 = arith.constant dense<0.000000e+00> : vector<16x32xf32>
    %243 = tpu.matmul %242, %241, %cst_62 {dimension_numbers = #tpu.dot_dimension_numbers<[1], [0], [0], [1], [0, 0, 1, 1], [], []>} : vector<16x32xbf16>, vector<32x32xbf16>, vector<16x32xf32> -> vector<16x32xf32>
    %244 = vector.extract_strided_slice %9 {offsets = [128], sizes = [32], strides = [1]} : vector<352xf32> to vector<32xf32>
    %245 = vector.shape_cast %244 : vector<32xf32> to vector<1x32xf32>
    %246 = vector.broadcast %245 : vector<1x32xf32> to vector<16x32xf32>
    %247 = arith.addf %243, %246 : vector<16x32xf32>
    %c0_63 = arith.constant 0 : index
    %c0_64 = arith.constant 0 : index
    %c0_65 = arith.constant 0 : index
    %248 = vector.load %arg2[%c0_63, %c0_64, %c0_65] : memref<2x10x32xf32, #tpu.memory_space<vmem>>, vector<1x10x32xf32>
    %249 = vector.shape_cast %248 : vector<1x10x32xf32> to vector<10x32xf32>
    %250 = vector.extract_strided_slice %5 {offsets = [0, 160], sizes = [32, 64], strides = [1, 1]} : vector<32x320xbf16> to vector<32x64xbf16>
    %251 = arith.truncf %249 : vector<10x32xf32> to vector<10x32xbf16>
    %cst_66 = arith.constant dense<0.000000e+00> : vector<10x64xf32>
    %252 = tpu.matmul %251, %250, %cst_66 {dimension_numbers = #tpu.dot_dimension_numbers<[1], [0], [0], [1], [0, 0, 1, 1], [], []>} : vector<10x32xbf16>, vector<32x64xbf16>, vector<10x64xf32> -> vector<10x64xf32>
    %253 = vector.extract_strided_slice %9 {offsets = [160], sizes = [64], strides = [1]} : vector<352xf32> to vector<64xf32>
    %254 = vector.shape_cast %253 : vector<64xf32> to vector<1x64xf32>
    %255 = vector.broadcast %254 : vector<1x64xf32> to vector<10x64xf32>
    %256 = arith.addf %252, %255 : vector<10x64xf32>
    %257 = vector.extract_strided_slice %247 {offsets = [0, 0], sizes = [8, 32], strides = [1, 1]} : vector<16x32xf32> to vector<8x32xf32>
    %258 = vector.extract_strided_slice %256 {offsets = [0, 0], sizes = [10, 32], strides = [1, 1]} : vector<10x64xf32> to vector<10x32xf32>
    %259 = vector.extract_strided_slice %256 {offsets = [0, 32], sizes = [10, 32], strides = [1, 1]} : vector<10x64xf32> to vector<10x32xf32>
    %260 = vector.extract_strided_slice %1 {offsets = [0, 0, 0], sizes = [1, 8, 10], strides = [1, 1, 1]} : vector<2x8x10xf32> to vector<1x8x10xf32>
    %261 = vector.shape_cast %260 : vector<1x8x10xf32> to vector<8x10xf32>
    %262 = vector.extract_strided_slice %5 {offsets = [0, 224], sizes = [32, 32], strides = [1, 1]} : vector<32x320xbf16> to vector<32x32xbf16>
    %263 = arith.truncf %257 : vector<8x32xf32> to vector<8x32xbf16>
    %264 = tpu.transpose %258, [1, 0] : vector<10x32xf32> -> vector<32x10xf32>
    %265 = arith.truncf %264 : vector<32x10xf32> to vector<32x10xbf16>
    %266 = arith.truncf %259 : vector<10x32xf32> to vector<10x32xbf16>
    %267 = vector.extract_strided_slice %263 {offsets = [0, 0], sizes = [8, 8], strides = [1, 1]} : vector<8x32xbf16> to vector<8x8xbf16>
    %268 = vector.extract_strided_slice %265 {offsets = [0, 0], sizes = [8, 10], strides = [1, 1]} : vector<32x10xbf16> to vector<8x10xbf16>
    %cst_67 = arith.constant dense<0.000000e+00> : vector<8x10xf32>
    %269 = tpu.matmul %267, %268, %cst_67 {dimension_numbers = #tpu.dot_dimension_numbers<[1], [0], [0], [1], [0, 0, 1, 1], [], []>} : vector<8x8xbf16>, vector<8x10xbf16>, vector<8x10xf32> -> vector<8x10xf32>
    %270 = arith.addf %269, %261 : vector<8x10xf32>
    %cst_68 = arith.constant dense<0xFF800000> : vector<8xf32>
    %271 = vector.multi_reduction <maximumf>, %270, %cst_68 [1] : vector<8x10xf32> to vector<8xf32>
    %272 = vector.shape_cast %271 : vector<8xf32> to vector<8x1xf32>
    %273 = vector.broadcast %272 : vector<8x1xf32> to vector<8x10xf32>
    %274 = arith.subf %270, %273 : vector<8x10xf32>
    %275 = math.exp %274 : vector<8x10xf32>
    %cst_69 = arith.constant dense<0.000000e+00> : vector<8xf32>
    %276 = vector.multi_reduction <add>, %275, %cst_69 [1] : vector<8x10xf32> to vector<8xf32>
    %277 = vector.shape_cast %276 : vector<8xf32> to vector<8x1xf32>
    %278 = tpu.reciprocal %277 {approx = true} : vector<8x1xf32> -> vector<8x1xf32>
    %279 = vector.broadcast %278 : vector<8x1xf32> to vector<8x10xf32>
    %280 = arith.mulf %275, %279 : vector<8x10xf32>
    %281 = arith.truncf %280 : vector<8x10xf32> to vector<8x10xbf16>
    %282 = vector.extract_strided_slice %266 {offsets = [0, 0], sizes = [10, 8], strides = [1, 1]} : vector<10x32xbf16> to vector<10x8xbf16>
    %cst_70 = arith.constant dense<0.000000e+00> : vector<8x8xf32>
    %283 = tpu.matmul %281, %282, %cst_70 {dimension_numbers = #tpu.dot_dimension_numbers<[1], [0], [0], [1], [0, 0, 1, 1], [], []>} : vector<8x10xbf16>, vector<10x8xbf16>, vector<8x8xf32> -> vector<8x8xf32>
    %284 = vector.extract_strided_slice %263 {offsets = [0, 8], sizes = [8, 8], strides = [1, 1]} : vector<8x32xbf16> to vector<8x8xbf16>
    %285 = vector.extract_strided_slice %265 {offsets = [8, 0], sizes = [8, 10], strides = [1, 1]} : vector<32x10xbf16> to vector<8x10xbf16>
    %cst_71 = arith.constant dense<0.000000e+00> : vector<8x10xf32>
    %286 = tpu.matmul %284, %285, %cst_71 {dimension_numbers = #tpu.dot_dimension_numbers<[1], [0], [0], [1], [0, 0, 1, 1], [], []>} : vector<8x8xbf16>, vector<8x10xbf16>, vector<8x10xf32> -> vector<8x10xf32>
    %287 = arith.addf %286, %261 : vector<8x10xf32>
    %cst_72 = arith.constant dense<0xFF800000> : vector<8xf32>
    %288 = vector.multi_reduction <maximumf>, %287, %cst_72 [1] : vector<8x10xf32> to vector<8xf32>
    %289 = vector.shape_cast %288 : vector<8xf32> to vector<8x1xf32>
    %290 = vector.broadcast %289 : vector<8x1xf32> to vector<8x10xf32>
    %291 = arith.subf %287, %290 : vector<8x10xf32>
    %292 = math.exp %291 : vector<8x10xf32>
    %cst_73 = arith.constant dense<0.000000e+00> : vector<8xf32>
    %293 = vector.multi_reduction <add>, %292, %cst_73 [1] : vector<8x10xf32> to vector<8xf32>
    %294 = vector.shape_cast %293 : vector<8xf32> to vector<8x1xf32>
    %295 = tpu.reciprocal %294 {approx = true} : vector<8x1xf32> -> vector<8x1xf32>
    %296 = vector.broadcast %295 : vector<8x1xf32> to vector<8x10xf32>
    %297 = arith.mulf %292, %296 : vector<8x10xf32>
    %298 = arith.truncf %297 : vector<8x10xf32> to vector<8x10xbf16>
    %299 = vector.extract_strided_slice %266 {offsets = [0, 8], sizes = [10, 8], strides = [1, 1]} : vector<10x32xbf16> to vector<10x8xbf16>
    %cst_74 = arith.constant dense<0.000000e+00> : vector<8x8xf32>
    %300 = tpu.matmul %298, %299, %cst_74 {dimension_numbers = #tpu.dot_dimension_numbers<[1], [0], [0], [1], [0, 0, 1, 1], [], []>} : vector<8x10xbf16>, vector<10x8xbf16>, vector<8x8xf32> -> vector<8x8xf32>
    %301 = vector.extract_strided_slice %263 {offsets = [0, 16], sizes = [8, 8], strides = [1, 1]} : vector<8x32xbf16> to vector<8x8xbf16>
    %302 = vector.extract_strided_slice %265 {offsets = [16, 0], sizes = [8, 10], strides = [1, 1]} : vector<32x10xbf16> to vector<8x10xbf16>
    %cst_75 = arith.constant dense<0.000000e+00> : vector<8x10xf32>
    %303 = tpu.matmul %301, %302, %cst_75 {dimension_numbers = #tpu.dot_dimension_numbers<[1], [0], [0], [1], [0, 0, 1, 1], [], []>} : vector<8x8xbf16>, vector<8x10xbf16>, vector<8x10xf32> -> vector<8x10xf32>
    %304 = arith.addf %303, %261 : vector<8x10xf32>
    %cst_76 = arith.constant dense<0xFF800000> : vector<8xf32>
    %305 = vector.multi_reduction <maximumf>, %304, %cst_76 [1] : vector<8x10xf32> to vector<8xf32>
    %306 = vector.shape_cast %305 : vector<8xf32> to vector<8x1xf32>
    %307 = vector.broadcast %306 : vector<8x1xf32> to vector<8x10xf32>
    %308 = arith.subf %304, %307 : vector<8x10xf32>
    %309 = math.exp %308 : vector<8x10xf32>
    %cst_77 = arith.constant dense<0.000000e+00> : vector<8xf32>
    %310 = vector.multi_reduction <add>, %309, %cst_77 [1] : vector<8x10xf32> to vector<8xf32>
    %311 = vector.shape_cast %310 : vector<8xf32> to vector<8x1xf32>
    %312 = tpu.reciprocal %311 {approx = true} : vector<8x1xf32> -> vector<8x1xf32>
    %313 = vector.broadcast %312 : vector<8x1xf32> to vector<8x10xf32>
    %314 = arith.mulf %309, %313 : vector<8x10xf32>
    %315 = arith.truncf %314 : vector<8x10xf32> to vector<8x10xbf16>
    %316 = vector.extract_strided_slice %266 {offsets = [0, 16], sizes = [10, 8], strides = [1, 1]} : vector<10x32xbf16> to vector<10x8xbf16>
    %cst_78 = arith.constant dense<0.000000e+00> : vector<8x8xf32>
    %317 = tpu.matmul %315, %316, %cst_78 {dimension_numbers = #tpu.dot_dimension_numbers<[1], [0], [0], [1], [0, 0, 1, 1], [], []>} : vector<8x10xbf16>, vector<10x8xbf16>, vector<8x8xf32> -> vector<8x8xf32>
    %318 = vector.extract_strided_slice %263 {offsets = [0, 24], sizes = [8, 8], strides = [1, 1]} : vector<8x32xbf16> to vector<8x8xbf16>
    %319 = vector.extract_strided_slice %265 {offsets = [24, 0], sizes = [8, 10], strides = [1, 1]} : vector<32x10xbf16> to vector<8x10xbf16>
    %cst_79 = arith.constant dense<0.000000e+00> : vector<8x10xf32>
    %320 = tpu.matmul %318, %319, %cst_79 {dimension_numbers = #tpu.dot_dimension_numbers<[1], [0], [0], [1], [0, 0, 1, 1], [], []>} : vector<8x8xbf16>, vector<8x10xbf16>, vector<8x10xf32> -> vector<8x10xf32>
    %321 = arith.addf %320, %261 : vector<8x10xf32>
    %cst_80 = arith.constant dense<0xFF800000> : vector<8xf32>
    %322 = vector.multi_reduction <maximumf>, %321, %cst_80 [1] : vector<8x10xf32> to vector<8xf32>
    %323 = vector.shape_cast %322 : vector<8xf32> to vector<8x1xf32>
    %324 = vector.broadcast %323 : vector<8x1xf32> to vector<8x10xf32>
    %325 = arith.subf %321, %324 : vector<8x10xf32>
    %326 = math.exp %325 : vector<8x10xf32>
    %cst_81 = arith.constant dense<0.000000e+00> : vector<8xf32>
    %327 = vector.multi_reduction <add>, %326, %cst_81 [1] : vector<8x10xf32> to vector<8xf32>
    %328 = vector.shape_cast %327 : vector<8xf32> to vector<8x1xf32>
    %329 = tpu.reciprocal %328 {approx = true} : vector<8x1xf32> -> vector<8x1xf32>
    %330 = vector.broadcast %329 : vector<8x1xf32> to vector<8x10xf32>
    %331 = arith.mulf %326, %330 : vector<8x10xf32>
    %332 = arith.truncf %331 : vector<8x10xf32> to vector<8x10xbf16>
    %333 = vector.extract_strided_slice %266 {offsets = [0, 24], sizes = [10, 8], strides = [1, 1]} : vector<10x32xbf16> to vector<10x8xbf16>
    %cst_82 = arith.constant dense<0.000000e+00> : vector<8x8xf32>
    %334 = tpu.matmul %332, %333, %cst_82 {dimension_numbers = #tpu.dot_dimension_numbers<[1], [0], [0], [1], [0, 0, 1, 1], [], []>} : vector<8x10xbf16>, vector<10x8xbf16>, vector<8x8xf32> -> vector<8x8xf32>
    %335 = tpu.concatenate %283, %300, %317, %334 in 1 : vector<8x8xf32>, vector<8x8xf32>, vector<8x8xf32>, vector<8x8xf32> -> vector<8x32xf32>
    %336 = arith.truncf %335 : vector<8x32xf32> to vector<8x32xbf16>
    %cst_83 = arith.constant dense<0.000000e+00> : vector<8x32xf32>
    %337 = tpu.matmul %336, %262, %cst_83 {dimension_numbers = #tpu.dot_dimension_numbers<[1], [0], [0], [1], [0, 0, 1, 1], [], []>} : vector<8x32xbf16>, vector<32x32xbf16>, vector<8x32xf32> -> vector<8x32xf32>
    %c1 = arith.constant 1 : index
    %c0_84 = arith.constant 0 : index
    %c0_85 = arith.constant 0 : index
    %338 = vector.load %arg2[%c1, %c0_84, %c0_85] : memref<2x10x32xf32, #tpu.memory_space<vmem>>, vector<1x10x32xf32>
    %339 = vector.shape_cast %338 : vector<1x10x32xf32> to vector<10x32xf32>
    %340 = vector.extract_strided_slice %5 {offsets = [0, 160], sizes = [32, 64], strides = [1, 1]} : vector<32x320xbf16> to vector<32x64xbf16>
    %341 = arith.truncf %339 : vector<10x32xf32> to vector<10x32xbf16>
    %cst_86 = arith.constant dense<0.000000e+00> : vector<10x64xf32>
    %342 = tpu.matmul %341, %340, %cst_86 {dimension_numbers = #tpu.dot_dimension_numbers<[1], [0], [0], [1], [0, 0, 1, 1], [], []>} : vector<10x32xbf16>, vector<32x64xbf16>, vector<10x64xf32> -> vector<10x64xf32>
    %343 = vector.extract_strided_slice %9 {offsets = [160], sizes = [64], strides = [1]} : vector<352xf32> to vector<64xf32>
    %344 = vector.shape_cast %343 : vector<64xf32> to vector<1x64xf32>
    %345 = vector.broadcast %344 : vector<1x64xf32> to vector<10x64xf32>
    %346 = arith.addf %342, %345 : vector<10x64xf32>
    %347 = vector.extract_strided_slice %247 {offsets = [8, 0], sizes = [8, 32], strides = [1, 1]} : vector<16x32xf32> to vector<8x32xf32>
    %348 = vector.extract_strided_slice %346 {offsets = [0, 0], sizes = [10, 32], strides = [1, 1]} : vector<10x64xf32> to vector<10x32xf32>
    %349 = vector.extract_strided_slice %346 {offsets = [0, 32], sizes = [10, 32], strides = [1, 1]} : vector<10x64xf32> to vector<10x32xf32>
    %350 = vector.extract_strided_slice %1 {offsets = [1, 0, 0], sizes = [1, 8, 10], strides = [1, 1, 1]} : vector<2x8x10xf32> to vector<1x8x10xf32>
    %351 = vector.shape_cast %350 : vector<1x8x10xf32> to vector<8x10xf32>
    %352 = vector.extract_strided_slice %5 {offsets = [0, 224], sizes = [32, 32], strides = [1, 1]} : vector<32x320xbf16> to vector<32x32xbf16>
    %353 = arith.truncf %347 : vector<8x32xf32> to vector<8x32xbf16>
    %354 = tpu.transpose %348, [1, 0] : vector<10x32xf32> -> vector<32x10xf32>
    %355 = arith.truncf %354 : vector<32x10xf32> to vector<32x10xbf16>
    %356 = arith.truncf %349 : vector<10x32xf32> to vector<10x32xbf16>
    %357 = vector.extract_strided_slice %353 {offsets = [0, 0], sizes = [8, 8], strides = [1, 1]} : vector<8x32xbf16> to vector<8x8xbf16>
    %358 = vector.extract_strided_slice %355 {offsets = [0, 0], sizes = [8, 10], strides = [1, 1]} : vector<32x10xbf16> to vector<8x10xbf16>
    %cst_87 = arith.constant dense<0.000000e+00> : vector<8x10xf32>
    %359 = tpu.matmul %357, %358, %cst_87 {dimension_numbers = #tpu.dot_dimension_numbers<[1], [0], [0], [1], [0, 0, 1, 1], [], []>} : vector<8x8xbf16>, vector<8x10xbf16>, vector<8x10xf32> -> vector<8x10xf32>
    %360 = arith.addf %359, %351 : vector<8x10xf32>
    %cst_88 = arith.constant dense<0xFF800000> : vector<8xf32>
    %361 = vector.multi_reduction <maximumf>, %360, %cst_88 [1] : vector<8x10xf32> to vector<8xf32>
    %362 = vector.shape_cast %361 : vector<8xf32> to vector<8x1xf32>
    %363 = vector.broadcast %362 : vector<8x1xf32> to vector<8x10xf32>
    %364 = arith.subf %360, %363 : vector<8x10xf32>
    %365 = math.exp %364 : vector<8x10xf32>
    %cst_89 = arith.constant dense<0.000000e+00> : vector<8xf32>
    %366 = vector.multi_reduction <add>, %365, %cst_89 [1] : vector<8x10xf32> to vector<8xf32>
    %367 = vector.shape_cast %366 : vector<8xf32> to vector<8x1xf32>
    %368 = tpu.reciprocal %367 {approx = true} : vector<8x1xf32> -> vector<8x1xf32>
    %369 = vector.broadcast %368 : vector<8x1xf32> to vector<8x10xf32>
    %370 = arith.mulf %365, %369 : vector<8x10xf32>
    %371 = arith.truncf %370 : vector<8x10xf32> to vector<8x10xbf16>
    %372 = vector.extract_strided_slice %356 {offsets = [0, 0], sizes = [10, 8], strides = [1, 1]} : vector<10x32xbf16> to vector<10x8xbf16>
    %cst_90 = arith.constant dense<0.000000e+00> : vector<8x8xf32>
    %373 = tpu.matmul %371, %372, %cst_90 {dimension_numbers = #tpu.dot_dimension_numbers<[1], [0], [0], [1], [0, 0, 1, 1], [], []>} : vector<8x10xbf16>, vector<10x8xbf16>, vector<8x8xf32> -> vector<8x8xf32>
    %374 = vector.extract_strided_slice %353 {offsets = [0, 8], sizes = [8, 8], strides = [1, 1]} : vector<8x32xbf16> to vector<8x8xbf16>
    %375 = vector.extract_strided_slice %355 {offsets = [8, 0], sizes = [8, 10], strides = [1, 1]} : vector<32x10xbf16> to vector<8x10xbf16>
    %cst_91 = arith.constant dense<0.000000e+00> : vector<8x10xf32>
    %376 = tpu.matmul %374, %375, %cst_91 {dimension_numbers = #tpu.dot_dimension_numbers<[1], [0], [0], [1], [0, 0, 1, 1], [], []>} : vector<8x8xbf16>, vector<8x10xbf16>, vector<8x10xf32> -> vector<8x10xf32>
    %377 = arith.addf %376, %351 : vector<8x10xf32>
    %cst_92 = arith.constant dense<0xFF800000> : vector<8xf32>
    %378 = vector.multi_reduction <maximumf>, %377, %cst_92 [1] : vector<8x10xf32> to vector<8xf32>
    %379 = vector.shape_cast %378 : vector<8xf32> to vector<8x1xf32>
    %380 = vector.broadcast %379 : vector<8x1xf32> to vector<8x10xf32>
    %381 = arith.subf %377, %380 : vector<8x10xf32>
    %382 = math.exp %381 : vector<8x10xf32>
    %cst_93 = arith.constant dense<0.000000e+00> : vector<8xf32>
    %383 = vector.multi_reduction <add>, %382, %cst_93 [1] : vector<8x10xf32> to vector<8xf32>
    %384 = vector.shape_cast %383 : vector<8xf32> to vector<8x1xf32>
    %385 = tpu.reciprocal %384 {approx = true} : vector<8x1xf32> -> vector<8x1xf32>
    %386 = vector.broadcast %385 : vector<8x1xf32> to vector<8x10xf32>
    %387 = arith.mulf %382, %386 : vector<8x10xf32>
    %388 = arith.truncf %387 : vector<8x10xf32> to vector<8x10xbf16>
    %389 = vector.extract_strided_slice %356 {offsets = [0, 8], sizes = [10, 8], strides = [1, 1]} : vector<10x32xbf16> to vector<10x8xbf16>
    %cst_94 = arith.constant dense<0.000000e+00> : vector<8x8xf32>
    %390 = tpu.matmul %388, %389, %cst_94 {dimension_numbers = #tpu.dot_dimension_numbers<[1], [0], [0], [1], [0, 0, 1, 1], [], []>} : vector<8x10xbf16>, vector<10x8xbf16>, vector<8x8xf32> -> vector<8x8xf32>
    %391 = vector.extract_strided_slice %353 {offsets = [0, 16], sizes = [8, 8], strides = [1, 1]} : vector<8x32xbf16> to vector<8x8xbf16>
    %392 = vector.extract_strided_slice %355 {offsets = [16, 0], sizes = [8, 10], strides = [1, 1]} : vector<32x10xbf16> to vector<8x10xbf16>
    %cst_95 = arith.constant dense<0.000000e+00> : vector<8x10xf32>
    %393 = tpu.matmul %391, %392, %cst_95 {dimension_numbers = #tpu.dot_dimension_numbers<[1], [0], [0], [1], [0, 0, 1, 1], [], []>} : vector<8x8xbf16>, vector<8x10xbf16>, vector<8x10xf32> -> vector<8x10xf32>
    %394 = arith.addf %393, %351 : vector<8x10xf32>
    %cst_96 = arith.constant dense<0xFF800000> : vector<8xf32>
    %395 = vector.multi_reduction <maximumf>, %394, %cst_96 [1] : vector<8x10xf32> to vector<8xf32>
    %396 = vector.shape_cast %395 : vector<8xf32> to vector<8x1xf32>
    %397 = vector.broadcast %396 : vector<8x1xf32> to vector<8x10xf32>
    %398 = arith.subf %394, %397 : vector<8x10xf32>
    %399 = math.exp %398 : vector<8x10xf32>
    %cst_97 = arith.constant dense<0.000000e+00> : vector<8xf32>
    %400 = vector.multi_reduction <add>, %399, %cst_97 [1] : vector<8x10xf32> to vector<8xf32>
    %401 = vector.shape_cast %400 : vector<8xf32> to vector<8x1xf32>
    %402 = tpu.reciprocal %401 {approx = true} : vector<8x1xf32> -> vector<8x1xf32>
    %403 = vector.broadcast %402 : vector<8x1xf32> to vector<8x10xf32>
    %404 = arith.mulf %399, %403 : vector<8x10xf32>
    %405 = arith.truncf %404 : vector<8x10xf32> to vector<8x10xbf16>
    %406 = vector.extract_strided_slice %356 {offsets = [0, 16], sizes = [10, 8], strides = [1, 1]} : vector<10x32xbf16> to vector<10x8xbf16>
    %cst_98 = arith.constant dense<0.000000e+00> : vector<8x8xf32>
    %407 = tpu.matmul %405, %406, %cst_98 {dimension_numbers = #tpu.dot_dimension_numbers<[1], [0], [0], [1], [0, 0, 1, 1], [], []>} : vector<8x10xbf16>, vector<10x8xbf16>, vector<8x8xf32> -> vector<8x8xf32>
    %408 = vector.extract_strided_slice %353 {offsets = [0, 24], sizes = [8, 8], strides = [1, 1]} : vector<8x32xbf16> to vector<8x8xbf16>
    %409 = vector.extract_strided_slice %355 {offsets = [24, 0], sizes = [8, 10], strides = [1, 1]} : vector<32x10xbf16> to vector<8x10xbf16>
    %cst_99 = arith.constant dense<0.000000e+00> : vector<8x10xf32>
    %410 = tpu.matmul %408, %409, %cst_99 {dimension_numbers = #tpu.dot_dimension_numbers<[1], [0], [0], [1], [0, 0, 1, 1], [], []>} : vector<8x8xbf16>, vector<8x10xbf16>, vector<8x10xf32> -> vector<8x10xf32>
    %411 = arith.addf %410, %351 : vector<8x10xf32>
    %cst_100 = arith.constant dense<0xFF800000> : vector<8xf32>
    %412 = vector.multi_reduction <maximumf>, %411, %cst_100 [1] : vector<8x10xf32> to vector<8xf32>
    %413 = vector.shape_cast %412 : vector<8xf32> to vector<8x1xf32>
    %414 = vector.broadcast %413 : vector<8x1xf32> to vector<8x10xf32>
    %415 = arith.subf %411, %414 : vector<8x10xf32>
    %416 = math.exp %415 : vector<8x10xf32>
    %cst_101 = arith.constant dense<0.000000e+00> : vector<8xf32>
    %417 = vector.multi_reduction <add>, %416, %cst_101 [1] : vector<8x10xf32> to vector<8xf32>
    %418 = vector.shape_cast %417 : vector<8xf32> to vector<8x1xf32>
    %419 = tpu.reciprocal %418 {approx = true} : vector<8x1xf32> -> vector<8x1xf32>
    %420 = vector.broadcast %419 : vector<8x1xf32> to vector<8x10xf32>
    %421 = arith.mulf %416, %420 : vector<8x10xf32>
    %422 = arith.truncf %421 : vector<8x10xf32> to vector<8x10xbf16>
    %423 = vector.extract_strided_slice %356 {offsets = [0, 24], sizes = [10, 8], strides = [1, 1]} : vector<10x32xbf16> to vector<10x8xbf16>
    %cst_102 = arith.constant dense<0.000000e+00> : vector<8x8xf32>
    %424 = tpu.matmul %422, %423, %cst_102 {dimension_numbers = #tpu.dot_dimension_numbers<[1], [0], [0], [1], [0, 0, 1, 1], [], []>} : vector<8x10xbf16>, vector<10x8xbf16>, vector<8x8xf32> -> vector<8x8xf32>
    %425 = tpu.concatenate %373, %390, %407, %424 in 1 : vector<8x8xf32>, vector<8x8xf32>, vector<8x8xf32>, vector<8x8xf32> -> vector<8x32xf32>
    %426 = arith.truncf %425 : vector<8x32xf32> to vector<8x32xbf16>
    %cst_103 = arith.constant dense<0.000000e+00> : vector<8x32xf32>
    %427 = tpu.matmul %426, %352, %cst_103 {dimension_numbers = #tpu.dot_dimension_numbers<[1], [0], [0], [1], [0, 0, 1, 1], [], []>} : vector<8x32xbf16>, vector<32x32xbf16>, vector<8x32xf32> -> vector<8x32xf32>
    %428 = tpu.concatenate %337, %427 in 0 : vector<8x32xf32>, vector<8x32xf32> -> vector<16x32xf32>
    %429 = arith.addf %212, %428 : vector<16x32xf32>
    %430 = vector.extract_strided_slice %9 {offsets = [224], sizes = [32], strides = [1]} : vector<352xf32> to vector<32xf32>
    %431 = vector.shape_cast %430 : vector<32xf32> to vector<1x32xf32>
    %432 = vector.broadcast %431 : vector<1x32xf32> to vector<16x32xf32>
    %433 = arith.addf %429, %432 : vector<16x32xf32>
    %434 = vector.extract_strided_slice %3 {offsets = [2, 0, 0], sizes = [1, 1, 32], strides = [1, 1, 1]} : vector<7x2x32xf32> to vector<1x1x32xf32>
    %435 = vector.shape_cast %434 : vector<1x1x32xf32> to vector<32xf32>
    %436 = vector.extract_strided_slice %3 {offsets = [2, 1, 0], sizes = [1, 1, 32], strides = [1, 1, 1]} : vector<7x2x32xf32> to vector<1x1x32xf32>
    %437 = vector.shape_cast %436 : vector<1x1x32xf32> to vector<32xf32>
    %cst_104 = arith.constant dense<0.000000e+00> : vector<16xf32>
    %438 = vector.multi_reduction <add>, %433, %cst_104 [1] : vector<16x32xf32> to vector<16xf32>
    %439 = vector.shape_cast %438 : vector<16xf32> to vector<16x1xf32>
    %cst_105 = arith.constant 3.200000e+01 : f32
    %440 = vector.broadcast %cst_105 : f32 to vector<16x1xf32>
    %441 = arith.divf %439, %440 : vector<16x1xf32>
    %442 = vector.broadcast %441 : vector<16x1xf32> to vector<16x32xf32>
    %443 = arith.subf %433, %442 : vector<16x32xf32>
    %444 = arith.mulf %443, %443 : vector<16x32xf32>
    %cst_106 = arith.constant dense<0.000000e+00> : vector<16xf32>
    %445 = vector.multi_reduction <add>, %444, %cst_106 [1] : vector<16x32xf32> to vector<16xf32>
    %446 = vector.shape_cast %445 : vector<16xf32> to vector<16x1xf32>
    %cst_107 = arith.constant 0.0322580636 : f32
    %447 = vector.broadcast %cst_107 : f32 to vector<16x1xf32>
    %448 = arith.mulf %446, %447 : vector<16x1xf32>
    %449 = vector.broadcast %441 : vector<16x1xf32> to vector<16x32xf32>
    %450 = arith.subf %433, %449 : vector<16x32xf32>
    %451 = vector.shape_cast %435 : vector<32xf32> to vector<1x32xf32>
    %452 = vector.broadcast %451 : vector<1x32xf32> to vector<16x32xf32>
    %453 = arith.mulf %452, %450 : vector<16x32xf32>
    %454 = math.sqrt %448 : vector<16x1xf32>
    %cst_108 = arith.constant 9.99999997E-7 : f32
    %455 = vector.broadcast %cst_108 : f32 to vector<16x1xf32>
    %456 = arith.addf %454, %455 : vector<16x1xf32>
    %457 = vector.broadcast %456 : vector<16x1xf32> to vector<16x32xf32>
    %458 = arith.divf %453, %457 : vector<16x32xf32>
    %459 = vector.shape_cast %437 : vector<32xf32> to vector<1x32xf32>
    %460 = vector.broadcast %459 : vector<1x32xf32> to vector<16x32xf32>
    %461 = arith.addf %458, %460 : vector<16x32xf32>
    %462 = vector.extract_strided_slice %5 {offsets = [0, 256], sizes = [32, 64], strides = [1, 1]} : vector<32x320xbf16> to vector<32x64xbf16>
    %463 = arith.truncf %461 : vector<16x32xf32> to vector<16x32xbf16>
    %cst_109 = arith.constant dense<0.000000e+00> : vector<16x64xf32>
    %464 = tpu.matmul %463, %462, %cst_109 {dimension_numbers = #tpu.dot_dimension_numbers<[1], [0], [0], [1], [0, 0, 1, 1], [], []>} : vector<16x32xbf16>, vector<32x64xbf16>, vector<16x64xf32> -> vector<16x64xf32>
    %465 = vector.extract_strided_slice %9 {offsets = [256], sizes = [64], strides = [1]} : vector<352xf32> to vector<64xf32>
    %466 = vector.shape_cast %465 : vector<64xf32> to vector<1x64xf32>
    %467 = vector.broadcast %466 : vector<1x64xf32> to vector<16x64xf32>
    %468 = arith.addf %464, %467 : vector<16x64xf32>
    %cst_110 = arith.constant 0.000000e+00 : f32
    %469 = vector.broadcast %cst_110 : f32 to vector<16x64xf32>
    %470 = arith.maximumf %468, %469 : vector<16x64xf32>
    %471 = arith.truncf %470 : vector<16x64xf32> to vector<16x64xbf16>
    %cst_111 = arith.constant dense<0.000000e+00> : vector<16x32xf32>
    %472 = tpu.matmul %471, %7, %cst_111 {dimension_numbers = #tpu.dot_dimension_numbers<[1], [0], [0], [1], [0, 0, 1, 1], [], []>} : vector<16x64xbf16>, vector<64x32xbf16>, vector<16x32xf32> -> vector<16x32xf32>
    %473 = arith.addf %433, %472 : vector<16x32xf32>
    %474 = vector.extract_strided_slice %9 {offsets = [320], sizes = [32], strides = [1]} : vector<352xf32> to vector<32xf32>
    %475 = vector.shape_cast %474 : vector<32xf32> to vector<1x32xf32>
    %476 = vector.broadcast %475 : vector<1x32xf32> to vector<16x32xf32>
    %477 = arith.addf %473, %476 : vector<16x32xf32>
    %c1_112 = arith.constant 1 : index
    %c0_113 = arith.constant 0 : index
    %c0_114 = arith.constant 0 : index
    %478 = vector.load %arg5[%c1_112, %c0_113, %c0_114] : memref<2x32x320xbf16, #tpu.memory_space<vmem>>, vector<1x32x320xbf16>
    %479 = vector.shape_cast %478 : vector<1x32x320xbf16> to vector<32x320xbf16>
    %c1_115 = arith.constant 1 : index
    %c0_116 = arith.constant 0 : index
    %c0_117 = arith.constant 0 : index
    %480 = vector.load %arg6[%c1_115, %c0_116, %c0_117] : memref<2x64x32xbf16, #tpu.memory_space<vmem>>, vector<1x64x32xbf16>
    %481 = vector.shape_cast %480 : vector<1x64x32xbf16> to vector<64x32xbf16>
    %c1_118 = arith.constant 1 : index
    %c0_119 = arith.constant 0 : index
    %482 = vector.load %arg7[%c1_118, %c0_119] : memref<2x352xf32, #tpu.memory_space<vmem>>, vector<1x352xf32>
    %483 = vector.shape_cast %482 : vector<1x352xf32> to vector<352xf32>
    %484 = vector.extract_strided_slice %3 {offsets = [3, 0, 0], sizes = [1, 1, 32], strides = [1, 1, 1]} : vector<7x2x32xf32> to vector<1x1x32xf32>
    %485 = vector.shape_cast %484 : vector<1x1x32xf32> to vector<32xf32>
    %486 = vector.extract_strided_slice %3 {offsets = [3, 1, 0], sizes = [1, 1, 32], strides = [1, 1, 1]} : vector<7x2x32xf32> to vector<1x1x32xf32>
    %487 = vector.shape_cast %486 : vector<1x1x32xf32> to vector<32xf32>
    %cst_120 = arith.constant dense<0.000000e+00> : vector<16xf32>
    %488 = vector.multi_reduction <add>, %477, %cst_120 [1] : vector<16x32xf32> to vector<16xf32>
    %489 = vector.shape_cast %488 : vector<16xf32> to vector<16x1xf32>
    %cst_121 = arith.constant 3.200000e+01 : f32
    %490 = vector.broadcast %cst_121 : f32 to vector<16x1xf32>
    %491 = arith.divf %489, %490 : vector<16x1xf32>
    %492 = vector.broadcast %491 : vector<16x1xf32> to vector<16x32xf32>
    %493 = arith.subf %477, %492 : vector<16x32xf32>
    %494 = arith.mulf %493, %493 : vector<16x32xf32>
    %cst_122 = arith.constant dense<0.000000e+00> : vector<16xf32>
    %495 = vector.multi_reduction <add>, %494, %cst_122 [1] : vector<16x32xf32> to vector<16xf32>
    %496 = vector.shape_cast %495 : vector<16xf32> to vector<16x1xf32>
    %cst_123 = arith.constant 0.0322580636 : f32
    %497 = vector.broadcast %cst_123 : f32 to vector<16x1xf32>
    %498 = arith.mulf %496, %497 : vector<16x1xf32>
    %499 = vector.broadcast %491 : vector<16x1xf32> to vector<16x32xf32>
    %500 = arith.subf %477, %499 : vector<16x32xf32>
    %501 = vector.shape_cast %485 : vector<32xf32> to vector<1x32xf32>
    %502 = vector.broadcast %501 : vector<1x32xf32> to vector<16x32xf32>
    %503 = arith.mulf %502, %500 : vector<16x32xf32>
    %504 = math.sqrt %498 : vector<16x1xf32>
    %cst_124 = arith.constant 9.99999997E-7 : f32
    %505 = vector.broadcast %cst_124 : f32 to vector<16x1xf32>
    %506 = arith.addf %504, %505 : vector<16x1xf32>
    %507 = vector.broadcast %506 : vector<16x1xf32> to vector<16x32xf32>
    %508 = arith.divf %503, %507 : vector<16x32xf32>
    %509 = vector.shape_cast %487 : vector<32xf32> to vector<1x32xf32>
    %510 = vector.broadcast %509 : vector<1x32xf32> to vector<16x32xf32>
    %511 = arith.addf %508, %510 : vector<16x32xf32>
    %512 = vector.extract_strided_slice %479 {offsets = [0, 0], sizes = [32, 96], strides = [1, 1]} : vector<32x320xbf16> to vector<32x96xbf16>
    %513 = arith.truncf %511 : vector<16x32xf32> to vector<16x32xbf16>
    %cst_125 = arith.constant dense<0.000000e+00> : vector<16x96xf32>
    %514 = tpu.matmul %513, %512, %cst_125 {dimension_numbers = #tpu.dot_dimension_numbers<[1], [0], [0], [1], [0, 0, 1, 1], [], []>} : vector<16x32xbf16>, vector<32x96xbf16>, vector<16x96xf32> -> vector<16x96xf32>
    %515 = vector.extract_strided_slice %483 {offsets = [0], sizes = [96], strides = [1]} : vector<352xf32> to vector<96xf32>
    %516 = vector.shape_cast %515 : vector<96xf32> to vector<1x96xf32>
    %517 = vector.broadcast %516 : vector<1x96xf32> to vector<16x96xf32>
    %518 = arith.addf %514, %517 : vector<16x96xf32>
    %519 = vector.extract_strided_slice %518 {offsets = [0, 0], sizes = [8, 32], strides = [1, 1]} : vector<16x96xf32> to vector<8x32xf32>
    %520 = vector.extract_strided_slice %518 {offsets = [0, 32], sizes = [8, 32], strides = [1, 1]} : vector<16x96xf32> to vector<8x32xf32>
    %521 = vector.extract_strided_slice %518 {offsets = [0, 64], sizes = [8, 32], strides = [1, 1]} : vector<16x96xf32> to vector<8x32xf32>
    %522 = vector.extract_strided_slice %2 {offsets = [0, 0, 0], sizes = [1, 8, 8], strides = [1, 1, 1]} : vector<2x8x8xf32> to vector<1x8x8xf32>
    %523 = vector.shape_cast %522 : vector<1x8x8xf32> to vector<8x8xf32>
    %524 = vector.extract_strided_slice %479 {offsets = [0, 96], sizes = [32, 32], strides = [1, 1]} : vector<32x320xbf16> to vector<32x32xbf16>
    %525 = arith.truncf %519 : vector<8x32xf32> to vector<8x32xbf16>
    %526 = tpu.transpose %520, [1, 0] : vector<8x32xf32> -> vector<32x8xf32>
    %527 = arith.truncf %526 : vector<32x8xf32> to vector<32x8xbf16>
    %528 = arith.truncf %521 : vector<8x32xf32> to vector<8x32xbf16>
    %529 = vector.extract_strided_slice %525 {offsets = [0, 0], sizes = [8, 8], strides = [1, 1]} : vector<8x32xbf16> to vector<8x8xbf16>
    %530 = vector.extract_strided_slice %527 {offsets = [0, 0], sizes = [8, 8], strides = [1, 1]} : vector<32x8xbf16> to vector<8x8xbf16>
    %cst_126 = arith.constant dense<0.000000e+00> : vector<8x8xf32>
    %531 = tpu.matmul %529, %530, %cst_126 {dimension_numbers = #tpu.dot_dimension_numbers<[1], [0], [0], [1], [0, 0, 1, 1], [], []>} : vector<8x8xbf16>, vector<8x8xbf16>, vector<8x8xf32> -> vector<8x8xf32>
    %532 = arith.addf %531, %523 : vector<8x8xf32>
    %cst_127 = arith.constant dense<0xFF800000> : vector<8xf32>
    %533 = vector.multi_reduction <maximumf>, %532, %cst_127 [1] : vector<8x8xf32> to vector<8xf32>
    %534 = vector.shape_cast %533 : vector<8xf32> to vector<8x1xf32>
    %535 = vector.broadcast %534 : vector<8x1xf32> to vector<8x8xf32>
    %536 = arith.subf %532, %535 : vector<8x8xf32>
    %537 = math.exp %536 : vector<8x8xf32>
    %cst_128 = arith.constant dense<0.000000e+00> : vector<8xf32>
    %538 = vector.multi_reduction <add>, %537, %cst_128 [1] : vector<8x8xf32> to vector<8xf32>
    %539 = vector.shape_cast %538 : vector<8xf32> to vector<8x1xf32>
    %540 = tpu.reciprocal %539 {approx = true} : vector<8x1xf32> -> vector<8x1xf32>
    %541 = vector.broadcast %540 : vector<8x1xf32> to vector<8x8xf32>
    %542 = arith.mulf %537, %541 : vector<8x8xf32>
    %543 = arith.truncf %542 : vector<8x8xf32> to vector<8x8xbf16>
    %544 = vector.extract_strided_slice %528 {offsets = [0, 0], sizes = [8, 8], strides = [1, 1]} : vector<8x32xbf16> to vector<8x8xbf16>
    %cst_129 = arith.constant dense<0.000000e+00> : vector<8x8xf32>
    %545 = tpu.matmul %543, %544, %cst_129 {dimension_numbers = #tpu.dot_dimension_numbers<[1], [0], [0], [1], [0, 0, 1, 1], [], []>} : vector<8x8xbf16>, vector<8x8xbf16>, vector<8x8xf32> -> vector<8x8xf32>
    %546 = vector.extract_strided_slice %525 {offsets = [0, 8], sizes = [8, 8], strides = [1, 1]} : vector<8x32xbf16> to vector<8x8xbf16>
    %547 = vector.extract_strided_slice %527 {offsets = [8, 0], sizes = [8, 8], strides = [1, 1]} : vector<32x8xbf16> to vector<8x8xbf16>
    %cst_130 = arith.constant dense<0.000000e+00> : vector<8x8xf32>
    %548 = tpu.matmul %546, %547, %cst_130 {dimension_numbers = #tpu.dot_dimension_numbers<[1], [0], [0], [1], [0, 0, 1, 1], [], []>} : vector<8x8xbf16>, vector<8x8xbf16>, vector<8x8xf32> -> vector<8x8xf32>
    %549 = arith.addf %548, %523 : vector<8x8xf32>
    %cst_131 = arith.constant dense<0xFF800000> : vector<8xf32>
    %550 = vector.multi_reduction <maximumf>, %549, %cst_131 [1] : vector<8x8xf32> to vector<8xf32>
    %551 = vector.shape_cast %550 : vector<8xf32> to vector<8x1xf32>
    %552 = vector.broadcast %551 : vector<8x1xf32> to vector<8x8xf32>
    %553 = arith.subf %549, %552 : vector<8x8xf32>
    %554 = math.exp %553 : vector<8x8xf32>
    %cst_132 = arith.constant dense<0.000000e+00> : vector<8xf32>
    %555 = vector.multi_reduction <add>, %554, %cst_132 [1] : vector<8x8xf32> to vector<8xf32>
    %556 = vector.shape_cast %555 : vector<8xf32> to vector<8x1xf32>
    %557 = tpu.reciprocal %556 {approx = true} : vector<8x1xf32> -> vector<8x1xf32>
    %558 = vector.broadcast %557 : vector<8x1xf32> to vector<8x8xf32>
    %559 = arith.mulf %554, %558 : vector<8x8xf32>
    %560 = arith.truncf %559 : vector<8x8xf32> to vector<8x8xbf16>
    %561 = vector.extract_strided_slice %528 {offsets = [0, 8], sizes = [8, 8], strides = [1, 1]} : vector<8x32xbf16> to vector<8x8xbf16>
    %cst_133 = arith.constant dense<0.000000e+00> : vector<8x8xf32>
    %562 = tpu.matmul %560, %561, %cst_133 {dimension_numbers = #tpu.dot_dimension_numbers<[1], [0], [0], [1], [0, 0, 1, 1], [], []>} : vector<8x8xbf16>, vector<8x8xbf16>, vector<8x8xf32> -> vector<8x8xf32>
    %563 = vector.extract_strided_slice %525 {offsets = [0, 16], sizes = [8, 8], strides = [1, 1]} : vector<8x32xbf16> to vector<8x8xbf16>
    %564 = vector.extract_strided_slice %527 {offsets = [16, 0], sizes = [8, 8], strides = [1, 1]} : vector<32x8xbf16> to vector<8x8xbf16>
    %cst_134 = arith.constant dense<0.000000e+00> : vector<8x8xf32>
    %565 = tpu.matmul %563, %564, %cst_134 {dimension_numbers = #tpu.dot_dimension_numbers<[1], [0], [0], [1], [0, 0, 1, 1], [], []>} : vector<8x8xbf16>, vector<8x8xbf16>, vector<8x8xf32> -> vector<8x8xf32>
    %566 = arith.addf %565, %523 : vector<8x8xf32>
    %cst_135 = arith.constant dense<0xFF800000> : vector<8xf32>
    %567 = vector.multi_reduction <maximumf>, %566, %cst_135 [1] : vector<8x8xf32> to vector<8xf32>
    %568 = vector.shape_cast %567 : vector<8xf32> to vector<8x1xf32>
    %569 = vector.broadcast %568 : vector<8x1xf32> to vector<8x8xf32>
    %570 = arith.subf %566, %569 : vector<8x8xf32>
    %571 = math.exp %570 : vector<8x8xf32>
    %cst_136 = arith.constant dense<0.000000e+00> : vector<8xf32>
    %572 = vector.multi_reduction <add>, %571, %cst_136 [1] : vector<8x8xf32> to vector<8xf32>
    %573 = vector.shape_cast %572 : vector<8xf32> to vector<8x1xf32>
    %574 = tpu.reciprocal %573 {approx = true} : vector<8x1xf32> -> vector<8x1xf32>
    %575 = vector.broadcast %574 : vector<8x1xf32> to vector<8x8xf32>
    %576 = arith.mulf %571, %575 : vector<8x8xf32>
    %577 = arith.truncf %576 : vector<8x8xf32> to vector<8x8xbf16>
    %578 = vector.extract_strided_slice %528 {offsets = [0, 16], sizes = [8, 8], strides = [1, 1]} : vector<8x32xbf16> to vector<8x8xbf16>
    %cst_137 = arith.constant dense<0.000000e+00> : vector<8x8xf32>
    %579 = tpu.matmul %577, %578, %cst_137 {dimension_numbers = #tpu.dot_dimension_numbers<[1], [0], [0], [1], [0, 0, 1, 1], [], []>} : vector<8x8xbf16>, vector<8x8xbf16>, vector<8x8xf32> -> vector<8x8xf32>
    %580 = vector.extract_strided_slice %525 {offsets = [0, 24], sizes = [8, 8], strides = [1, 1]} : vector<8x32xbf16> to vector<8x8xbf16>
    %581 = vector.extract_strided_slice %527 {offsets = [24, 0], sizes = [8, 8], strides = [1, 1]} : vector<32x8xbf16> to vector<8x8xbf16>
    %cst_138 = arith.constant dense<0.000000e+00> : vector<8x8xf32>
    %582 = tpu.matmul %580, %581, %cst_138 {dimension_numbers = #tpu.dot_dimension_numbers<[1], [0], [0], [1], [0, 0, 1, 1], [], []>} : vector<8x8xbf16>, vector<8x8xbf16>, vector<8x8xf32> -> vector<8x8xf32>
    %583 = arith.addf %582, %523 : vector<8x8xf32>
    %cst_139 = arith.constant dense<0xFF800000> : vector<8xf32>
    %584 = vector.multi_reduction <maximumf>, %583, %cst_139 [1] : vector<8x8xf32> to vector<8xf32>
    %585 = vector.shape_cast %584 : vector<8xf32> to vector<8x1xf32>
    %586 = vector.broadcast %585 : vector<8x1xf32> to vector<8x8xf32>
    %587 = arith.subf %583, %586 : vector<8x8xf32>
    %588 = math.exp %587 : vector<8x8xf32>
    %cst_140 = arith.constant dense<0.000000e+00> : vector<8xf32>
    %589 = vector.multi_reduction <add>, %588, %cst_140 [1] : vector<8x8xf32> to vector<8xf32>
    %590 = vector.shape_cast %589 : vector<8xf32> to vector<8x1xf32>
    %591 = tpu.reciprocal %590 {approx = true} : vector<8x1xf32> -> vector<8x1xf32>
    %592 = vector.broadcast %591 : vector<8x1xf32> to vector<8x8xf32>
    %593 = arith.mulf %588, %592 : vector<8x8xf32>
    %594 = arith.truncf %593 : vector<8x8xf32> to vector<8x8xbf16>
    %595 = vector.extract_strided_slice %528 {offsets = [0, 24], sizes = [8, 8], strides = [1, 1]} : vector<8x32xbf16> to vector<8x8xbf16>
    %cst_141 = arith.constant dense<0.000000e+00> : vector<8x8xf32>
    %596 = tpu.matmul %594, %595, %cst_141 {dimension_numbers = #tpu.dot_dimension_numbers<[1], [0], [0], [1], [0, 0, 1, 1], [], []>} : vector<8x8xbf16>, vector<8x8xbf16>, vector<8x8xf32> -> vector<8x8xf32>
    %597 = tpu.concatenate %545, %562, %579, %596 in 1 : vector<8x8xf32>, vector<8x8xf32>, vector<8x8xf32>, vector<8x8xf32> -> vector<8x32xf32>
    %598 = arith.truncf %597 : vector<8x32xf32> to vector<8x32xbf16>
    %cst_142 = arith.constant dense<0.000000e+00> : vector<8x32xf32>
    %599 = tpu.matmul %598, %524, %cst_142 {dimension_numbers = #tpu.dot_dimension_numbers<[1], [0], [0], [1], [0, 0, 1, 1], [], []>} : vector<8x32xbf16>, vector<32x32xbf16>, vector<8x32xf32> -> vector<8x32xf32>
    %600 = vector.extract_strided_slice %518 {offsets = [8, 0], sizes = [8, 32], strides = [1, 1]} : vector<16x96xf32> to vector<8x32xf32>
    %601 = vector.extract_strided_slice %518 {offsets = [8, 32], sizes = [8, 32], strides = [1, 1]} : vector<16x96xf32> to vector<8x32xf32>
    %602 = vector.extract_strided_slice %518 {offsets = [8, 64], sizes = [8, 32], strides = [1, 1]} : vector<16x96xf32> to vector<8x32xf32>
    %603 = vector.extract_strided_slice %2 {offsets = [1, 0, 0], sizes = [1, 8, 8], strides = [1, 1, 1]} : vector<2x8x8xf32> to vector<1x8x8xf32>
    %604 = vector.shape_cast %603 : vector<1x8x8xf32> to vector<8x8xf32>
    %605 = vector.extract_strided_slice %479 {offsets = [0, 96], sizes = [32, 32], strides = [1, 1]} : vector<32x320xbf16> to vector<32x32xbf16>
    %606 = arith.truncf %600 : vector<8x32xf32> to vector<8x32xbf16>
    %607 = tpu.transpose %601, [1, 0] : vector<8x32xf32> -> vector<32x8xf32>
    %608 = arith.truncf %607 : vector<32x8xf32> to vector<32x8xbf16>
    %609 = arith.truncf %602 : vector<8x32xf32> to vector<8x32xbf16>
    %610 = vector.extract_strided_slice %606 {offsets = [0, 0], sizes = [8, 8], strides = [1, 1]} : vector<8x32xbf16> to vector<8x8xbf16>
    %611 = vector.extract_strided_slice %608 {offsets = [0, 0], sizes = [8, 8], strides = [1, 1]} : vector<32x8xbf16> to vector<8x8xbf16>
    %cst_143 = arith.constant dense<0.000000e+00> : vector<8x8xf32>
    %612 = tpu.matmul %610, %611, %cst_143 {dimension_numbers = #tpu.dot_dimension_numbers<[1], [0], [0], [1], [0, 0, 1, 1], [], []>} : vector<8x8xbf16>, vector<8x8xbf16>, vector<8x8xf32> -> vector<8x8xf32>
    %613 = arith.addf %612, %604 : vector<8x8xf32>
    %cst_144 = arith.constant dense<0xFF800000> : vector<8xf32>
    %614 = vector.multi_reduction <maximumf>, %613, %cst_144 [1] : vector<8x8xf32> to vector<8xf32>
    %615 = vector.shape_cast %614 : vector<8xf32> to vector<8x1xf32>
    %616 = vector.broadcast %615 : vector<8x1xf32> to vector<8x8xf32>
    %617 = arith.subf %613, %616 : vector<8x8xf32>
    %618 = math.exp %617 : vector<8x8xf32>
    %cst_145 = arith.constant dense<0.000000e+00> : vector<8xf32>
    %619 = vector.multi_reduction <add>, %618, %cst_145 [1] : vector<8x8xf32> to vector<8xf32>
    %620 = vector.shape_cast %619 : vector<8xf32> to vector<8x1xf32>
    %621 = tpu.reciprocal %620 {approx = true} : vector<8x1xf32> -> vector<8x1xf32>
    %622 = vector.broadcast %621 : vector<8x1xf32> to vector<8x8xf32>
    %623 = arith.mulf %618, %622 : vector<8x8xf32>
    %624 = arith.truncf %623 : vector<8x8xf32> to vector<8x8xbf16>
    %625 = vector.extract_strided_slice %609 {offsets = [0, 0], sizes = [8, 8], strides = [1, 1]} : vector<8x32xbf16> to vector<8x8xbf16>
    %cst_146 = arith.constant dense<0.000000e+00> : vector<8x8xf32>
    %626 = tpu.matmul %624, %625, %cst_146 {dimension_numbers = #tpu.dot_dimension_numbers<[1], [0], [0], [1], [0, 0, 1, 1], [], []>} : vector<8x8xbf16>, vector<8x8xbf16>, vector<8x8xf32> -> vector<8x8xf32>
    %627 = vector.extract_strided_slice %606 {offsets = [0, 8], sizes = [8, 8], strides = [1, 1]} : vector<8x32xbf16> to vector<8x8xbf16>
    %628 = vector.extract_strided_slice %608 {offsets = [8, 0], sizes = [8, 8], strides = [1, 1]} : vector<32x8xbf16> to vector<8x8xbf16>
    %cst_147 = arith.constant dense<0.000000e+00> : vector<8x8xf32>
    %629 = tpu.matmul %627, %628, %cst_147 {dimension_numbers = #tpu.dot_dimension_numbers<[1], [0], [0], [1], [0, 0, 1, 1], [], []>} : vector<8x8xbf16>, vector<8x8xbf16>, vector<8x8xf32> -> vector<8x8xf32>
    %630 = arith.addf %629, %604 : vector<8x8xf32>
    %cst_148 = arith.constant dense<0xFF800000> : vector<8xf32>
    %631 = vector.multi_reduction <maximumf>, %630, %cst_148 [1] : vector<8x8xf32> to vector<8xf32>
    %632 = vector.shape_cast %631 : vector<8xf32> to vector<8x1xf32>
    %633 = vector.broadcast %632 : vector<8x1xf32> to vector<8x8xf32>
    %634 = arith.subf %630, %633 : vector<8x8xf32>
    %635 = math.exp %634 : vector<8x8xf32>
    %cst_149 = arith.constant dense<0.000000e+00> : vector<8xf32>
    %636 = vector.multi_reduction <add>, %635, %cst_149 [1] : vector<8x8xf32> to vector<8xf32>
    %637 = vector.shape_cast %636 : vector<8xf32> to vector<8x1xf32>
    %638 = tpu.reciprocal %637 {approx = true} : vector<8x1xf32> -> vector<8x1xf32>
    %639 = vector.broadcast %638 : vector<8x1xf32> to vector<8x8xf32>
    %640 = arith.mulf %635, %639 : vector<8x8xf32>
    %641 = arith.truncf %640 : vector<8x8xf32> to vector<8x8xbf16>
    %642 = vector.extract_strided_slice %609 {offsets = [0, 8], sizes = [8, 8], strides = [1, 1]} : vector<8x32xbf16> to vector<8x8xbf16>
    %cst_150 = arith.constant dense<0.000000e+00> : vector<8x8xf32>
    %643 = tpu.matmul %641, %642, %cst_150 {dimension_numbers = #tpu.dot_dimension_numbers<[1], [0], [0], [1], [0, 0, 1, 1], [], []>} : vector<8x8xbf16>, vector<8x8xbf16>, vector<8x8xf32> -> vector<8x8xf32>
    %644 = vector.extract_strided_slice %606 {offsets = [0, 16], sizes = [8, 8], strides = [1, 1]} : vector<8x32xbf16> to vector<8x8xbf16>
    %645 = vector.extract_strided_slice %608 {offsets = [16, 0], sizes = [8, 8], strides = [1, 1]} : vector<32x8xbf16> to vector<8x8xbf16>
    %cst_151 = arith.constant dense<0.000000e+00> : vector<8x8xf32>
    %646 = tpu.matmul %644, %645, %cst_151 {dimension_numbers = #tpu.dot_dimension_numbers<[1], [0], [0], [1], [0, 0, 1, 1], [], []>} : vector<8x8xbf16>, vector<8x8xbf16>, vector<8x8xf32> -> vector<8x8xf32>
    %647 = arith.addf %646, %604 : vector<8x8xf32>
    %cst_152 = arith.constant dense<0xFF800000> : vector<8xf32>
    %648 = vector.multi_reduction <maximumf>, %647, %cst_152 [1] : vector<8x8xf32> to vector<8xf32>
    %649 = vector.shape_cast %648 : vector<8xf32> to vector<8x1xf32>
    %650 = vector.broadcast %649 : vector<8x1xf32> to vector<8x8xf32>
    %651 = arith.subf %647, %650 : vector<8x8xf32>
    %652 = math.exp %651 : vector<8x8xf32>
    %cst_153 = arith.constant dense<0.000000e+00> : vector<8xf32>
    %653 = vector.multi_reduction <add>, %652, %cst_153 [1] : vector<8x8xf32> to vector<8xf32>
    %654 = vector.shape_cast %653 : vector<8xf32> to vector<8x1xf32>
    %655 = tpu.reciprocal %654 {approx = true} : vector<8x1xf32> -> vector<8x1xf32>
    %656 = vector.broadcast %655 : vector<8x1xf32> to vector<8x8xf32>
    %657 = arith.mulf %652, %656 : vector<8x8xf32>
    %658 = arith.truncf %657 : vector<8x8xf32> to vector<8x8xbf16>
    %659 = vector.extract_strided_slice %609 {offsets = [0, 16], sizes = [8, 8], strides = [1, 1]} : vector<8x32xbf16> to vector<8x8xbf16>
    %cst_154 = arith.constant dense<0.000000e+00> : vector<8x8xf32>
    %660 = tpu.matmul %658, %659, %cst_154 {dimension_numbers = #tpu.dot_dimension_numbers<[1], [0], [0], [1], [0, 0, 1, 1], [], []>} : vector<8x8xbf16>, vector<8x8xbf16>, vector<8x8xf32> -> vector<8x8xf32>
    %661 = vector.extract_strided_slice %606 {offsets = [0, 24], sizes = [8, 8], strides = [1, 1]} : vector<8x32xbf16> to vector<8x8xbf16>
    %662 = vector.extract_strided_slice %608 {offsets = [24, 0], sizes = [8, 8], strides = [1, 1]} : vector<32x8xbf16> to vector<8x8xbf16>
    %cst_155 = arith.constant dense<0.000000e+00> : vector<8x8xf32>
    %663 = tpu.matmul %661, %662, %cst_155 {dimension_numbers = #tpu.dot_dimension_numbers<[1], [0], [0], [1], [0, 0, 1, 1], [], []>} : vector<8x8xbf16>, vector<8x8xbf16>, vector<8x8xf32> -> vector<8x8xf32>
    %664 = arith.addf %663, %604 : vector<8x8xf32>
    %cst_156 = arith.constant dense<0xFF800000> : vector<8xf32>
    %665 = vector.multi_reduction <maximumf>, %664, %cst_156 [1] : vector<8x8xf32> to vector<8xf32>
    %666 = vector.shape_cast %665 : vector<8xf32> to vector<8x1xf32>
    %667 = vector.broadcast %666 : vector<8x1xf32> to vector<8x8xf32>
    %668 = arith.subf %664, %667 : vector<8x8xf32>
    %669 = math.exp %668 : vector<8x8xf32>
    %cst_157 = arith.constant dense<0.000000e+00> : vector<8xf32>
    %670 = vector.multi_reduction <add>, %669, %cst_157 [1] : vector<8x8xf32> to vector<8xf32>
    %671 = vector.shape_cast %670 : vector<8xf32> to vector<8x1xf32>
    %672 = tpu.reciprocal %671 {approx = true} : vector<8x1xf32> -> vector<8x1xf32>
    %673 = vector.broadcast %672 : vector<8x1xf32> to vector<8x8xf32>
    %674 = arith.mulf %669, %673 : vector<8x8xf32>
    %675 = arith.truncf %674 : vector<8x8xf32> to vector<8x8xbf16>
    %676 = vector.extract_strided_slice %609 {offsets = [0, 24], sizes = [8, 8], strides = [1, 1]} : vector<8x32xbf16> to vector<8x8xbf16>
    %cst_158 = arith.constant dense<0.000000e+00> : vector<8x8xf32>
    %677 = tpu.matmul %675, %676, %cst_158 {dimension_numbers = #tpu.dot_dimension_numbers<[1], [0], [0], [1], [0, 0, 1, 1], [], []>} : vector<8x8xbf16>, vector<8x8xbf16>, vector<8x8xf32> -> vector<8x8xf32>
    %678 = tpu.concatenate %626, %643, %660, %677 in 1 : vector<8x8xf32>, vector<8x8xf32>, vector<8x8xf32>, vector<8x8xf32> -> vector<8x32xf32>
    %679 = arith.truncf %678 : vector<8x32xf32> to vector<8x32xbf16>
    %cst_159 = arith.constant dense<0.000000e+00> : vector<8x32xf32>
    %680 = tpu.matmul %679, %605, %cst_159 {dimension_numbers = #tpu.dot_dimension_numbers<[1], [0], [0], [1], [0, 0, 1, 1], [], []>} : vector<8x32xbf16>, vector<32x32xbf16>, vector<8x32xf32> -> vector<8x32xf32>
    %681 = tpu.concatenate %599, %680 in 0 : vector<8x32xf32>, vector<8x32xf32> -> vector<16x32xf32>
    %682 = arith.addf %477, %681 : vector<16x32xf32>
    %683 = vector.extract_strided_slice %483 {offsets = [96], sizes = [32], strides = [1]} : vector<352xf32> to vector<32xf32>
    %684 = vector.shape_cast %683 : vector<32xf32> to vector<1x32xf32>
    %685 = vector.broadcast %684 : vector<1x32xf32> to vector<16x32xf32>
    %686 = arith.addf %682, %685 : vector<16x32xf32>
    %687 = vector.extract_strided_slice %3 {offsets = [4, 0, 0], sizes = [1, 1, 32], strides = [1, 1, 1]} : vector<7x2x32xf32> to vector<1x1x32xf32>
    %688 = vector.shape_cast %687 : vector<1x1x32xf32> to vector<32xf32>
    %689 = vector.extract_strided_slice %3 {offsets = [4, 1, 0], sizes = [1, 1, 32], strides = [1, 1, 1]} : vector<7x2x32xf32> to vector<1x1x32xf32>
    %690 = vector.shape_cast %689 : vector<1x1x32xf32> to vector<32xf32>
    %cst_160 = arith.constant dense<0.000000e+00> : vector<16xf32>
    %691 = vector.multi_reduction <add>, %686, %cst_160 [1] : vector<16x32xf32> to vector<16xf32>
    %692 = vector.shape_cast %691 : vector<16xf32> to vector<16x1xf32>
    %cst_161 = arith.constant 3.200000e+01 : f32
    %693 = vector.broadcast %cst_161 : f32 to vector<16x1xf32>
    %694 = arith.divf %692, %693 : vector<16x1xf32>
    %695 = vector.broadcast %694 : vector<16x1xf32> to vector<16x32xf32>
    %696 = arith.subf %686, %695 : vector<16x32xf32>
    %697 = arith.mulf %696, %696 : vector<16x32xf32>
    %cst_162 = arith.constant dense<0.000000e+00> : vector<16xf32>
    %698 = vector.multi_reduction <add>, %697, %cst_162 [1] : vector<16x32xf32> to vector<16xf32>
    %699 = vector.shape_cast %698 : vector<16xf32> to vector<16x1xf32>
    %cst_163 = arith.constant 0.0322580636 : f32
    %700 = vector.broadcast %cst_163 : f32 to vector<16x1xf32>
    %701 = arith.mulf %699, %700 : vector<16x1xf32>
    %702 = vector.broadcast %694 : vector<16x1xf32> to vector<16x32xf32>
    %703 = arith.subf %686, %702 : vector<16x32xf32>
    %704 = vector.shape_cast %688 : vector<32xf32> to vector<1x32xf32>
    %705 = vector.broadcast %704 : vector<1x32xf32> to vector<16x32xf32>
    %706 = arith.mulf %705, %703 : vector<16x32xf32>
    %707 = math.sqrt %701 : vector<16x1xf32>
    %cst_164 = arith.constant 9.99999997E-7 : f32
    %708 = vector.broadcast %cst_164 : f32 to vector<16x1xf32>
    %709 = arith.addf %707, %708 : vector<16x1xf32>
    %710 = vector.broadcast %709 : vector<16x1xf32> to vector<16x32xf32>
    %711 = arith.divf %706, %710 : vector<16x32xf32>
    %712 = vector.shape_cast %690 : vector<32xf32> to vector<1x32xf32>
    %713 = vector.broadcast %712 : vector<1x32xf32> to vector<16x32xf32>
    %714 = arith.addf %711, %713 : vector<16x32xf32>
    %715 = vector.extract_strided_slice %479 {offsets = [0, 128], sizes = [32, 32], strides = [1, 1]} : vector<32x320xbf16> to vector<32x32xbf16>
    %716 = arith.truncf %714 : vector<16x32xf32> to vector<16x32xbf16>
    %cst_165 = arith.constant dense<0.000000e+00> : vector<16x32xf32>
    %717 = tpu.matmul %716, %715, %cst_165 {dimension_numbers = #tpu.dot_dimension_numbers<[1], [0], [0], [1], [0, 0, 1, 1], [], []>} : vector<16x32xbf16>, vector<32x32xbf16>, vector<16x32xf32> -> vector<16x32xf32>
    %718 = vector.extract_strided_slice %483 {offsets = [128], sizes = [32], strides = [1]} : vector<352xf32> to vector<32xf32>
    %719 = vector.shape_cast %718 : vector<32xf32> to vector<1x32xf32>
    %720 = vector.broadcast %719 : vector<1x32xf32> to vector<16x32xf32>
    %721 = arith.addf %717, %720 : vector<16x32xf32>
    %c0_166 = arith.constant 0 : index
    %c0_167 = arith.constant 0 : index
    %c0_168 = arith.constant 0 : index
    %722 = vector.load %arg2[%c0_166, %c0_167, %c0_168] : memref<2x10x32xf32, #tpu.memory_space<vmem>>, vector<1x10x32xf32>
    %723 = vector.shape_cast %722 : vector<1x10x32xf32> to vector<10x32xf32>
    %724 = vector.extract_strided_slice %479 {offsets = [0, 160], sizes = [32, 64], strides = [1, 1]} : vector<32x320xbf16> to vector<32x64xbf16>
    %725 = arith.truncf %723 : vector<10x32xf32> to vector<10x32xbf16>
    %cst_169 = arith.constant dense<0.000000e+00> : vector<10x64xf32>
    %726 = tpu.matmul %725, %724, %cst_169 {dimension_numbers = #tpu.dot_dimension_numbers<[1], [0], [0], [1], [0, 0, 1, 1], [], []>} : vector<10x32xbf16>, vector<32x64xbf16>, vector<10x64xf32> -> vector<10x64xf32>
    %727 = vector.extract_strided_slice %483 {offsets = [160], sizes = [64], strides = [1]} : vector<352xf32> to vector<64xf32>
    %728 = vector.shape_cast %727 : vector<64xf32> to vector<1x64xf32>
    %729 = vector.broadcast %728 : vector<1x64xf32> to vector<10x64xf32>
    %730 = arith.addf %726, %729 : vector<10x64xf32>
    %731 = vector.extract_strided_slice %721 {offsets = [0, 0], sizes = [8, 32], strides = [1, 1]} : vector<16x32xf32> to vector<8x32xf32>
    %732 = vector.extract_strided_slice %730 {offsets = [0, 0], sizes = [10, 32], strides = [1, 1]} : vector<10x64xf32> to vector<10x32xf32>
    %733 = vector.extract_strided_slice %730 {offsets = [0, 32], sizes = [10, 32], strides = [1, 1]} : vector<10x64xf32> to vector<10x32xf32>
    %734 = vector.extract_strided_slice %1 {offsets = [0, 0, 0], sizes = [1, 8, 10], strides = [1, 1, 1]} : vector<2x8x10xf32> to vector<1x8x10xf32>
    %735 = vector.shape_cast %734 : vector<1x8x10xf32> to vector<8x10xf32>
    %736 = vector.extract_strided_slice %479 {offsets = [0, 224], sizes = [32, 32], strides = [1, 1]} : vector<32x320xbf16> to vector<32x32xbf16>
    %737 = arith.truncf %731 : vector<8x32xf32> to vector<8x32xbf16>
    %738 = tpu.transpose %732, [1, 0] : vector<10x32xf32> -> vector<32x10xf32>
    %739 = arith.truncf %738 : vector<32x10xf32> to vector<32x10xbf16>
    %740 = arith.truncf %733 : vector<10x32xf32> to vector<10x32xbf16>
    %741 = vector.extract_strided_slice %737 {offsets = [0, 0], sizes = [8, 8], strides = [1, 1]} : vector<8x32xbf16> to vector<8x8xbf16>
    %742 = vector.extract_strided_slice %739 {offsets = [0, 0], sizes = [8, 10], strides = [1, 1]} : vector<32x10xbf16> to vector<8x10xbf16>
    %cst_170 = arith.constant dense<0.000000e+00> : vector<8x10xf32>
    %743 = tpu.matmul %741, %742, %cst_170 {dimension_numbers = #tpu.dot_dimension_numbers<[1], [0], [0], [1], [0, 0, 1, 1], [], []>} : vector<8x8xbf16>, vector<8x10xbf16>, vector<8x10xf32> -> vector<8x10xf32>
    %744 = arith.addf %743, %735 : vector<8x10xf32>
    %cst_171 = arith.constant dense<0xFF800000> : vector<8xf32>
    %745 = vector.multi_reduction <maximumf>, %744, %cst_171 [1] : vector<8x10xf32> to vector<8xf32>
    %746 = vector.shape_cast %745 : vector<8xf32> to vector<8x1xf32>
    %747 = vector.broadcast %746 : vector<8x1xf32> to vector<8x10xf32>
    %748 = arith.subf %744, %747 : vector<8x10xf32>
    %749 = math.exp %748 : vector<8x10xf32>
    %cst_172 = arith.constant dense<0.000000e+00> : vector<8xf32>
    %750 = vector.multi_reduction <add>, %749, %cst_172 [1] : vector<8x10xf32> to vector<8xf32>
    %751 = vector.shape_cast %750 : vector<8xf32> to vector<8x1xf32>
    %752 = tpu.reciprocal %751 {approx = true} : vector<8x1xf32> -> vector<8x1xf32>
    %753 = vector.broadcast %752 : vector<8x1xf32> to vector<8x10xf32>
    %754 = arith.mulf %749, %753 : vector<8x10xf32>
    %755 = arith.truncf %754 : vector<8x10xf32> to vector<8x10xbf16>
    %756 = vector.extract_strided_slice %740 {offsets = [0, 0], sizes = [10, 8], strides = [1, 1]} : vector<10x32xbf16> to vector<10x8xbf16>
    %cst_173 = arith.constant dense<0.000000e+00> : vector<8x8xf32>
    %757 = tpu.matmul %755, %756, %cst_173 {dimension_numbers = #tpu.dot_dimension_numbers<[1], [0], [0], [1], [0, 0, 1, 1], [], []>} : vector<8x10xbf16>, vector<10x8xbf16>, vector<8x8xf32> -> vector<8x8xf32>
    %758 = vector.extract_strided_slice %737 {offsets = [0, 8], sizes = [8, 8], strides = [1, 1]} : vector<8x32xbf16> to vector<8x8xbf16>
    %759 = vector.extract_strided_slice %739 {offsets = [8, 0], sizes = [8, 10], strides = [1, 1]} : vector<32x10xbf16> to vector<8x10xbf16>
    %cst_174 = arith.constant dense<0.000000e+00> : vector<8x10xf32>
    %760 = tpu.matmul %758, %759, %cst_174 {dimension_numbers = #tpu.dot_dimension_numbers<[1], [0], [0], [1], [0, 0, 1, 1], [], []>} : vector<8x8xbf16>, vector<8x10xbf16>, vector<8x10xf32> -> vector<8x10xf32>
    %761 = arith.addf %760, %735 : vector<8x10xf32>
    %cst_175 = arith.constant dense<0xFF800000> : vector<8xf32>
    %762 = vector.multi_reduction <maximumf>, %761, %cst_175 [1] : vector<8x10xf32> to vector<8xf32>
    %763 = vector.shape_cast %762 : vector<8xf32> to vector<8x1xf32>
    %764 = vector.broadcast %763 : vector<8x1xf32> to vector<8x10xf32>
    %765 = arith.subf %761, %764 : vector<8x10xf32>
    %766 = math.exp %765 : vector<8x10xf32>
    %cst_176 = arith.constant dense<0.000000e+00> : vector<8xf32>
    %767 = vector.multi_reduction <add>, %766, %cst_176 [1] : vector<8x10xf32> to vector<8xf32>
    %768 = vector.shape_cast %767 : vector<8xf32> to vector<8x1xf32>
    %769 = tpu.reciprocal %768 {approx = true} : vector<8x1xf32> -> vector<8x1xf32>
    %770 = vector.broadcast %769 : vector<8x1xf32> to vector<8x10xf32>
    %771 = arith.mulf %766, %770 : vector<8x10xf32>
    %772 = arith.truncf %771 : vector<8x10xf32> to vector<8x10xbf16>
    %773 = vector.extract_strided_slice %740 {offsets = [0, 8], sizes = [10, 8], strides = [1, 1]} : vector<10x32xbf16> to vector<10x8xbf16>
    %cst_177 = arith.constant dense<0.000000e+00> : vector<8x8xf32>
    %774 = tpu.matmul %772, %773, %cst_177 {dimension_numbers = #tpu.dot_dimension_numbers<[1], [0], [0], [1], [0, 0, 1, 1], [], []>} : vector<8x10xbf16>, vector<10x8xbf16>, vector<8x8xf32> -> vector<8x8xf32>
    %775 = vector.extract_strided_slice %737 {offsets = [0, 16], sizes = [8, 8], strides = [1, 1]} : vector<8x32xbf16> to vector<8x8xbf16>
    %776 = vector.extract_strided_slice %739 {offsets = [16, 0], sizes = [8, 10], strides = [1, 1]} : vector<32x10xbf16> to vector<8x10xbf16>
    %cst_178 = arith.constant dense<0.000000e+00> : vector<8x10xf32>
    %777 = tpu.matmul %775, %776, %cst_178 {dimension_numbers = #tpu.dot_dimension_numbers<[1], [0], [0], [1], [0, 0, 1, 1], [], []>} : vector<8x8xbf16>, vector<8x10xbf16>, vector<8x10xf32> -> vector<8x10xf32>
    %778 = arith.addf %777, %735 : vector<8x10xf32>
    %cst_179 = arith.constant dense<0xFF800000> : vector<8xf32>
    %779 = vector.multi_reduction <maximumf>, %778, %cst_179 [1] : vector<8x10xf32> to vector<8xf32>
    %780 = vector.shape_cast %779 : vector<8xf32> to vector<8x1xf32>
    %781 = vector.broadcast %780 : vector<8x1xf32> to vector<8x10xf32>
    %782 = arith.subf %778, %781 : vector<8x10xf32>
    %783 = math.exp %782 : vector<8x10xf32>
    %cst_180 = arith.constant dense<0.000000e+00> : vector<8xf32>
    %784 = vector.multi_reduction <add>, %783, %cst_180 [1] : vector<8x10xf32> to vector<8xf32>
    %785 = vector.shape_cast %784 : vector<8xf32> to vector<8x1xf32>
    %786 = tpu.reciprocal %785 {approx = true} : vector<8x1xf32> -> vector<8x1xf32>
    %787 = vector.broadcast %786 : vector<8x1xf32> to vector<8x10xf32>
    %788 = arith.mulf %783, %787 : vector<8x10xf32>
    %789 = arith.truncf %788 : vector<8x10xf32> to vector<8x10xbf16>
    %790 = vector.extract_strided_slice %740 {offsets = [0, 16], sizes = [10, 8], strides = [1, 1]} : vector<10x32xbf16> to vector<10x8xbf16>
    %cst_181 = arith.constant dense<0.000000e+00> : vector<8x8xf32>
    %791 = tpu.matmul %789, %790, %cst_181 {dimension_numbers = #tpu.dot_dimension_numbers<[1], [0], [0], [1], [0, 0, 1, 1], [], []>} : vector<8x10xbf16>, vector<10x8xbf16>, vector<8x8xf32> -> vector<8x8xf32>
    %792 = vector.extract_strided_slice %737 {offsets = [0, 24], sizes = [8, 8], strides = [1, 1]} : vector<8x32xbf16> to vector<8x8xbf16>
    %793 = vector.extract_strided_slice %739 {offsets = [24, 0], sizes = [8, 10], strides = [1, 1]} : vector<32x10xbf16> to vector<8x10xbf16>
    %cst_182 = arith.constant dense<0.000000e+00> : vector<8x10xf32>
    %794 = tpu.matmul %792, %793, %cst_182 {dimension_numbers = #tpu.dot_dimension_numbers<[1], [0], [0], [1], [0, 0, 1, 1], [], []>} : vector<8x8xbf16>, vector<8x10xbf16>, vector<8x10xf32> -> vector<8x10xf32>
    %795 = arith.addf %794, %735 : vector<8x10xf32>
    %cst_183 = arith.constant dense<0xFF800000> : vector<8xf32>
    %796 = vector.multi_reduction <maximumf>, %795, %cst_183 [1] : vector<8x10xf32> to vector<8xf32>
    %797 = vector.shape_cast %796 : vector<8xf32> to vector<8x1xf32>
    %798 = vector.broadcast %797 : vector<8x1xf32> to vector<8x10xf32>
    %799 = arith.subf %795, %798 : vector<8x10xf32>
    %800 = math.exp %799 : vector<8x10xf32>
    %cst_184 = arith.constant dense<0.000000e+00> : vector<8xf32>
    %801 = vector.multi_reduction <add>, %800, %cst_184 [1] : vector<8x10xf32> to vector<8xf32>
    %802 = vector.shape_cast %801 : vector<8xf32> to vector<8x1xf32>
    %803 = tpu.reciprocal %802 {approx = true} : vector<8x1xf32> -> vector<8x1xf32>
    %804 = vector.broadcast %803 : vector<8x1xf32> to vector<8x10xf32>
    %805 = arith.mulf %800, %804 : vector<8x10xf32>
    %806 = arith.truncf %805 : vector<8x10xf32> to vector<8x10xbf16>
    %807 = vector.extract_strided_slice %740 {offsets = [0, 24], sizes = [10, 8], strides = [1, 1]} : vector<10x32xbf16> to vector<10x8xbf16>
    %cst_185 = arith.constant dense<0.000000e+00> : vector<8x8xf32>
    %808 = tpu.matmul %806, %807, %cst_185 {dimension_numbers = #tpu.dot_dimension_numbers<[1], [0], [0], [1], [0, 0, 1, 1], [], []>} : vector<8x10xbf16>, vector<10x8xbf16>, vector<8x8xf32> -> vector<8x8xf32>
    %809 = tpu.concatenate %757, %774, %791, %808 in 1 : vector<8x8xf32>, vector<8x8xf32>, vector<8x8xf32>, vector<8x8xf32> -> vector<8x32xf32>
    %810 = arith.truncf %809 : vector<8x32xf32> to vector<8x32xbf16>
    %cst_186 = arith.constant dense<0.000000e+00> : vector<8x32xf32>
    %811 = tpu.matmul %810, %736, %cst_186 {dimension_numbers = #tpu.dot_dimension_numbers<[1], [0], [0], [1], [0, 0, 1, 1], [], []>} : vector<8x32xbf16>, vector<32x32xbf16>, vector<8x32xf32> -> vector<8x32xf32>
    %c1_187 = arith.constant 1 : index
    %c0_188 = arith.constant 0 : index
    %c0_189 = arith.constant 0 : index
    %812 = vector.load %arg2[%c1_187, %c0_188, %c0_189] : memref<2x10x32xf32, #tpu.memory_space<vmem>>, vector<1x10x32xf32>
    %813 = vector.shape_cast %812 : vector<1x10x32xf32> to vector<10x32xf32>
    %814 = vector.extract_strided_slice %479 {offsets = [0, 160], sizes = [32, 64], strides = [1, 1]} : vector<32x320xbf16> to vector<32x64xbf16>
    %815 = arith.truncf %813 : vector<10x32xf32> to vector<10x32xbf16>
    %cst_190 = arith.constant dense<0.000000e+00> : vector<10x64xf32>
    %816 = tpu.matmul %815, %814, %cst_190 {dimension_numbers = #tpu.dot_dimension_numbers<[1], [0], [0], [1], [0, 0, 1, 1], [], []>} : vector<10x32xbf16>, vector<32x64xbf16>, vector<10x64xf32> -> vector<10x64xf32>
    %817 = vector.extract_strided_slice %483 {offsets = [160], sizes = [64], strides = [1]} : vector<352xf32> to vector<64xf32>
    %818 = vector.shape_cast %817 : vector<64xf32> to vector<1x64xf32>
    %819 = vector.broadcast %818 : vector<1x64xf32> to vector<10x64xf32>
    %820 = arith.addf %816, %819 : vector<10x64xf32>
    %821 = vector.extract_strided_slice %721 {offsets = [8, 0], sizes = [8, 32], strides = [1, 1]} : vector<16x32xf32> to vector<8x32xf32>
    %822 = vector.extract_strided_slice %820 {offsets = [0, 0], sizes = [10, 32], strides = [1, 1]} : vector<10x64xf32> to vector<10x32xf32>
    %823 = vector.extract_strided_slice %820 {offsets = [0, 32], sizes = [10, 32], strides = [1, 1]} : vector<10x64xf32> to vector<10x32xf32>
    %824 = vector.extract_strided_slice %1 {offsets = [1, 0, 0], sizes = [1, 8, 10], strides = [1, 1, 1]} : vector<2x8x10xf32> to vector<1x8x10xf32>
    %825 = vector.shape_cast %824 : vector<1x8x10xf32> to vector<8x10xf32>
    %826 = vector.extract_strided_slice %479 {offsets = [0, 224], sizes = [32, 32], strides = [1, 1]} : vector<32x320xbf16> to vector<32x32xbf16>
    %827 = arith.truncf %821 : vector<8x32xf32> to vector<8x32xbf16>
    %828 = tpu.transpose %822, [1, 0] : vector<10x32xf32> -> vector<32x10xf32>
    %829 = arith.truncf %828 : vector<32x10xf32> to vector<32x10xbf16>
    %830 = arith.truncf %823 : vector<10x32xf32> to vector<10x32xbf16>
    %831 = vector.extract_strided_slice %827 {offsets = [0, 0], sizes = [8, 8], strides = [1, 1]} : vector<8x32xbf16> to vector<8x8xbf16>
    %832 = vector.extract_strided_slice %829 {offsets = [0, 0], sizes = [8, 10], strides = [1, 1]} : vector<32x10xbf16> to vector<8x10xbf16>
    %cst_191 = arith.constant dense<0.000000e+00> : vector<8x10xf32>
    %833 = tpu.matmul %831, %832, %cst_191 {dimension_numbers = #tpu.dot_dimension_numbers<[1], [0], [0], [1], [0, 0, 1, 1], [], []>} : vector<8x8xbf16>, vector<8x10xbf16>, vector<8x10xf32> -> vector<8x10xf32>
    %834 = arith.addf %833, %825 : vector<8x10xf32>
    %cst_192 = arith.constant dense<0xFF800000> : vector<8xf32>
    %835 = vector.multi_reduction <maximumf>, %834, %cst_192 [1] : vector<8x10xf32> to vector<8xf32>
    %836 = vector.shape_cast %835 : vector<8xf32> to vector<8x1xf32>
    %837 = vector.broadcast %836 : vector<8x1xf32> to vector<8x10xf32>
    %838 = arith.subf %834, %837 : vector<8x10xf32>
    %839 = math.exp %838 : vector<8x10xf32>
    %cst_193 = arith.constant dense<0.000000e+00> : vector<8xf32>
    %840 = vector.multi_reduction <add>, %839, %cst_193 [1] : vector<8x10xf32> to vector<8xf32>
    %841 = vector.shape_cast %840 : vector<8xf32> to vector<8x1xf32>
    %842 = tpu.reciprocal %841 {approx = true} : vector<8x1xf32> -> vector<8x1xf32>
    %843 = vector.broadcast %842 : vector<8x1xf32> to vector<8x10xf32>
    %844 = arith.mulf %839, %843 : vector<8x10xf32>
    %845 = arith.truncf %844 : vector<8x10xf32> to vector<8x10xbf16>
    %846 = vector.extract_strided_slice %830 {offsets = [0, 0], sizes = [10, 8], strides = [1, 1]} : vector<10x32xbf16> to vector<10x8xbf16>
    %cst_194 = arith.constant dense<0.000000e+00> : vector<8x8xf32>
    %847 = tpu.matmul %845, %846, %cst_194 {dimension_numbers = #tpu.dot_dimension_numbers<[1], [0], [0], [1], [0, 0, 1, 1], [], []>} : vector<8x10xbf16>, vector<10x8xbf16>, vector<8x8xf32> -> vector<8x8xf32>
    %848 = vector.extract_strided_slice %827 {offsets = [0, 8], sizes = [8, 8], strides = [1, 1]} : vector<8x32xbf16> to vector<8x8xbf16>
    %849 = vector.extract_strided_slice %829 {offsets = [8, 0], sizes = [8, 10], strides = [1, 1]} : vector<32x10xbf16> to vector<8x10xbf16>
    %cst_195 = arith.constant dense<0.000000e+00> : vector<8x10xf32>
    %850 = tpu.matmul %848, %849, %cst_195 {dimension_numbers = #tpu.dot_dimension_numbers<[1], [0], [0], [1], [0, 0, 1, 1], [], []>} : vector<8x8xbf16>, vector<8x10xbf16>, vector<8x10xf32> -> vector<8x10xf32>
    %851 = arith.addf %850, %825 : vector<8x10xf32>
    %cst_196 = arith.constant dense<0xFF800000> : vector<8xf32>
    %852 = vector.multi_reduction <maximumf>, %851, %cst_196 [1] : vector<8x10xf32> to vector<8xf32>
    %853 = vector.shape_cast %852 : vector<8xf32> to vector<8x1xf32>
    %854 = vector.broadcast %853 : vector<8x1xf32> to vector<8x10xf32>
    %855 = arith.subf %851, %854 : vector<8x10xf32>
    %856 = math.exp %855 : vector<8x10xf32>
    %cst_197 = arith.constant dense<0.000000e+00> : vector<8xf32>
    %857 = vector.multi_reduction <add>, %856, %cst_197 [1] : vector<8x10xf32> to vector<8xf32>
    %858 = vector.shape_cast %857 : vector<8xf32> to vector<8x1xf32>
    %859 = tpu.reciprocal %858 {approx = true} : vector<8x1xf32> -> vector<8x1xf32>
    %860 = vector.broadcast %859 : vector<8x1xf32> to vector<8x10xf32>
    %861 = arith.mulf %856, %860 : vector<8x10xf32>
    %862 = arith.truncf %861 : vector<8x10xf32> to vector<8x10xbf16>
    %863 = vector.extract_strided_slice %830 {offsets = [0, 8], sizes = [10, 8], strides = [1, 1]} : vector<10x32xbf16> to vector<10x8xbf16>
    %cst_198 = arith.constant dense<0.000000e+00> : vector<8x8xf32>
    %864 = tpu.matmul %862, %863, %cst_198 {dimension_numbers = #tpu.dot_dimension_numbers<[1], [0], [0], [1], [0, 0, 1, 1], [], []>} : vector<8x10xbf16>, vector<10x8xbf16>, vector<8x8xf32> -> vector<8x8xf32>
    %865 = vector.extract_strided_slice %827 {offsets = [0, 16], sizes = [8, 8], strides = [1, 1]} : vector<8x32xbf16> to vector<8x8xbf16>
    %866 = vector.extract_strided_slice %829 {offsets = [16, 0], sizes = [8, 10], strides = [1, 1]} : vector<32x10xbf16> to vector<8x10xbf16>
    %cst_199 = arith.constant dense<0.000000e+00> : vector<8x10xf32>
    %867 = tpu.matmul %865, %866, %cst_199 {dimension_numbers = #tpu.dot_dimension_numbers<[1], [0], [0], [1], [0, 0, 1, 1], [], []>} : vector<8x8xbf16>, vector<8x10xbf16>, vector<8x10xf32> -> vector<8x10xf32>
    %868 = arith.addf %867, %825 : vector<8x10xf32>
    %cst_200 = arith.constant dense<0xFF800000> : vector<8xf32>
    %869 = vector.multi_reduction <maximumf>, %868, %cst_200 [1] : vector<8x10xf32> to vector<8xf32>
    %870 = vector.shape_cast %869 : vector<8xf32> to vector<8x1xf32>
    %871 = vector.broadcast %870 : vector<8x1xf32> to vector<8x10xf32>
    %872 = arith.subf %868, %871 : vector<8x10xf32>
    %873 = math.exp %872 : vector<8x10xf32>
    %cst_201 = arith.constant dense<0.000000e+00> : vector<8xf32>
    %874 = vector.multi_reduction <add>, %873, %cst_201 [1] : vector<8x10xf32> to vector<8xf32>
    %875 = vector.shape_cast %874 : vector<8xf32> to vector<8x1xf32>
    %876 = tpu.reciprocal %875 {approx = true} : vector<8x1xf32> -> vector<8x1xf32>
    %877 = vector.broadcast %876 : vector<8x1xf32> to vector<8x10xf32>
    %878 = arith.mulf %873, %877 : vector<8x10xf32>
    %879 = arith.truncf %878 : vector<8x10xf32> to vector<8x10xbf16>
    %880 = vector.extract_strided_slice %830 {offsets = [0, 16], sizes = [10, 8], strides = [1, 1]} : vector<10x32xbf16> to vector<10x8xbf16>
    %cst_202 = arith.constant dense<0.000000e+00> : vector<8x8xf32>
    %881 = tpu.matmul %879, %880, %cst_202 {dimension_numbers = #tpu.dot_dimension_numbers<[1], [0], [0], [1], [0, 0, 1, 1], [], []>} : vector<8x10xbf16>, vector<10x8xbf16>, vector<8x8xf32> -> vector<8x8xf32>
    %882 = vector.extract_strided_slice %827 {offsets = [0, 24], sizes = [8, 8], strides = [1, 1]} : vector<8x32xbf16> to vector<8x8xbf16>
    %883 = vector.extract_strided_slice %829 {offsets = [24, 0], sizes = [8, 10], strides = [1, 1]} : vector<32x10xbf16> to vector<8x10xbf16>
    %cst_203 = arith.constant dense<0.000000e+00> : vector<8x10xf32>
    %884 = tpu.matmul %882, %883, %cst_203 {dimension_numbers = #tpu.dot_dimension_numbers<[1], [0], [0], [1], [0, 0, 1, 1], [], []>} : vector<8x8xbf16>, vector<8x10xbf16>, vector<8x10xf32> -> vector<8x10xf32>
    %885 = arith.addf %884, %825 : vector<8x10xf32>
    %cst_204 = arith.constant dense<0xFF800000> : vector<8xf32>
    %886 = vector.multi_reduction <maximumf>, %885, %cst_204 [1] : vector<8x10xf32> to vector<8xf32>
    %887 = vector.shape_cast %886 : vector<8xf32> to vector<8x1xf32>
    %888 = vector.broadcast %887 : vector<8x1xf32> to vector<8x10xf32>
    %889 = arith.subf %885, %888 : vector<8x10xf32>
    %890 = math.exp %889 : vector<8x10xf32>
    %cst_205 = arith.constant dense<0.000000e+00> : vector<8xf32>
    %891 = vector.multi_reduction <add>, %890, %cst_205 [1] : vector<8x10xf32> to vector<8xf32>
    %892 = vector.shape_cast %891 : vector<8xf32> to vector<8x1xf32>
    %893 = tpu.reciprocal %892 {approx = true} : vector<8x1xf32> -> vector<8x1xf32>
    %894 = vector.broadcast %893 : vector<8x1xf32> to vector<8x10xf32>
    %895 = arith.mulf %890, %894 : vector<8x10xf32>
    %896 = arith.truncf %895 : vector<8x10xf32> to vector<8x10xbf16>
    %897 = vector.extract_strided_slice %830 {offsets = [0, 24], sizes = [10, 8], strides = [1, 1]} : vector<10x32xbf16> to vector<10x8xbf16>
    %cst_206 = arith.constant dense<0.000000e+00> : vector<8x8xf32>
    %898 = tpu.matmul %896, %897, %cst_206 {dimension_numbers = #tpu.dot_dimension_numbers<[1], [0], [0], [1], [0, 0, 1, 1], [], []>} : vector<8x10xbf16>, vector<10x8xbf16>, vector<8x8xf32> -> vector<8x8xf32>
    %899 = tpu.concatenate %847, %864, %881, %898 in 1 : vector<8x8xf32>, vector<8x8xf32>, vector<8x8xf32>, vector<8x8xf32> -> vector<8x32xf32>
    %900 = arith.truncf %899 : vector<8x32xf32> to vector<8x32xbf16>
    %cst_207 = arith.constant dense<0.000000e+00> : vector<8x32xf32>
    %901 = tpu.matmul %900, %826, %cst_207 {dimension_numbers = #tpu.dot_dimension_numbers<[1], [0], [0], [1], [0, 0, 1, 1], [], []>} : vector<8x32xbf16>, vector<32x32xbf16>, vector<8x32xf32> -> vector<8x32xf32>
    %902 = tpu.concatenate %811, %901 in 0 : vector<8x32xf32>, vector<8x32xf32> -> vector<16x32xf32>
    %903 = arith.addf %686, %902 : vector<16x32xf32>
    %904 = vector.extract_strided_slice %483 {offsets = [224], sizes = [32], strides = [1]} : vector<352xf32> to vector<32xf32>
    %905 = vector.shape_cast %904 : vector<32xf32> to vector<1x32xf32>
    %906 = vector.broadcast %905 : vector<1x32xf32> to vector<16x32xf32>
    %907 = arith.addf %903, %906 : vector<16x32xf32>
    %908 = vector.extract_strided_slice %3 {offsets = [5, 0, 0], sizes = [1, 1, 32], strides = [1, 1, 1]} : vector<7x2x32xf32> to vector<1x1x32xf32>
    %909 = vector.shape_cast %908 : vector<1x1x32xf32> to vector<32xf32>
    %910 = vector.extract_strided_slice %3 {offsets = [5, 1, 0], sizes = [1, 1, 32], strides = [1, 1, 1]} : vector<7x2x32xf32> to vector<1x1x32xf32>
    %911 = vector.shape_cast %910 : vector<1x1x32xf32> to vector<32xf32>
    %cst_208 = arith.constant dense<0.000000e+00> : vector<16xf32>
    %912 = vector.multi_reduction <add>, %907, %cst_208 [1] : vector<16x32xf32> to vector<16xf32>
    %913 = vector.shape_cast %912 : vector<16xf32> to vector<16x1xf32>
    %cst_209 = arith.constant 3.200000e+01 : f32
    %914 = vector.broadcast %cst_209 : f32 to vector<16x1xf32>
    %915 = arith.divf %913, %914 : vector<16x1xf32>
    %916 = vector.broadcast %915 : vector<16x1xf32> to vector<16x32xf32>
    %917 = arith.subf %907, %916 : vector<16x32xf32>
    %918 = arith.mulf %917, %917 : vector<16x32xf32>
    %cst_210 = arith.constant dense<0.000000e+00> : vector<16xf32>
    %919 = vector.multi_reduction <add>, %918, %cst_210 [1] : vector<16x32xf32> to vector<16xf32>
    %920 = vector.shape_cast %919 : vector<16xf32> to vector<16x1xf32>
    %cst_211 = arith.constant 0.0322580636 : f32
    %921 = vector.broadcast %cst_211 : f32 to vector<16x1xf32>
    %922 = arith.mulf %920, %921 : vector<16x1xf32>
    %923 = vector.broadcast %915 : vector<16x1xf32> to vector<16x32xf32>
    %924 = arith.subf %907, %923 : vector<16x32xf32>
    %925 = vector.shape_cast %909 : vector<32xf32> to vector<1x32xf32>
    %926 = vector.broadcast %925 : vector<1x32xf32> to vector<16x32xf32>
    %927 = arith.mulf %926, %924 : vector<16x32xf32>
    %928 = math.sqrt %922 : vector<16x1xf32>
    %cst_212 = arith.constant 9.99999997E-7 : f32
    %929 = vector.broadcast %cst_212 : f32 to vector<16x1xf32>
    %930 = arith.addf %928, %929 : vector<16x1xf32>
    %931 = vector.broadcast %930 : vector<16x1xf32> to vector<16x32xf32>
    %932 = arith.divf %927, %931 : vector<16x32xf32>
    %933 = vector.shape_cast %911 : vector<32xf32> to vector<1x32xf32>
    %934 = vector.broadcast %933 : vector<1x32xf32> to vector<16x32xf32>
    %935 = arith.addf %932, %934 : vector<16x32xf32>
    %936 = vector.extract_strided_slice %479 {offsets = [0, 256], sizes = [32, 64], strides = [1, 1]} : vector<32x320xbf16> to vector<32x64xbf16>
    %937 = arith.truncf %935 : vector<16x32xf32> to vector<16x32xbf16>
    %cst_213 = arith.constant dense<0.000000e+00> : vector<16x64xf32>
    %938 = tpu.matmul %937, %936, %cst_213 {dimension_numbers = #tpu.dot_dimension_numbers<[1], [0], [0], [1], [0, 0, 1, 1], [], []>} : vector<16x32xbf16>, vector<32x64xbf16>, vector<16x64xf32> -> vector<16x64xf32>
    %939 = vector.extract_strided_slice %483 {offsets = [256], sizes = [64], strides = [1]} : vector<352xf32> to vector<64xf32>
    %940 = vector.shape_cast %939 : vector<64xf32> to vector<1x64xf32>
    %941 = vector.broadcast %940 : vector<1x64xf32> to vector<16x64xf32>
    %942 = arith.addf %938, %941 : vector<16x64xf32>
    %cst_214 = arith.constant 0.000000e+00 : f32
    %943 = vector.broadcast %cst_214 : f32 to vector<16x64xf32>
    %944 = arith.maximumf %942, %943 : vector<16x64xf32>
    %945 = arith.truncf %944 : vector<16x64xf32> to vector<16x64xbf16>
    %cst_215 = arith.constant dense<0.000000e+00> : vector<16x32xf32>
    %946 = tpu.matmul %945, %481, %cst_215 {dimension_numbers = #tpu.dot_dimension_numbers<[1], [0], [0], [1], [0, 0, 1, 1], [], []>} : vector<16x64xbf16>, vector<64x32xbf16>, vector<16x32xf32> -> vector<16x32xf32>
    %947 = arith.addf %907, %946 : vector<16x32xf32>
    %948 = vector.extract_strided_slice %483 {offsets = [320], sizes = [32], strides = [1]} : vector<352xf32> to vector<32xf32>
    %949 = vector.shape_cast %948 : vector<32xf32> to vector<1x32xf32>
    %950 = vector.broadcast %949 : vector<1x32xf32> to vector<16x32xf32>
    %951 = arith.addf %947, %950 : vector<16x32xf32>
    %952 = vector.extract_strided_slice %3 {offsets = [6, 0, 0], sizes = [1, 1, 32], strides = [1, 1, 1]} : vector<7x2x32xf32> to vector<1x1x32xf32>
    %953 = vector.shape_cast %952 : vector<1x1x32xf32> to vector<32xf32>
    %954 = vector.extract_strided_slice %3 {offsets = [6, 1, 0], sizes = [1, 1, 32], strides = [1, 1, 1]} : vector<7x2x32xf32> to vector<1x1x32xf32>
    %955 = vector.shape_cast %954 : vector<1x1x32xf32> to vector<32xf32>
    %cst_216 = arith.constant dense<0.000000e+00> : vector<16xf32>
    %956 = vector.multi_reduction <add>, %951, %cst_216 [1] : vector<16x32xf32> to vector<16xf32>
    %957 = vector.shape_cast %956 : vector<16xf32> to vector<16x1xf32>
    %cst_217 = arith.constant 3.200000e+01 : f32
    %958 = vector.broadcast %cst_217 : f32 to vector<16x1xf32>
    %959 = arith.divf %957, %958 : vector<16x1xf32>
    %960 = vector.broadcast %959 : vector<16x1xf32> to vector<16x32xf32>
    %961 = arith.subf %951, %960 : vector<16x32xf32>
    %962 = arith.mulf %961, %961 : vector<16x32xf32>
    %cst_218 = arith.constant dense<0.000000e+00> : vector<16xf32>
    %963 = vector.multi_reduction <add>, %962, %cst_218 [1] : vector<16x32xf32> to vector<16xf32>
    %964 = vector.shape_cast %963 : vector<16xf32> to vector<16x1xf32>
    %cst_219 = arith.constant 0.0322580636 : f32
    %965 = vector.broadcast %cst_219 : f32 to vector<16x1xf32>
    %966 = arith.mulf %964, %965 : vector<16x1xf32>
    %967 = vector.broadcast %959 : vector<16x1xf32> to vector<16x32xf32>
    %968 = arith.subf %951, %967 : vector<16x32xf32>
    %969 = vector.shape_cast %953 : vector<32xf32> to vector<1x32xf32>
    %970 = vector.broadcast %969 : vector<1x32xf32> to vector<16x32xf32>
    %971 = arith.mulf %970, %968 : vector<16x32xf32>
    %972 = math.sqrt %966 : vector<16x1xf32>
    %cst_220 = arith.constant 9.99999997E-7 : f32
    %973 = vector.broadcast %cst_220 : f32 to vector<16x1xf32>
    %974 = arith.addf %972, %973 : vector<16x1xf32>
    %975 = vector.broadcast %974 : vector<16x1xf32> to vector<16x32xf32>
    %976 = arith.divf %971, %975 : vector<16x32xf32>
    %977 = vector.shape_cast %955 : vector<32xf32> to vector<1x32xf32>
    %978 = vector.broadcast %977 : vector<1x32xf32> to vector<16x32xf32>
    %979 = arith.addf %976, %978 : vector<16x32xf32>
    %c0_221 = arith.constant 0 : index
    %c0_222 = arith.constant 0 : index
    %980 = vector.load %arg9[%c0_221, %c0_222] : memref<16x32xf32, #tpu.memory_space<vmem>>, vector<16x32xf32>
    tpu.vector_store %arg9[%c0_221, %c0_222], %979 {strides = array<i32>} : memref<16x32xf32, #tpu.memory_space<vmem>>, vector<16x32xf32>,
    return
  }
  func.func @transform_0(%arg0: i32) -> (i32, i32) {
    %c0_i32 = arith.constant 0 : i32
    %c0_i32_0 = arith.constant 0 : i32
    return %arg0, %c0_i32 : i32, i32
  }
  func.func @transform_1(%arg0: i32) -> (i32, i32, i32) {
    %c0_i32 = arith.constant 0 : i32
    %c0_i32_0 = arith.constant 0 : i32
    %c0_i32_1 = arith.constant 0 : i32
    return %arg0, %c0_i32, %c0_i32_0 : i32, i32, i32
  }
  func.func @transform_2(%arg0: i32) -> (i32, i32, i32) {
    %c0_i32 = arith.constant 0 : i32
    %c0_i32_0 = arith.constant 0 : i32
    %c0_i32_1 = arith.constant 0 : i32
    return %arg0, %c0_i32, %c0_i32_0 : i32, i32, i32
  }
  func.func @transform_3(%arg0: i32) -> (i32, i32, i32) {
    %c0_i32 = arith.constant 0 : i32
    %c0_i32_0 = arith.constant 0 : i32
    %c0_i32_1 = arith.constant 0 : i32
    return %arg0, %c0_i32, %c0_i32_0 : i32, i32, i32
  }
  func.func @transform_4(%arg0: i32) -> (i32, i32, i32) {
    %c0_i32 = arith.constant 0 : i32
    %c0_i32_0 = arith.constant 0 : i32
    %c0_i32_1 = arith.constant 0 : i32
    %c0_i32_2 = arith.constant 0 : i32
    return %c0_i32, %c0_i32_0, %c0_i32_1 : i32, i32, i32
  }
  func.func @transform_5(%arg0: i32) -> (i32, i32, i32) {
    %c0_i32 = arith.constant 0 : i32
    %c0_i32_0 = arith.constant 0 : i32
    %c0_i32_1 = arith.constant 0 : i32
    %c0_i32_2 = arith.constant 0 : i32
    return %c0_i32, %c0_i32_0, %c0_i32_1 : i32, i32, i32
  }
  func.func @transform_6(%arg0: i32) -> (i32, i32) {
    %c0_i32 = arith.constant 0 : i32
    %c0_i32_0 = arith.constant 0 : i32
    %c0_i32_1 = arith.constant 0 : i32
    return %c0_i32, %c0_i32_0 : i32, i32
  }
  func.func @transform_7(%arg0: i32) -> (i32, i32, i32) {
    %c0_i32 = arith.constant 0 : i32
    %c0_i32_0 = arith.constant 0 : i32
    %c0_i32_1 = arith.constant 0 : i32
    %c0_i32_2 = arith.constant 0 : i32
    return %c0_i32, %c0_i32_0, %c0_i32_1 : i32, i32, i32
  }
  func.func @transform_8(%arg0: i32) -> (i32, i32) {
    %c0_i32 = arith.constant 0 : i32
    %c0_i32_0 = arith.constant 0 : i32
    return %arg0, %c0_i32 : i32, i32
  }
}

</mosaic_0001>

<bundles_post_ra>
// kernel: tpu_custom_call.1
= control target key start
LH: loop header
LB: loop body
LE: loop exit
PB: predicated region body
PF: predicated region fallthrough
CT: control target
= control target key end

     0   :  { %13 = vsyncpa [#allocation3], 0  ;;  %s7897_s0 = inlined_call_operand.vmem [shape: f32[16,32], index: 0, kind: input, shape index: {}]   ;;  %s7898_s1 = inlined_call_operand.vmem [shape: f32[2,10,32], index: 1, kind: input, shape index: {}]   ;;  %s7899_s2 = inlined_call_operand.hbm [shape: f32[2,8,10], index: 2, kind: input, shape index: {}]   ;;  %s7900_s3 = inlined_call_operand.hbm [shape: f32[2,8,8], index: 3, kind: input, shape index: {}]   ;;  %s7901_s4 = inlined_call_operand.vmem [shape: bf16[2,32,320], index: 4, kind: input, shape index: {}]   ;;  %s7902_s5 = inlined_call_operand.vmem [shape: bf16[2,64,32], index: 5, kind: input, shape index: {}]   ;;  %s7903_s6 = inlined_call_operand.hbm [shape: f32[2,352], index: 6, kind: input, shape index: {}]   ;;  %s7904_s7 = inlined_call_operand.vmem [shape: f32[7,2,32], index: 7, kind: input, shape index: {}]   ;;  %s7905_s8 = inlined_call_operand.hbm [shape: f32[16,32], index: 8, kind: output, shape index: {}]  }
   0x1   :  { %14 = vsyncpa [#allocation6], 0 }
   0x2   :  { %15 = vsyncpa [#allocation4], 0  ;;  %s6760_s27 = smov [#allocation5]   ;;  %s6761_s29 = smov [#allocation2]  }
   0x3   :  { %s37_s28 = sshll.u32 %s6760_s27, 4  ;;  %s25_s30 = sshll.u32 %s6761_s29, 4  ;;  %s38_s28 = int_to_ptr.vmem [resolvable:$true] %s37_s28  ;;  %s26_s30 = int_to_ptr.vmem [resolvable:$true] %s25_s30 }
   0x4   :  { %s6682_s9 = scalar_lea.vmem %s38_s28, 256  ;;  %p6687_p1 = scmp.lt.s32.totalorder %s38_s28, %s38_s28 }
   0x5   :  { %p6683_p0 = scmp.ne.s32.totalorder %s38_s28, %s6682_s9  ;;  %p6688_p2 = scmp.lt.s32.totalorder %s6682_s9, %s6682_s9 }
   0x7   :  { %p6689_p3 = por %p6688_p2, %p6687_p1 }
   0x9   :  { %p6690_p4 = pnand %p6689_p3, %p6683_p0 }
   0xb   :  { %6693 = shalt.err (!%p6690_p4)
}
   0xc   :  { %s6762_s10 = smov 128   ;;  %s6763_s11 = smov 8  }
   0xd   :  { %43 = dma.hbm_to_vmem [thread:$0]  %s7900_s3, 256, %s38_s28, [#allocation6], %s6762_s10, %s6762_s10, %s6763_s11  }
   0xe   :  { %s6702_s14 = scalar_lea.vmem %s26_s30, 256  ;;  %p6707_p6 = scmp.lt.s32.totalorder %s26_s30, %s26_s30 }
   0xf   :  { %p6703_p5 = scmp.ne.s32.totalorder %s26_s30, %s6702_s14  ;;  %p6708_p7 = scmp.lt.s32.totalorder %s6702_s14, %s6702_s14 }
  0x11   :  { %p6709_p8 = por %p6708_p7, %p6707_p6 }
  0x13   :  { %p6710_p9 = pnand %p6709_p8, %p6703_p5 }
  0x15   :  { %6713 = shalt.err (!%p6710_p9)
}
  0x16   :  { %31 = dma.hbm_to_vmem [thread:$0]  %s7899_s2, 256, %s26_s30, [#allocation3], %s6762_s10, %s6762_s10, %s6763_s11  }
  0x17   :  { %s6764_s17 = smov [#allocation7]  }
  0x18   :  { %s54_s18 = sshll.u32 %s6764_s17, 4  ;;  %s55_s18 = int_to_ptr.vmem [resolvable:$true] %s54_s18 }
  0x19   :  { %s6722_s19 = scalar_lea.vmem %s55_s18, 96  ;;  %p6727_p11 = scmp.lt.s32.totalorder %s55_s18, %s55_s18 }
  0x1a   :  { %p6723_p10 = scmp.ne.s32.totalorder %s55_s18, %s6722_s19  ;;  %p6728_p12 = scmp.lt.s32.totalorder %s6722_s19, %s6722_s19 }
  0x1c   :  { %p6729_p13 = por %p6728_p12, %p6727_p11 }
  0x1e   :  { %p6730_p0 = pnand %p6729_p13, %p6723_p10 }
  0x20   :  { %6733 = shalt.err (!%p6730_p0)
}
  0x21   :  { %57 = dma.hbm_to_vmem [thread:$0]  %s7903_s6, 96, %s55_s18, [#allocation6]  }
  0x22   :  { %6754 = dma.done.wait [#allocation3], 256  }
  0x23   :  { %6755 = vsyncadd [#allocation3], 4294967040 }
  0x24   :  { %6756 = dma.done.wait [#allocation6], 352  }
  0x25   :  { %6757 = vsyncadd [#allocation6], 4294966944  ;;  %vm100_vm0 = vcmask 261120   ;;  %v6845_v0 = vld [vmem:[%s7897_s0] sm:$0xff]  ;;  %v6850_v1 = vld [vmem:[%s7897_s0 + $0x8] sm:$0xff]  ;;  %v6765_v15 = vmov 0.0   ;;  %v122_v27 = vlaneseq }
  0x26   :  { %v101_v2 = vsel %vm100_vm0, %v6845_v0, 0.0  ;;  %v104_v3 = vsel %vm100_vm0, %v6850_v1, 0.0  ;;  %v6863_v14 = vld [vmem:[%s7901_s4 + $0x18] ss:$12 sps:$4 sm:$0xff]   ;;  %5886 = vmatprep.subr.bf16.mxu0 %v6765_v15  ;;  %vm6766_vm1 = vmmov 0   ;;  %5900 = vmatprep.subr.bf16.mxu1 %v6765_v15  ;;  %s6767_s28 = smov 96  }
  0x27   :  { %102 = vadd.xlane.f32.xlu0 %v101_v2  ;;  %5890 = vmatprep.mubr.msk.bf16.mxu0 %vm6766_vm1, %v6765_v15  ;;  %v6872_v16 = vld [vmem:[%s7901_s4] ss:$12 sps:$4 sm:$0xff]   ;;  %v123_v33 = vshrl.u32 %v122_v27, 7  ;;  %s6768_s29 = smov 120   ;;  %s6769_s30 = smov 104   ;;  %vm260_vm6 = vcmask 1043456  }
  0x28   :  { %5887 = vmatpush3.bf16.msra.mxu0 %v6863_v14  ;;  %5902 = vmatprep.mubr.msk.bf16.mxu1 %vm6766_vm1, %v6765_v15  ;;  %v76_v36 = vld [vmem:[%s7904_s7] sm:$0x3]  ;;  %s6770_s9 = smov 112   ;;  %vm256_vm7 = vcmask 64512   ;;  %s6771_s12 = smov 64   ;;  %vm706_vm8 = vcmask 130048  }
  0x29   :  { %5888 = vmatprep.subr.bf16.mxu0 %v6765_v15  ;;  %v6880_v35 = vsub.s32 0, %v123_v33  ;;  %v6886_v38 = vsub.s32 1, %v123_v33  ;;  %v6892_v49 = vld [vmem:[#allocation7] ss:$2 sm:$0x7]  ;;  %s6772_s13 = smov 48  }
  0x2a   :  { %s6773_s14 = smov 40   ;;  %s6774_s15 = smov 56   ;;  %vm708_vm9 = vcmask 195584   ;;  %vm1554_vm14 = vcmask 80896   ;;  %vm1573_vm15 = vcmask 1044480  }
  0x2b   :  { %105 = vadd.xlane.f32.xlu0 %v104_v3  ;;  %v125_v37 = vrot.slane %v76_v36, %v6880_v35  ;;  %v151_v41 = vrot.slane %v76_v36, %v6886_v38  ;;  %v6896_v50 = vrot.slane %v6892_v49, %v6880_v35  ;;  %s6775_s16 = smov 32   ;;  %s6776_s17 = smov 16  }
  0x2c   :  { %5889 = vmatpush3.bf16.msra.mxu0 %v6872_v16  ;;  %s6777_s18 = smov 24   ;;  %s6778_s25 = smov 88  }
  0x2d   :  { %5894 = vmatprep.subr.bf16.mxu0 %v6765_v15  ;;  %s6779_s26 = smov 80   ;;  %s6780_s27 = smov 72  }
  0x2e   :  { %s6781_s0 = smov [#allocation8]  }
  0x2f   :  { %s5559_s6 = sshll.u32 %s6781_s0, 4  ;;  %s5560_s6 = int_to_ptr.vmem [resolvable:$true] %s5559_s6 }
  0x30   :  { %p6739_p2 = scmp.lt.s32.totalorder %s5560_s6, %s5560_s6 }
  0xb0   :  { %v103_v4 = vpop.xlane.xlu0 %102 }
  0xb1   :  { %v108_v5 = vmul.f32 0.03125, %v103_v4 }
  0xb3   :  { %v110_v6 = vsub.f32 %v6845_v0, %v108_v5 }
  0xb4   :  { %v106_v7 = vpop.xlane.xlu0 %105 }
  0xb5   :  { %v109_v8 = vmul.f32 0.03125, %v106_v7  ;;  %v112_v9 = vmul.f32 %v110_v6, %v110_v6  ;;  %v126_v40 = vmul.f32 %v125_v37, %v110_v6 }
  0xb7   :  { %v111_v10 = vsub.f32 %v6850_v1, %v109_v8  ;;  %v114_v11 = vsel %vm100_vm0, %v112_v9, 0.0 }
  0xb8   :  { %115 = vadd.xlane.f32.xlu1 %v114_v11  ;;  %v74_v11 = vld [vmem:[#allocation5] sm:$0xff] }
  0xb9   :  { %v113_v12 = vmul.f32 %v111_v10, %v111_v10  ;;  %v127_v42 = vmul.f32 %v125_v37, %v111_v10 }
  0xbb   :  { %v117_v13 = vsel %vm100_vm0, %v113_v12, 0.0 }
  0xbc   :  { %118 = vadd.xlane.f32.xlu1 %v117_v13 }
 0x141   :  { %v116_v17 = vpop.xlane.xlu1 %115 }
 0x142   :  { %v120_v18 = vmul.f32 0.032258064, %v116_v17 }
 0x144   :  { %6484 = vrsqrt.f32 %v120_v18  ;;  %vm130_vm2 = vcmp.eq.f32.partialorder %v120_v18, inf  ;;  %v133_v23 = vand.u32 2147483648, %v120_v18  ;;  %vm132_vm3 = vcmp.eq.f32.partialorder %v120_v18, 0.0 }
 0x145   :  { %v119_v19 = vpop.xlane.xlu1 %118 }
 0x146   :  { %v121_v20 = vmul.f32 0.032258064, %v119_v19 }
 0x148   :  { %6486 = vrsqrt.f32 %v121_v20  ;;  %vm137_vm4 = vcmp.eq.f32.partialorder %v121_v20, inf  ;;  %v140_v30 = vand.u32 2147483648, %v121_v20  ;;  %vm139_vm5 = vcmp.eq.f32.partialorder %v121_v20, 0.0 }
 0x151   :  { %v6485_v21 = vpop.eup %6484 }
 0x152   :  { %v129_v22 = vmul.f32 %v6485_v21, %v120_v18 }
 0x154   :  { %v131_v24 = vsel %vm130_vm2, %v120_v18, %v129_v22 }
 0x155   :  { %v6487_v25 = vpop.eup %6486  ;;  %v134_v26 = vsel %vm132_vm3, %v133_v23, %v131_v24 }
 0x156   :  { %v142_v28 = vadd.f32 1e-06, %v134_v26  ;;  %v136_v29 = vmul.f32 %v6487_v25, %v121_v20 }
 0x158   :  { %6488 = vrcp.f32 %v142_v28  ;;  %v138_v31 = vsel %vm137_vm4, %v121_v20, %v136_v29 }
 0x159   :  { %v141_v32 = vsel %vm139_vm5, %v140_v30, %v138_v31 }
 0x15a   :  { %v143_v34 = vadd.f32 1e-06, %v141_v32 }
 0x15c   :  { %6490 = vrcp.f32 %v143_v34 }
 0x165   :  { %v6489_v39 = vpop.eup %6488 }
 0x166   :  { %v145_v43 = vmul.f32 %v6489_v39, %v126_v40 }
 0x168   :  { %v152_v46 = vadd.f32 %v151_v41, %v145_v43 }
 0x169   :  { %v6491_v44 = vpop.eup %6490 }
 0x16a   :  { %v147_v45 = vmul.f32 %v6491_v44, %v127_v42 }
 0x16c   :  { %v153_v47 = vadd.f32 %v151_v41, %v147_v45 }
 0x16e   :  { %v154_v48 = vpack.c.bf16 %v153_v47, %v152_v46 }
 0x170   :  { %5891 = vmatmul.mubr.msk.bf16.vlgmr.msra.gmra.mxu0 %vm100_vm0, %v154_v48 }
 0x171   :  { %5896 = vmatprep.mubr.msk.bf16.mxu0 %vm6766_vm1, %v6765_v15 }
 0x230   :  { %v210_v51 = vpop.f32.mrf.mxu0 }
 0x231   :  { %v211_v52 = vadd.f32 %v210_v51, %v6896_v50 }
 0x232   :  { %v5892_v53 = vpop.f32.mrf.mxu0 }
 0x233   :  { %v6899_v54 = vpack.c.bf16 %v211_v52, %v211_v52  ;;  %219 = vrot.lane.b32.xlu0 %v211_v52, %s6767_s28 }
 0x234   :  { %v6902_v55 = vpop.f32.mrf.mxu0 }
 0x235   :  { %365 = vrot.lane.b32.xlu1 %v6899_v54, %s6768_s29  ;;  %v214_v41 = vadd.f32 %v6902_v55, %v6896_v50 }
 0x236   :  { %v5893_v56 = vpop.f32.mrf.mxu0 }
 0x237   :  { %583 = vrot.lane.b32.xlu0 %v6899_v54, %s6769_s30  ;;  %v6944_v42 = vpack.c.bf16 %v214_v41, %v214_v41 }
 0x239   :  { %475 = vrot.lane.b32.xlu1 %v6899_v54, %s6770_s9 }
 0x2a5   :  { %v220_v57 = vpop.permute.xlu0 %219 }
 0x2a6   :  { %222 = vxpose.xlu1.b32.start.end [1/1] (short) (narrow) %v220_v57, 32 }
 0x2a7   :  { %v366_v58 = vpop.permute.xlu1 %365 }
 0x2a9   :  { %v584_v10 = vpop.permute.xlu0 %583 }
 0x2ab   :  { %v476_v59 = vpop.permute.xlu1 %475 }
 0x322   :  { %v238_v60 = vpop.trf.xlu1 }
 0x326   :  { %v239_v61 = vpop.trf.xlu1 }
 0x327   :  { %v254_v62 = vpack.c.bf16 %v239_v61, %v238_v60 }
 0x329   :  { %v262_v63 = vsel %vm260_vm6, %v254_v62, 0  ;;  %v368_v2 = vrot.slane %v254_v62, 4 }
 0x32a   :  { %5895 = vmatpush3.bf16.msra.mxu0 %v262_v63  ;;  %v240_v3 = vpop.trf.xlu1 }
 0x32b   :  { %5906 = vmatprep.subr.bf16.mxu0 %v6765_v15  ;;  %v373_v4 = vsel %vm260_vm6, %v368_v2, 0 }
 0x32d   :  { %5897 = vmatmul.mubr.msk.bf16.vlgmr.msra.gmra.mxu0 %vm256_vm7, %v6899_v54 }
 0x32e   :  { %5907 = vmatpush3.bf16.msra.mxu0 %v373_v4  ;;  %v241_v5 = vpop.trf.xlu1  ;;  %5908 = vmatprep.mubr.msk.bf16.mxu0 %vm6766_vm1, %v6765_v15 }
 0x32f   :  { %v255_v6 = vpack.c.bf16 %v241_v5, %v240_v3  ;;  %5918 = vmatprep.subr.bf16.mxu0 %v6765_v15 }
 0x331   :  { %v481_v7 = vsel %vm260_vm6, %v255_v6, 0  ;;  %v586_v8 = vrot.slane %v255_v6, 4 }
 0x333   :  { %v591_v9 = vsel %vm260_vm6, %v586_v8, 0 }
 0x335   :  { %5909 = vmatmul.mubr.msk.bf16.vlgmr.msra.gmra.mxu0 %vm256_vm7, %v366_v58 }
 0x336   :  { %5919 = vmatpush3.bf16.msra.mxu0 %v481_v7  ;;  %5920 = vmatprep.mubr.msk.bf16.mxu0 %vm6766_vm1, %v6765_v15 }
 0x337   :  { %5930 = vmatprep.subr.bf16.mxu0 %v6765_v15 }
 0x33d   :  { %5921 = vmatmul.mubr.msk.bf16.vlgmr.msra.gmra.mxu0 %vm256_vm7, %v476_v59 }
 0x33e   :  { %5931 = vmatpush3.bf16.msra.mxu0 %v591_v9  ;;  %5932 = vmatprep.mubr.msk.bf16.mxu0 %vm6766_vm1, %v6765_v15 }
 0x33f   :  { %5942 = vmatprep.subr.bf16.mxu0 %v6765_v15 }
 0x345   :  { %5933 = vmatmul.mubr.msk.bf16.vlgmr.msra.gmra.mxu0 %vm256_vm7, %v584_v10 }
 0x346   :  { %5946 = vmatprep.mubr.msk.bf16.mxu0 %vm6766_vm1, %v6765_v15 }
 0x3ed   :  { %v298_v12 = vpop.f32.mrf.mxu0 }
 0x3ee   :  { %v299_v13 = vadd.f32 %v298_v12, %v74_v11 }
 0x3ef   :  { %v5898_v17 = vpop.f32.mrf.mxu0 }
 0x3f0   :  { %v304_v18 = vsel %vm256_vm7, %v299_v13, -inf }
 0x3f1   :  { %305 = vmax.xlane.f32.xlu0 %v304_v18  ;;  %v301_v19 = vpop.f32.mrf.mxu0 }
 0x3f3   :  { %v5899_v20 = vpop.f32.mrf.mxu0 }
 0x3f5   :  { %v409_v21 = vpop.f32.mrf.mxu0 }
 0x3f6   :  { %v410_v22 = vadd.f32 %v409_v21, %v74_v11 }
 0x3f7   :  { %v5910_v23 = vpop.f32.mrf.mxu0 }
 0x3f8   :  { %v415_v24 = vsel %vm256_vm7, %v410_v22, -inf }
 0x3f9   :  { %416 = vmax.xlane.f32.xlu0 %v415_v24  ;;  %v412_v25 = vpop.f32.mrf.mxu0 }
 0x3fb   :  { %v5911_v26 = vpop.f32.mrf.mxu0 }
 0x3fd   :  { %v517_v27 = vpop.f32.mrf.mxu0 }
 0x3fe   :  { %v518_v28 = vadd.f32 %v517_v27, %v74_v11 }
 0x3ff   :  { %v5922_v29 = vpop.f32.mrf.mxu0 }
 0x400   :  { %v523_v30 = vsel %vm256_vm7, %v518_v28, -inf }
 0x401   :  { %524 = vmax.xlane.f32.xlu0 %v523_v30  ;;  %v520_v31 = vpop.f32.mrf.mxu0 }
 0x403   :  { %v5923_v32 = vpop.f32.mrf.mxu0 }
 0x405   :  { %v627_v33 = vpop.f32.mrf.mxu0 }
 0x406   :  { %v628_v34 = vadd.f32 %v627_v33, %v74_v11 }
 0x407   :  { %v5934_v36 = vpop.f32.mrf.mxu0 }
 0x408   :  { %v633_v37 = vsel %vm256_vm7, %v628_v34, -inf }
 0x409   :  { %634 = vmax.xlane.f32.xlu1 %v633_v37  ;;  %v630_v39 = vpop.f32.mrf.mxu0 }
 0x40b   :  { %v5935_v40 = vpop.f32.mrf.mxu0 }
 0x417   :  { %762 = vrot.lane.b32.xlu0 %v214_v41, %s6767_s28 }
 0x41a   :  { %317 = vrot.lane.b32.xlu1 %v6899_v54, %s6771_s12 }
 0x41e   :  { %535 = vrot.lane.b32.xlu1 %v6899_v54, %s6772_s13 }
 0x422   :  { %645 = vrot.lane.b32.xlu1 %v6899_v54, %s6773_s14 }
 0x426   :  { %906 = vrot.lane.b32.xlu1 %v6944_v42, %s6768_s29 }
 0x42a   :  { %1016 = vrot.lane.b32.xlu1 %v6944_v42, %s6770_s9 }
 0x47a   :  { %v306_v43 = vpop.xlane.xlu0 %305 }
 0x47b   :  { %v307_v44 = vsub.f32 %v299_v13, %v306_v43 }
 0x47d   :  { %v308_v45 = vmul.f32 1.442695, %v307_v44 }
 0x47f   :  { %6492 = vpow2.f32 %v308_v45 }
 0x482   :  { %v417_v46 = vpop.xlane.xlu0 %416 }
 0x483   :  { %v418_v47 = vsub.f32 %v410_v22, %v417_v46 }
 0x485   :  { %v419_v48 = vmul.f32 1.442695, %v418_v47 }
 0x487   :  { %6494 = vpow2.f32 %v419_v48 }
 0x48a   :  { %v525_v51 = vpop.xlane.xlu0 %524 }
 0x48b   :  { %v526_v52 = vsub.f32 %v518_v28, %v525_v51 }
 0x48c   :  { %v6493_v53 = vpop.eup %6492 }
 0x48d   :  { %v527_v55 = vmul.f32 1.442695, %v526_v52  ;;  %v310_v56 = vsel %vm256_vm7, %v6493_v53, 0.0 }
 0x48e   :  { %311 = vadd.xlane.f32.xlu0 %v310_v56  ;;  %v763_v57 = vpop.permute.xlu0 %762 }
 0x48f   :  { %6496 = vpow2.f32 %v527_v55  ;;  %765 = vxpose.xlu1.b32.start.end [1/1] (short) (narrow) %v763_v57, 32 }
 0x492   :  { %v635_v58 = vpop.xlane.xlu1 %634 }
 0x493   :  { %v636_v59 = vsub.f32 %v628_v34, %v635_v58 }
 0x494   :  { %v6495_v60 = vpop.eup %6494 }
 0x495   :  { %v637_v61 = vmul.f32 1.442695, %v636_v59  ;;  %v421_v62 = vsel %vm256_vm7, %v6495_v60, 0.0 }
 0x496   :  { %422 = vadd.xlane.f32.xlu0 %v421_v62  ;;  %v318_v63 = vpop.permute.xlu1 %317 }
 0x497   :  { %6498 = vpow2.f32 %v637_v61  ;;  %v323_v2 = vsel %vm260_vm6, %v318_v63, 0 }
 0x498   :  { %5901 = vmatpush3.bf16.msra.mxu1 %v323_v2 }
 0x499   :  { %5912 = vmatprep.subr.bf16.mxu1 %v6765_v15 }
 0x49a   :  { %v536_v9 = vpop.permute.xlu1 %535 }
 0x49b   :  { %v541_v26 = vsel %vm260_vm6, %v536_v9, 0 }
 0x49c   :  { %v6497_v3 = vpop.eup %6496 }
 0x49d   :  { %v529_v4 = vsel %vm256_vm7, %v6497_v3, 0.0 }
 0x49e   :  { %530 = vadd.xlane.f32.xlu0 %v529_v4  ;;  %v646_v17 = vpop.permute.xlu1 %645 }
 0x49f   :  { %v651_v32 = vsel %vm260_vm6, %v646_v17, 0 }
 0x4a2   :  { %v907_v18 = vpop.permute.xlu1 %906 }
 0x4a4   :  { %v6499_v5 = vpop.eup %6498 }
 0x4a5   :  { %v639_v6 = vsel %vm256_vm7, %v6499_v5, 0.0 }
 0x4a6   :  { %640 = vadd.xlane.f32.xlu0 %v639_v6  ;;  %v1017_v23 = vpop.permute.xlu1 %1016  ;;  %v75_v6 = vld [vmem:[#allocation5 + $0x8] sm:$0xff] }
 0x4bc   :  { %427 = vrot.lane.b32.xlu0 %v6899_v54, %s6774_s15 }
 0x4c0   :  { %1124 = vrot.lane.b32.xlu0 %v6944_v42, %s6769_s30 }
 0x50b   :  { %v781_v27 = vpop.trf.xlu1 }
 0x50f   :  { %v782_v31 = vpop.trf.xlu1 }
 0x510   :  { %v797_v33 = vpack.c.bf16 %v782_v31, %v781_v27 }
 0x512   :  { %v803_v37 = vsel %vm260_vm6, %v797_v33, 0  ;;  %v909_v40 = vrot.slane %v797_v33, 4 }
 0x513   :  { %v783_v39 = vpop.trf.xlu1 }
 0x514   :  { %v914_v43 = vsel %vm260_vm6, %v909_v40, 0 }
 0x517   :  { %v312_v7 = vpop.xlane.xlu0 %311  ;;  %v784_v41 = vpop.trf.xlu1 }
 0x518   :  { %6500 = vrcp.f32 %v312_v7  ;;  %v798_v44 = vpack.c.bf16 %v784_v41, %v783_v39 }
 0x51a   :  { %v1022_v45 = vsel %vm260_vm6, %v798_v44, 0  ;;  %v1127_v46 = vrot.slane %v798_v44, 4 }
 0x51c   :  { %v1132_v47 = vsel %vm260_vm6, %v1127_v46, 0 }
 0x51f   :  { %v423_v8 = vpop.xlane.xlu0 %422 }
 0x520   :  { %6502 = vrcp.f32 %v423_v8 }
 0x525   :  { %v6501_v10 = vpop.eup %6500 }
 0x526   :  { %v314_v11 = vmul.f32 %v6501_v10, %v6493_v53 }
 0x527   :  { %v531_v12 = vpop.xlane.xlu0 %530 }
 0x528   :  { %v315_v13 = vpack.c.bf16 %v314_v11, %v314_v11  ;;  %6504 = vrcp.f32 %v531_v12 }
 0x52a   :  { %5903 = vmatmul.mubr.msk.bf16.vlgmr.msra.gmra.mxu1 %vm256_vm7, %v315_v13 }
 0x52b   :  { %5914 = vmatprep.mubr.msk.bf16.mxu1 %vm6766_vm1, %v6765_v15 }
 0x52d   :  { %v6503_v54 = vpop.eup %6502 }
 0x52e   :  { %v425_v20 = vmul.f32 %v6503_v54, %v6495_v60 }
 0x52f   :  { %v641_v19 = vpop.xlane.xlu0 %640 }
 0x530   :  { %6506 = vrcp.f32 %v641_v19  ;;  %v426_v24 = vpack.c.bf16 %v425_v20, %v425_v20 }
 0x533   :  { %v428_v21 = vpop.permute.xlu0 %427 }
 0x534   :  { %v433_v22 = vsel %vm260_vm6, %v428_v21, 0 }
 0x535   :  { %5913 = vmatpush3.bf16.msra.mxu1 %v433_v22  ;;  %v6505_v25 = vpop.eup %6504 }
 0x536   :  { %5924 = vmatprep.subr.bf16.mxu1 %v6765_v15  ;;  %v533_v28 = vmul.f32 %v6505_v25, %v6497_v3 }
 0x537   :  { %v1125_v48 = vpop.permute.xlu0 %1124 }
 0x538   :  { %5915 = vmatmul.mubr.msk.bf16.vlgmr.msra.gmra.mxu1 %vm256_vm7, %v426_v24  ;;  %v534_v29 = vpack.c.bf16 %v533_v28, %v533_v28 }
 0x539   :  { %5925 = vmatpush3.bf16.msra.mxu1 %v541_v26  ;;  %5926 = vmatprep.mubr.msk.bf16.mxu1 %vm6766_vm1, %v6765_v15 }
 0x53a   :  { %5936 = vmatprep.subr.bf16.mxu1 %v6765_v15 }
 0x53d   :  { %v6507_v30 = vpop.eup %6506 }
 0x53e   :  { %v643_v34 = vmul.f32 %v6507_v30, %v6499_v5 }
 0x540   :  { %5927 = vmatmul.mubr.msk.bf16.vlgmr.msra.gmra.mxu1 %vm256_vm7, %v534_v29  ;;  %v644_v36 = vpack.c.bf16 %v643_v34, %v643_v34 }
 0x541   :  { %5937 = vmatpush3.bf16.msra.mxu1 %v651_v32  ;;  %5938 = vmatprep.mubr.msk.bf16.mxu1 %vm6766_vm1, %v6765_v15 }
 0x542   :  { %5950 = vmatprep.subr.bf16.mxu1 %v6765_v15 }
 0x548   :  { %5939 = vmatmul.mubr.msk.bf16.vlgmr.msra.gmra.mxu1 %vm256_vm7, %v644_v36 }
 0x549   :  { %5951 = vmatpush3.bf16.msra.mxu1 %v803_v37  ;;  %5952 = vmatprep.mubr.msk.bf16.mxu1 %vm6766_vm1, %v6765_v15 }
 0x54a   :  { %5962 = vmatprep.subr.bf16.mxu1 %v6765_v15 }
 0x550   :  { %5953 = vmatmul.mubr.msk.bf16.vlgmr.msra.gmra.mxu1 %vm256_vm7, %v6944_v42 }
 0x551   :  { %5963 = vmatpush3.bf16.msra.mxu1 %v914_v43  ;;  %5964 = vmatprep.mubr.msk.bf16.mxu1 %vm6766_vm1, %v6765_v15 }
 0x552   :  { %5974 = vmatprep.subr.bf16.mxu1 %v6765_v15 }
 0x558   :  { %5965 = vmatmul.mubr.msk.bf16.vlgmr.msra.gmra.mxu1 %vm256_vm7, %v907_v18 }
 0x559   :  { %5975 = vmatpush3.bf16.msra.mxu1 %v1022_v45  ;;  %5976 = vmatprep.mubr.msk.bf16.mxu1 %vm6766_vm1, %v6765_v15 }
 0x55a   :  { %5986 = vmatprep.subr.bf16.mxu1 %v6765_v15 }
 0x560   :  { %5977 = vmatmul.mubr.msk.bf16.vlgmr.msra.gmra.mxu1 %vm256_vm7, %v1017_v23 }
 0x561   :  { %5987 = vmatpush3.bf16.msra.mxu1 %v1132_v47  ;;  %5988 = vmatprep.mubr.msk.bf16.mxu1 %vm6766_vm1, %v6765_v15 }
 0x562   :  { %5998 = vmatprep.subr.bf16.mxu1 %v6765_v15 }
 0x568   :  { %5989 = vmatmul.mubr.msk.bf16.vlgmr.msra.gmra.mxu1 %vm256_vm7, %v1125_v48 }
 0x569   :  { %6002 = vmatprep.mubr.msk.bf16.mxu1 %vm6766_vm1, %v6765_v15 }
 0x5ea   :  { %v6999_v51 = vpop.f32.mrf.mxu1 }
 0x5ec   :  { %v5904_v52 = vpop.f32.mrf.mxu1 }
 0x5ee   :  { %v362_v53 = vpop.f32.mrf.mxu1 }
 0x5f0   :  { %v5905_v55 = vpop.f32.mrf.mxu1 }
 0x5f8   :  { %v469_v56 = vpop.f32.mrf.mxu1 }
 0x5fa   :  { %v5916_v57 = vpop.f32.mrf.mxu1 }
 0x5fc   :  { %v472_v58 = vpop.f32.mrf.mxu1 }
 0x5fe   :  { %v5917_v59 = vpop.f32.mrf.mxu1 }
 0x600   :  { %v577_v60 = vpop.f32.mrf.mxu1 }
 0x602   :  { %v5928_v61 = vpop.f32.mrf.mxu1 }
 0x604   :  { %v580_v62 = vpop.f32.mrf.mxu1 }
 0x606   :  { %v5929_v63 = vpop.f32.mrf.mxu1 }
 0x608   :  { %v687_v2 = vpop.f32.mrf.mxu1 }
 0x60a   :  { %v5940_v3 = vpop.f32.mrf.mxu1 }
 0x60c   :  { %v690_v4 = vpop.f32.mrf.mxu1 }
 0x60e   :  { %v5941_v5 = vpop.f32.mrf.mxu1 }
 0x610   :  { %v839_v7 = vpop.f32.mrf.mxu1 }
 0x611   :  { %v840_v8 = vadd.f32 %v839_v7, %v75_v6 }
 0x612   :  { %v5954_v9 = vpop.f32.mrf.mxu1 }
 0x613   :  { %v845_v10 = vsel %vm256_vm7, %v840_v8, -inf }
 0x614   :  { %846 = vmax.xlane.f32.xlu0 %v845_v10  ;;  %v842_v11 = vpop.f32.mrf.mxu1 }
 0x616   :  { %v5955_v12 = vpop.f32.mrf.mxu1 }
 0x618   :  { %v950_v13 = vpop.f32.mrf.mxu1 }
 0x619   :  { %v951_v17 = vadd.f32 %v950_v13, %v75_v6 }
 0x61a   :  { %v5966_v54 = vpop.f32.mrf.mxu1 }
 0x61b   :  { %v956_v18 = vsel %vm256_vm7, %v951_v17, -inf }
 0x61c   :  { %957 = vmax.xlane.f32.xlu0 %v956_v18  ;;  %v953_v19 = vpop.f32.mrf.mxu1 }
 0x61e   :  { %v5967_v20 = vpop.f32.mrf.mxu1 }
 0x620   :  { %v1058_v21 = vpop.f32.mrf.mxu1 }
 0x621   :  { %v1059_v22 = vadd.f32 %v1058_v21, %v75_v6 }
 0x622   :  { %v5978_v23 = vpop.f32.mrf.mxu1 }
 0x623   :  { %v1064_v24 = vsel %vm256_vm7, %v1059_v22, -inf }
 0x624   :  { %1065 = vmax.xlane.f32.xlu1 %v1064_v24  ;;  %v1061_v25 = vpop.f32.mrf.mxu1 }
 0x626   :  { %v5979_v26 = vpop.f32.mrf.mxu1 }
 0x628   :  { %v1168_v27 = vpop.f32.mrf.mxu1 }
 0x629   :  { %v1169_v31 = vadd.f32 %v1168_v27, %v75_v6 }
 0x62a   :  { %v5990_v28 = vpop.f32.mrf.mxu1 }
 0x62b   :  { %v1174_v32 = vsel %vm256_vm7, %v1169_v31, -inf }
 0x62c   :  { %v1171_v29 = vpop.f32.mrf.mxu1 }
 0x62d   :  { %v7055_v29 = vld [vmem:[%s7901_s4 + $0x1c] ss:$12 sps:$4 sm:$0xff]  }
 0x62e   :  { %v5991_v30 = vpop.f32.mrf.mxu1 }
 0x632   :  { %713 = vrot.lane.b32.xlu0 %v6863_v14, %s6775_s16 }
 0x635   :  { %694 = vrot.lane.b32.xlu1 %v469_v56, %s6763_s11 }
 0x639   :  { %698 = vrot.lane.b32.xlu1 %v577_v60, %s6776_s17 }
 0x63d   :  { %711 = vrot.lane.b32.xlu1 %v6872_v16, %s6775_s16 }
 0x651   :  { %1175 = vmax.xlane.f32.xlu0 %v1174_v32 }
 0x667   :  { %702 = vrot.lane.b32.xlu0 %v687_v2, %s6777_s18 }
 0x69d   :  { %v847_v33 = vpop.xlane.xlu0 %846 }
 0x69e   :  { %v848_v34 = vsub.f32 %v840_v8, %v847_v33 }
 0x6a0   :  { %v849_v36 = vmul.f32 1.442695, %v848_v34 }
 0x6a2   :  { %6508 = vpow2.f32 %v849_v36 }
 0x6a5   :  { %v958_v14 = vpop.xlane.xlu0 %957 }
 0x6a6   :  { %v959_v37 = vsub.f32 %v951_v17, %v958_v14 }
 0x6a8   :  { %v960_v39 = vmul.f32 1.442695, %v959_v37 }
 0x6a9   :  { %v714_v40 = vpop.permute.xlu0 %713 }
 0x6aa   :  { %6510 = vpow2.f32 %v960_v39  ;;  %5943 = vmatpush3.bf16.msra.mxu0 %v714_v40  ;;  %5999 = vmatpush3.bf16.msra.mxu1 %v714_v40 }
 0x6ab   :  { %5944 = vmatprep.subr.bf16.mxu0 %v6765_v15  ;;  %6000 = vmatprep.subr.bf16.mxu1 %v6765_v15 }
 0x6ad   :  { %v1066_v16 = vpop.xlane.xlu1 %1065 }
 0x6ae   :  { %v1067_v41 = vsub.f32 %v1059_v22, %v1066_v16 }
 0x6af   :  { %v6509_v43 = vpop.eup %6508 }
 0x6b0   :  { %v1068_v44 = vmul.f32 1.442695, %v1067_v41  ;;  %v851_v45 = vsel %vm256_vm7, %v6509_v43, 0.0 }
 0x6b1   :  { %v695_v46 = vpop.permute.xlu1 %694  ;;  %852 = vadd.xlane.f32.xlu0 %v851_v45 }
 0x6b2   :  { %6512 = vpow2.f32 %v1068_v44  ;;  %v705_v59 = vsel %vm256_vm7, %v6999_v51, %v695_v46 }
 0x6b5   :  { %v699_v47 = vpop.permute.xlu1 %698 }
 0x6b6   :  { %v707_v61 = vsel %vm706_vm8, %v705_v59, %v699_v47 }
 0x6b7   :  { %v6511_v48 = vpop.eup %6510 }
 0x6b8   :  { %v962_v52 = vsel %vm256_vm7, %v6511_v48, 0.0 }
 0x6b9   :  { %963 = vadd.xlane.f32.xlu0 %v962_v52  ;;  %v712_v53 = vpop.permute.xlu1 %711 }
 0x6ba   :  { %5945 = vmatpush3.bf16.msra.mxu0 %v712_v53  ;;  %6001 = vmatpush3.bf16.msra.mxu1 %v712_v53 }
 0x6bb   :  { %5956 = vmatprep.subr.bf16.mxu0 %v6765_v15  ;;  %6014 = vmatprep.subr.bf16.mxu1 %v6765_v15 }
 0x6bf   :  { %v6513_v55 = vpop.eup %6512 }
 0x6c0   :  { %v1070_v56 = vsel %vm256_vm7, %v6513_v55, 0.0 }
 0x6c1   :  { %1071 = vadd.xlane.f32.xlu0 %v1070_v56 }
 0x6d7   :  { %858 = vrot.lane.b32.xlu0 %v6944_v42, %s6771_s12 }
 0x6da   :  { %v1176_v57 = vpop.xlane.xlu0 %1175 }
 0x6db   :  { %v1177_v58 = vsub.f32 %v1169_v31, %v1176_v57  ;;  %968 = vrot.lane.b32.xlu0 %v6944_v42, %s6774_s15 }
 0x6dd   :  { %v1178_v60 = vmul.f32 1.442695, %v1177_v58 }
 0x6de   :  { %v703_v62 = vpop.permute.xlu0 %702 }
 0x6df   :  { %6514 = vpow2.f32 %v1178_v60  ;;  %v709_v63 = vsel %vm708_vm9, %v707_v61, %v703_v62  ;;  %1076 = vrot.lane.b32.xlu0 %v6944_v42, %s6772_s13 }
 0x6e0   :  { %v710_v2 = vpack.c.bf16 %v709_v63, %v709_v63 }
 0x6e2   :  { %5947 = vmatmul.mubr.msk.bf16.vlgmr.msra.gmra.mxu0 %vm100_vm0, %v710_v2 }
 0x6e3   :  { %1186 = vrot.lane.b32.xlu0 %v6944_v42, %s6773_s14  ;;  %5958 = vmatprep.mubr.msk.bf16.mxu0 %vm6766_vm1, %v6765_v15 }
 0x6ec   :  { %v6515_v51 = vpop.eup %6514 }
 0x6ed   :  { %v1180_v3 = vsel %vm256_vm7, %v6515_v51, 0.0 }
 0x6ee   :  { %1181 = vadd.xlane.f32.xlu1 %v1180_v3 }
 0x73a   :  { %v853_v4 = vpop.xlane.xlu0 %852 }
 0x73b   :  { %6516 = vrcp.f32 %v853_v4 }
 0x742   :  { %v964_v5 = vpop.xlane.xlu0 %963 }
 0x743   :  { %6518 = vrcp.f32 %v964_v5 }
 0x748   :  { %v6517_v6 = vpop.eup %6516 }
 0x749   :  { %v855_v8 = vmul.f32 %v6517_v6, %v6509_v43 }
 0x74a   :  { %v1072_v7 = vpop.xlane.xlu0 %1071 }
 0x74b   :  { %6520 = vrcp.f32 %v1072_v7  ;;  %v856_v42 = vpack.c.bf16 %v855_v8, %v855_v8 }
 0x74e   :  { %v859_v9 = vpop.permute.xlu0 %858 }
 0x74f   :  { %v864_v10 = vsel %vm260_vm6, %v859_v9, 0 }
 0x750   :  { %5957 = vmatpush3.bf16.msra.mxu0 %v864_v10  ;;  %v6519_v11 = vpop.eup %6518 }
 0x751   :  { %5968 = vmatprep.subr.bf16.mxu0 %v6765_v15  ;;  %v966_v17 = vmul.f32 %v6519_v11, %v6511_v48 }
 0x752   :  { %v969_v12 = vpop.permute.xlu0 %968 }
 0x753   :  { %v974_v13 = vsel %vm260_vm6, %v969_v12, 0  ;;  %5959 = vmatmul.mubr.msk.bf16.vlgmr.msra.gmra.mxu0 %vm256_vm7, %v856_v42  ;;  %v967_v18 = vpack.c.bf16 %v966_v17, %v966_v17  ;;  %v7088_v12 = vld [vmem:[%s7901_s4 + $0x4] ss:$12 sps:$4 sm:$0xff]  }
 0x754   :  { %5969 = vmatpush3.bf16.msra.mxu0 %v974_v13  ;;  %5970 = vmatprep.mubr.msk.bf16.mxu0 %vm6766_vm1, %v6765_v15 }
 0x755   :  { %5980 = vmatprep.subr.bf16.mxu0 %v6765_v15 }
 0x756   :  { %v1077_v54 = vpop.permute.xlu0 %1076 }
 0x757   :  { %v1082_v20 = vsel %vm260_vm6, %v1077_v54, 0 }
 0x758   :  { %v6521_v19 = vpop.eup %6520 }
 0x759   :  { %v1074_v21 = vmul.f32 %v6521_v19, %v6513_v55 }
 0x75a   :  { %v1187_v22 = vpop.permute.xlu0 %1186 }
 0x75b   :  { %5971 = vmatmul.mubr.msk.bf16.vlgmr.msra.gmra.mxu0 %vm256_vm7, %v967_v18  ;;  %v1075_v23 = vpack.c.bf16 %v1074_v21, %v1074_v21  ;;  %v1192_v24 = vsel %vm260_vm6, %v1187_v22, 0 }
 0x75c   :  { %5981 = vmatpush3.bf16.msra.mxu0 %v1082_v20  ;;  %5982 = vmatprep.mubr.msk.bf16.mxu0 %vm6766_vm1, %v6765_v15 }
 0x75d   :  { %5992 = vmatprep.subr.bf16.mxu0 %v6765_v15 }
 0x763   :  { %5983 = vmatmul.mubr.msk.bf16.vlgmr.msra.gmra.mxu0 %vm256_vm7, %v1075_v23 }
 0x764   :  { %5993 = vmatpush3.bf16.msra.mxu0 %v1192_v24  ;;  %5994 = vmatprep.mubr.msk.bf16.mxu0 %vm6766_vm1, %v6765_v15 }
 0x765   :  { %6006 = vmatprep.subr.bf16.mxu0 %v6765_v15 }
 0x777   :  { %v1182_v25 = vpop.xlane.xlu1 %1181 }
 0x778   :  { %6522 = vrcp.f32 %v1182_v25 }
 0x785   :  { %v6523_v26 = vpop.eup %6522 }
 0x786   :  { %v1184_v27 = vmul.f32 %v6523_v26, %v6515_v51  ;;  %v1411_v26 = vld [vmem:[%s7898_s1] sm:$0xff] }
 0x788   :  { %v1185_v28 = vpack.c.bf16 %v1184_v27, %v1184_v27  ;;  %v1412_v27 = vld [vmem:[%s7898_s1 + $0x8] sm:$0x3] }
 0x78a   :  { %5995 = vmatmul.mubr.msk.bf16.vlgmr.msra.gmra.mxu0 %vm256_vm7, %v1185_v28 }
 0x78b   :  { %6007 = vmatpush3.bf16.msra.mxu0 %v7055_v29  ;;  %6010 = vmatprep.mubr.msk.bf16.mxu0 %vm6766_vm1, %v6765_v15 }
 0x78c   :  { %6008 = vmatprep.subr.bf16.mxu0 %v6765_v15 }
 0x78f   :  { %6009 = vmatpush3.bf16.msra.mxu0 %v7088_v12 }
 0x790   :  { %6022 = vmatprep.subr.bf16.mxu0 %v6765_v15 }
 0x7a2   :  { %v754_v30 = vpop.f32.mrf.mxu0 }
 0x7a3   :  { %v1293_v57 = vadd.f32 %v754_v30, %v6845_v0  ;;  %v7112_v30 = vpack.c.bf16 %v1412_v27, %v1411_v26 }
 0x7a4   :  { %v5948_v31 = vpop.f32.mrf.mxu0 }
 0x7a6   :  { %v757_v32 = vpop.f32.mrf.mxu0 }
 0x7a8   :  { %v5949_v33 = vpop.f32.mrf.mxu0 }
 0x813   :  { %v900_v34 = vpop.f32.mrf.mxu0 }
 0x815   :  { %v5960_v36 = vpop.f32.mrf.mxu0 }
 0x817   :  { %v903_v14 = vpop.f32.mrf.mxu0 }
 0x819   :  { %v5961_v37 = vpop.f32.mrf.mxu0 }
 0x81b   :  { %v1010_v39 = vpop.f32.mrf.mxu0 }
 0x81c   :  { %1235 = vrot.lane.b32.xlu0 %v1010_v39, %s6763_s11 }
 0x81d   :  { %v5972_v40 = vpop.f32.mrf.mxu0 }
 0x81f   :  { %v1013_v16 = vpop.f32.mrf.mxu0 }
 0x821   :  { %v5973_v41 = vpop.f32.mrf.mxu0 }
 0x822   :  { %v77_v41 = vld [vmem:[%s7904_s7 + $0x2] sm:$0x3] }
 0x823   :  { %v1118_v43 = vpop.f32.mrf.mxu0 }
 0x824   :  { %1239 = vrot.lane.b32.xlu0 %v1118_v43, %s6776_s17  ;;  %v1323_v43 = vrot.slane %v77_v41, %v6880_v35 }
 0x825   :  { %v5984_v44 = vpop.f32.mrf.mxu0 }
 0x827   :  { %v1121_v45 = vpop.f32.mrf.mxu0 }
 0x828   :  { %1295 = vrot.lane.b32.xlu0 %v6896_v50, %s6775_s16 }
 0x829   :  { %v5985_v46 = vpop.f32.mrf.mxu0 }
 0x82a   :  { %v1349_v46 = vrot.slane %v77_v41, %v6886_v38 }
 0x84a   :  { %v1228_v47 = vpop.f32.mrf.mxu0 }
 0x84b   :  { %1243 = vrot.lane.b32.xlu1 %v1228_v47, %s6777_s18 }
 0x84c   :  { %v5996_v48 = vpop.f32.mrf.mxu0 }
 0x84e   :  { %v1231_v52 = vpop.f32.mrf.mxu0 }
 0x850   :  { %v5997_v53 = vpop.f32.mrf.mxu0 }
 0x88e   :  { %v1236_v55 = vpop.permute.xlu0 %1235 }
 0x88f   :  { %v1246_v50 = vsel %vm256_vm7, %v900_v34, %v1236_v55 }
 0x896   :  { %v1240_v56 = vpop.permute.xlu0 %1239 }
 0x897   :  { %v1247_v61 = vsel %vm706_vm8, %v1246_v50, %v1240_v56 }
 0x89a   :  { %v1296_v58 = vpop.permute.xlu0 %1295 }
 0x89b   :  { %v7068_v59 = vadd.f32 %v1296_v58, %v1293_v57 }
 0x89d   :  { %v1300_v60 = vsel %vm100_vm0, %v7068_v59, 0.0 }
 0x89e   :  { %1301 = vadd.xlane.f32.xlu0 %v1300_v60 }
 0x8bd   :  { %v1244_v62 = vpop.permute.xlu1 %1243 }
 0x8be   :  { %v1248_v63 = vsel %vm708_vm9, %v1247_v61, %v1244_v62  ;;  %v1353_v62 = vrot.slane %v6892_v49, 1 }
 0x8bf   :  { %v1249_v2 = vpack.c.bf16 %v1248_v63, %v1248_v63 }
 0x8c0   :  { %v1357_v63 = vrot.slane %v1353_v62, %v6880_v35 }
 0x8c1   :  { %6003 = vmatmul.mubr.msk.bf16.vlgmr.msra.gmra.mxu1 %vm100_vm0, %v1249_v2 }
 0x8c2   :  { %6018 = vmatprep.mubr.msk.bf16.mxu1 %vm6766_vm1, %v6765_v15 }
 0x927   :  { %v1302_v0 = vpop.xlane.xlu0 %1301 }
 0x928   :  { %v1306_v51 = vmul.f32 0.03125, %v1302_v0 }
 0x92a   :  { %v1308_v3 = vsub.f32 %v7068_v59, %v1306_v51 }
 0x92c   :  { %v1310_v4 = vmul.f32 %v1308_v3, %v1308_v3  ;;  %v1324_v45 = vmul.f32 %v1323_v43, %v1308_v3 }
 0x92e   :  { %v1312_v5 = vsel %vm100_vm0, %v1310_v4, 0.0 }
 0x92f   :  { %1313 = vadd.xlane.f32.xlu0 %v1312_v5 }
 0x981   :  { %v1287_v6 = vpop.f32.mrf.mxu1 }
 0x982   :  { %v1294_v7 = vadd.f32 %v1287_v6, %v6850_v1 }
 0x983   :  { %v6004_v8 = vpop.f32.mrf.mxu1 }
 0x984   :  { %v7081_v9 = vadd.f32 %v1296_v58, %v1294_v7 }
 0x985   :  { %v1290_v10 = vpop.f32.mrf.mxu1 }
 0x986   :  { %v1303_v42 = vsel %vm100_vm0, %v7081_v9, 0.0 }
 0x987   :  { %1304 = vadd.xlane.f32.xlu1 %v1303_v42  ;;  %v6005_v11 = vpop.f32.mrf.mxu1 }
 0x998   :  { %1422 = vrot.lane.b32.xlu1 %v7088_v12, %s6767_s28 }
 0x9b8   :  { %v1314_v19 = vpop.xlane.xlu0 %1313 }
 0x9b9   :  { %v1318_v20 = vmul.f32 0.032258064, %v1314_v19 }
 0x9bb   :  { %6524 = vrsqrt.f32 %v1318_v20  ;;  %vm1328_vm10 = vcmp.eq.f32.partialorder %v1318_v20, inf  ;;  %v1331_v32 = vand.u32 2147483648, %v1318_v20  ;;  %vm1330_vm11 = vcmp.eq.f32.partialorder %v1318_v20, 0.0 }
 0x9c8   :  { %v6525_v23 = vpop.eup %6524 }
 0x9c9   :  { %v1327_v25 = vmul.f32 %v6525_v23, %v1318_v20 }
 0x9cb   :  { %v1329_v31 = vsel %vm1328_vm10, %v1318_v20, %v1327_v25  ;;  %vm2744_vm10 = vcmask 523264  }
 0x9cc   :  { %v1332_v33 = vsel %vm1330_vm11, %v1331_v32, %v1329_v31  ;;  %v72_v32 = vld [vmem:[#allocation2] sm:$0xff] }
 0x9cd   :  { %v1340_v34 = vadd.f32 1e-06, %v1332_v33 }
 0xa10   :  { %v1305_v1 = vpop.xlane.xlu1 %1304 }
 0xa11   :  { %v1307_v13 = vmul.f32 0.03125, %v1305_v1 }
 0xa13   :  { %v1309_v17 = vsub.f32 %v7081_v9, %v1307_v13 }
 0xa14   :  { %v7110_v28 = vpop.permute.xlu1 %1422 }
 0xa15   :  { %v1311_v54 = vmul.f32 %v1309_v17, %v1309_v17  ;;  %v1325_v47 = vmul.f32 %v1323_v43, %v1309_v17 }
 0xa17   :  { %v1315_v18 = vsel %vm100_vm0, %v1311_v54, 0.0 }
 0xa18   :  { %1316 = vadd.xlane.f32.xlu0 %v1315_v18 }
 0xa2e   :  { %1424 = vrot.lane.b32.xlu0 %v7055_v29, %s6767_s28 }
 0xa32   :  { %1414 = vrot.lane.b32.xlu0 %v6892_v49, %s6767_s28 }
 0xaa1   :  { %v1317_v21 = vpop.xlane.xlu0 %1316 }
 0xaa2   :  { %v1319_v22 = vmul.f32 0.032258064, %v1317_v21 }
 0xaa4   :  { %6526 = vrsqrt.f32 %v1319_v22  ;;  %vm1335_vm12 = vcmp.eq.f32.partialorder %v1319_v22, inf  ;;  %v1338_v37 = vand.u32 2147483648, %v1319_v22  ;;  %vm1337_vm13 = vcmp.eq.f32.partialorder %v1319_v22, 0.0 }
 0xaa5   :  { %v7100_v24 = vpop.permute.xlu0 %1424  ;;  %6528 = vrcp.f32 %v1340_v34 }
 0xaa6   :  { %6015 = vmatpush3.bf16.msra.mxu1 %v7100_v24 }
 0xaa7   :  { %6016 = vmatprep.subr.bf16.mxu1 %v6765_v15 }
 0xaa9   :  { %v1415_v7 = vpop.permute.xlu0 %1414 }
 0xaaa   :  { %6017 = vmatpush3.bf16.msra.mxu1 %v7110_v28  ;;  %v1416_v8 = vrot.slane %v1415_v7, 1 }
 0xaab   :  { %6028 = vmatprep.subr.bf16.mxu1 %v6765_v15 }
 0xaac   :  { %v7136_v49 = vrot.slane %v1416_v8, %v6880_v35 }
 0xaad   :  { %6019 = vmatmul.mubr.msk.bf16.vlgmr.msra.gmra.mxu1 %vm100_vm0, %v7112_v30 }
 0xaae   :  { %6030 = vmatprep.mubr.msk.bf16.mxu1 %vm6766_vm1, %v6765_v15 }
 0xab1   :  { %v6527_v36 = vpop.eup %6526 }
 0xab2   :  { %v1334_v14 = vmul.f32 %v6527_v36, %v1319_v22  ;;  %v6529_v44 = vpop.eup %6528 }
 0xab3   :  { %v1343_v48 = vmul.f32 %v6529_v44, %v1324_v45 }
 0xab4   :  { %v1336_v39 = vsel %vm1335_vm12, %v1319_v22, %v1334_v14 }
 0xab5   :  { %v1339_v40 = vsel %vm1337_vm13, %v1338_v37, %v1336_v39  ;;  %v1350_v55 = vadd.f32 %v1349_v46, %v1343_v48 }
 0xab6   :  { %v1341_v16 = vadd.f32 1e-06, %v1339_v40 }
 0xab8   :  { %6530 = vrcp.f32 %v1341_v16 }
 0xac5   :  { %v6531_v52 = vpop.eup %6530 }
 0xac6   :  { %v1345_v53 = vmul.f32 %v6531_v52, %v1325_v47 }
 0xac8   :  { %v1351_v56 = vadd.f32 %v1349_v46, %v1345_v53 }
 0xaca   :  { %v1352_v57 = vpack.c.bf16 %v1351_v56, %v1350_v55 }
 0xacc   :  { %6011 = vmatmul.mubr.msk.bf16.vlgmr.msra.gmra.mxu0 %vm100_vm0, %v1352_v57 }
 0xacd   :  { %6024 = vmatprep.mubr.msk.bf16.mxu0 %vm6766_vm1, %v6765_v15 }
 0xb6d   :  { %v1465_v58 = vpop.f32.mrf.mxu1 }
 0xb6e   :  { %v7139_v10 = vadd.f32 %v1465_v58, %v7136_v49 }
 0xb6f   :  { %v6020_v60 = vpop.f32.mrf.mxu1 }
 0xb71   :  { %v1468_v50 = vpop.f32.mrf.mxu1 }
 0xb72   :  { %v7143_v42 = vadd.f32 %v1468_v50, %v7136_v49 }
 0xb73   :  { %v6021_v61 = vpop.f32.mrf.mxu1 }
 0xb74   :  { %v1507_v62 = vpack.c.bf16 %v7143_v42, %v7139_v10 }
 0xb8c   :  { %v1404_v2 = vpop.f32.mrf.mxu0 }
 0xb8d   :  { %v1405_v0 = vadd.f32 %v1404_v2, %v1357_v63 }
 0xb8e   :  { %v6012_v51 = vpop.f32.mrf.mxu0 }
 0xb8f   :  { %v1472_v3 = vpack.c.bf16 %v1405_v0, %v1405_v0 }
 0xb90   :  { %v1407_v4 = vpop.f32.mrf.mxu0 }
 0xb91   :  { %v7130_v5 = vadd.f32 %v1407_v4, %v1357_v63  ;;  %1728 = vrot.lane.b32.xlu0 %v1472_v3, %s6770_s9  ;;  %1618 = vrot.lane.b32.xlu1 %v1472_v3, %s6768_s29 }
 0xb92   :  { %v6013_v6 = vpop.f32.mrf.mxu0 }
 0xb95   :  { %1836 = vrot.lane.b32.xlu0 %v1472_v3, %s6769_s30 }
 0xbba   :  { %1473 = vxpose.xlu1.b32.start [1/2] (short) (narrow) %v7139_v10, 32 }
 0xbbe   :  { %1474 = vxpose.xlu1.b32.end [2/2] (short) (narrow) %v7143_v42, 32 }
 0xc03   :  { %v1619_v11 = vpop.permute.xlu1 %1618  ;;  %v1729_v27 = vpop.permute.xlu0 %1728 }
 0xc07   :  { %v1837_v31 = vpop.permute.xlu0 %1836 }
 0xc36   :  { %v1489_v1 = vpop.trf.xlu1 }
 0xc3a   :  { %v1490_v13 = vpop.trf.xlu1 }
 0xc3b   :  { %v1505_v17 = vpack.c.bf16 %v1490_v13, %v1489_v1 }
 0xc3d   :  { %v1621_v54 = vrot.slane %v1505_v17, 4  ;;  %v1512_v18 = vsel %vm260_vm6, %v1505_v17, 0  ;;  %v7182_v17 = vpack.c.bf16 %v7130_v5, %v7130_v5 }
 0xc3e   :  { %6023 = vmatpush3.bf16.msra.mxu0 %v1512_v18  ;;  %v1491_v19 = vpop.trf.xlu1 }
 0xc3f   :  { %6034 = vmatprep.subr.bf16.mxu0 %v6765_v15  ;;  %v1626_v20 = vsel %vm260_vm6, %v1621_v54, 0 }
 0xc41   :  { %6025 = vmatmul.mubr.msk.bf16.vlgmr.msra.gmra.mxu0 %vm256_vm7, %v1472_v3 }
 0xc42   :  { %6035 = vmatpush3.bf16.msra.mxu0 %v1626_v20  ;;  %6036 = vmatprep.mubr.msk.bf16.mxu0 %vm6766_vm1, %v6765_v15  ;;  %v1492_v21 = vpop.trf.xlu1 }
 0xc43   :  { %v1506_v22 = vpack.c.bf16 %v1492_v21, %v1491_v19  ;;  %6046 = vmatprep.subr.bf16.mxu0 %v6765_v15 }
 0xc45   :  { %v1734_v23 = vsel %vm260_vm6, %v1506_v22, 0  ;;  %v1839_v25 = vrot.slane %v1506_v22, 4 }
 0xc47   :  { %v1844_v26 = vsel %vm260_vm6, %v1839_v25, 0 }
 0xc49   :  { %6037 = vmatmul.mubr.msk.bf16.vlgmr.msra.gmra.mxu0 %vm256_vm7, %v1619_v11 }
 0xc4a   :  { %6047 = vmatpush3.bf16.msra.mxu0 %v1734_v23  ;;  %6048 = vmatprep.mubr.msk.bf16.mxu0 %vm6766_vm1, %v6765_v15 }
 0xc4b   :  { %6058 = vmatprep.subr.bf16.mxu0 %v6765_v15 }
 0xc51   :  { %6049 = vmatmul.mubr.msk.bf16.vlgmr.msra.gmra.mxu0 %vm256_vm7, %v1729_v27 }
 0xc52   :  { %6059 = vmatpush3.bf16.msra.mxu0 %v1844_v26  ;;  %6060 = vmatprep.mubr.msk.bf16.mxu0 %vm6766_vm1, %v6765_v15 }
 0xc53   :  { %6070 = vmatprep.subr.bf16.mxu0 %v6765_v15 }
 0xc59   :  { %6061 = vmatmul.mubr.msk.bf16.vlgmr.msra.gmra.mxu0 %vm256_vm7, %v1837_v31 }
 0xc5a   :  { %6074 = vmatprep.mubr.msk.bf16.mxu0 %vm6766_vm1, %v6765_v15 }
 0xd01   :  { %v1548_v33 = vpop.f32.mrf.mxu0 }
 0xd02   :  { %v1549_v34 = vadd.f32 %v1548_v33, %v72_v32 }
 0xd03   :  { %v6026_v36 = vpop.f32.mrf.mxu0 }
 0xd04   :  { %v1555_v14 = vsel %vm1554_vm14, %v1549_v34, -inf }
 0xd05   :  { %1556 = vmax.xlane.f32.xlu0 %v1555_v14  ;;  %v1551_v37 = vpop.f32.mrf.mxu0 }
 0xd07   :  { %v6027_v39 = vpop.f32.mrf.mxu0 }
 0xd09   :  { %v1662_v40 = vpop.f32.mrf.mxu0 }
 0xd0a   :  { %v1663_v16 = vadd.f32 %v1662_v40, %v72_v32 }
 0xd0b   :  { %v6038_v41 = vpop.f32.mrf.mxu0 }
 0xd0c   :  { %v1668_v43 = vsel %vm1554_vm14, %v1663_v16, -inf }
 0xd0d   :  { %1669 = vmax.xlane.f32.xlu0 %v1668_v43  ;;  %v1665_v44 = vpop.f32.mrf.mxu0 }
 0xd0f   :  { %v6039_v45 = vpop.f32.mrf.mxu0 }
 0xd11   :  { %v1770_v46 = vpop.f32.mrf.mxu0 }
 0xd12   :  { %v1771_v47 = vadd.f32 %v1770_v46, %v72_v32 }
 0xd13   :  { %v6050_v48 = vpop.f32.mrf.mxu0 }
 0xd14   :  { %v1776_v52 = vsel %vm1554_vm14, %v1771_v47, -inf }
 0xd15   :  { %1777 = vmax.xlane.f32.xlu0 %v1776_v52  ;;  %v1773_v53 = vpop.f32.mrf.mxu0 }
 0xd17   :  { %v6051_v55 = vpop.f32.mrf.mxu0 }
 0xd18   :  { %v5606_v55 = vld [vmem:[%s7898_s1 + $0x10] sm:$0xff] }
 0xd19   :  { %v1880_v56 = vpop.f32.mrf.mxu0 }
 0xd1a   :  { %v1881_v57 = vadd.f32 %v1880_v56, %v72_v32  ;;  %v5607_v56 = vld [vmem:[%s7898_s1 + $0x18] sm:$0x3] }
 0xd1b   :  { %v6062_v58 = vpop.f32.mrf.mxu0 }
 0xd1c   :  { %v1886_v60 = vsel %vm1554_vm14, %v1881_v57, -inf }
 0xd1d   :  { %1887 = vmax.xlane.f32.xlu0 %v1886_v60  ;;  %v1883_v50 = vpop.f32.mrf.mxu0 }
 0xd1f   :  { %v6063_v61 = vpop.f32.mrf.mxu0 }
 0xd33   :  { %1568 = vrot.lane.b32.xlu0 %v1507_v62, %s6767_s28 }
 0xd37   :  { %1680 = vrot.lane.b32.xlu0 %v1507_v62, %s6778_s25 }
 0xd8e   :  { %v1557_v63 = vpop.xlane.xlu0 %1556 }
 0xd8f   :  { %v1558_v2 = vsub.f32 %v1549_v34, %v1557_v63 }
 0xd91   :  { %v1559_v0 = vmul.f32 1.442695, %v1558_v2 }
 0xd93   :  { %6532 = vpow2.f32 %v1559_v0 }
 0xd96   :  { %v1670_v51 = vpop.xlane.xlu0 %1669 }
 0xd97   :  { %v1671_v3 = vsub.f32 %v1663_v16, %v1670_v51 }
 0xd99   :  { %v1672_v4 = vmul.f32 1.442695, %v1671_v3 }
 0xd9b   :  { %6534 = vpow2.f32 %v1672_v4 }
 0xd9e   :  { %v1778_v8 = vpop.xlane.xlu0 %1777 }
 0xd9f   :  { %v1779_v54 = vsub.f32 %v1771_v47, %v1778_v8 }
 0xda0   :  { %v6533_v6 = vpop.eup %6532 }
 0xda1   :  { %v1561_v7 = vsel %vm1554_vm14, %v6533_v6, 0.0  ;;  %v1780_v18 = vmul.f32 1.442695, %v1779_v54 }
 0xda2   :  { %1562 = vadd.xlane.f32.xlu1 %v1561_v7 }
 0xda3   :  { %6536 = vpow2.f32 %v1780_v18 }
 0xda6   :  { %v1888_v11 = vpop.xlane.xlu0 %1887 }
 0xda7   :  { %v1889_v19 = vsub.f32 %v1881_v57, %v1888_v11  ;;  %v7220_v57 = vpack.c.bf16 %v5607_v56, %v5606_v55 }
 0xda8   :  { %v6535_v10 = vpop.eup %6534 }
 0xda9   :  { %v1674_v42 = vsel %vm1554_vm14, %v6535_v10, 0.0  ;;  %v1890_v20 = vmul.f32 1.442695, %v1889_v19 }
 0xdaa   :  { %1675 = vadd.xlane.f32.xlu0 %v1674_v42  ;;  %v1569_v1 = vpop.permute.xlu0 %1568 }
 0xdab   :  { %v1575_v13 = vsel %vm1573_vm15, %v1569_v1, 0  ;;  %6538 = vpow2.f32 %v1890_v20 }
 0xdac   :  { %6029 = vmatpush3.bf16.msra.mxu1 %v1575_v13 }
 0xdad   :  { %6040 = vmatprep.subr.bf16.mxu1 %v6765_v15 }
 0xdae   :  { %v1681_v25 = vpop.permute.xlu0 %1680 }
 0xdaf   :  { %v1686_v34 = vsel %vm1573_vm15, %v1681_v25, 0 }
 0xdb0   :  { %v6537_v21 = vpop.eup %6536 }
 0xdb1   :  { %v1782_v22 = vsel %vm1554_vm14, %v6537_v21, 0.0 }
 0xdb3   :  { %1964 = vrot.lane.b32.xlu1 %v7055_v29, %s6775_s16 }
 0xdb7   :  { %2203 = vrot.lane.b32.xlu1 %v7182_v17, %s6768_s29 }
 0xdb8   :  { %v6539_v29 = vpop.eup %6538 }
 0xdb9   :  { %v1892_v5 = vsel %vm1554_vm14, %v6539_v29, 0.0 }
 0xdc0   :  { %1788 = vrot.lane.b32.xlu0 %v1507_v62, %s6779_s26 }
 0xddf   :  { %1783 = vadd.xlane.f32.xlu0 %v1782_v22 }
 0xde3   :  { %1893 = vadd.xlane.f32.xlu0 %v1892_v5 }
 0xdf9   :  { %1898 = vrot.lane.b32.xlu0 %v1507_v62, %s6780_s27 }
 0xe2b   :  { %v1563_v23 = vpop.xlane.xlu1 %1562 }
 0xe2c   :  { %6540 = vrcp.f32 %v1563_v23 }
 0xe2f   :  { %v7190_v26 = vpop.permute.xlu1 %1964 }
 0xe30   :  { %6071 = vmatpush3.bf16.msra.mxu0 %v7190_v26 }
 0xe31   :  { %6072 = vmatprep.subr.bf16.mxu0 %v6765_v15 }
 0xe33   :  { %v1676_v27 = vpop.xlane.xlu0 %1675 }
 0xe34   :  { %6542 = vrcp.f32 %v1676_v27 }
 0xe37   :  { %v1789_v37 = vpop.permute.xlu0 %1788 }
 0xe38   :  { %v1794_v40 = vsel %vm1573_vm15, %v1789_v37, 0 }
 0xe39   :  { %v6541_v31 = vpop.eup %6540 }
 0xe3a   :  { %v1565_v32 = vmul.f32 %v6541_v31, %v6533_v6 }
 0xe3c   :  { %v1566_v33 = vpack.c.bf16 %v1565_v32, %v1565_v32 }
 0xe3e   :  { %6031 = vmatmul.mubr.msk.bf16.vlgmr.msra.gmra.mxu1 %vm1554_vm14, %v1566_v33 }
 0xe3f   :  { %6041 = vmatpush3.bf16.msra.mxu1 %v1686_v34  ;;  %6042 = vmatprep.mubr.msk.bf16.mxu1 %vm6766_vm1, %v6765_v15 }
 0xe40   :  { %6052 = vmatprep.subr.bf16.mxu1 %v6765_v15 }
 0xe41   :  { %v6543_v36 = vpop.eup %6542 }
 0xe42   :  { %v1678_v14 = vmul.f32 %v6543_v36, %v6535_v10 }
 0xe44   :  { %v1679_v39 = vpack.c.bf16 %v1678_v14, %v1678_v14 }
 0xe46   :  { %6043 = vmatmul.mubr.msk.bf16.vlgmr.msra.gmra.mxu1 %vm1554_vm14, %v1679_v39 }
 0xe47   :  { %6053 = vmatpush3.bf16.msra.mxu1 %v1794_v40  ;;  %6054 = vmatprep.mubr.msk.bf16.mxu1 %vm6766_vm1, %v6765_v15 }
 0xe48   :  { %6064 = vmatprep.subr.bf16.mxu1 %v6765_v15 }
 0xe68   :  { %v1784_v16 = vpop.xlane.xlu0 %1783 }
 0xe69   :  { %6544 = vrcp.f32 %v1784_v16 }
 0xe6c   :  { %v1894_v41 = vpop.xlane.xlu0 %1893 }
 0xe6d   :  { %6546 = vrcp.f32 %v1894_v41 }
 0xe70   :  { %v1899_v45 = vpop.permute.xlu0 %1898 }
 0xe71   :  { %v1904_v48 = vsel %vm1573_vm15, %v1899_v45, 0 }
 0xe76   :  { %v6545_v43 = vpop.eup %6544 }
 0xe77   :  { %v1786_v44 = vmul.f32 %v6545_v43, %v6537_v21 }
 0xe79   :  { %v1787_v46 = vpack.c.bf16 %v1786_v44, %v1786_v44 }
 0xe7a   :  { %v6547_v47 = vpop.eup %6546 }
 0xe7b   :  { %6055 = vmatmul.mubr.msk.bf16.vlgmr.msra.gmra.mxu1 %vm1554_vm14, %v1787_v46  ;;  %v1896_v52 = vmul.f32 %v6547_v47, %v6539_v29  ;;  %v73_v47 = vld [vmem:[#allocation2 + $0x8] sm:$0xff] }
 0xe7c   :  { %6065 = vmatpush3.bf16.msra.mxu1 %v1904_v48  ;;  %6066 = vmatprep.mubr.msk.bf16.mxu1 %vm6766_vm1, %v6765_v15 }
 0xe7d   :  { %6078 = vmatprep.subr.bf16.mxu1 %v6765_v15  ;;  %v1897_v53 = vpack.c.bf16 %v1896_v52, %v1896_v52 }
 0xe83   :  { %6067 = vmatmul.mubr.msk.bf16.vlgmr.msra.gmra.mxu1 %vm1554_vm14, %v1897_v53 }
 0xe84   :  { %6079 = vmatpush3.bf16.msra.mxu1 %v7100_v24  ;;  %6082 = vmatprep.mubr.msk.bf16.mxu1 %vm6766_vm1, %v6765_v15 }
 0xe85   :  { %6080 = vmatprep.subr.bf16.mxu1 %v6765_v15 }
 0xe88   :  { %6081 = vmatpush3.bf16.msra.mxu1 %v7110_v28 }
 0xe89   :  { %6092 = vmatprep.subr.bf16.mxu1 %v6765_v15 }
 0xe8b   :  { %6083 = vmatmul.mubr.msk.bf16.vlgmr.msra.gmra.mxu1 %vm100_vm0, %v7220_v57 }
 0xe8c   :  { %6094 = vmatprep.mubr.msk.bf16.mxu1 %vm6766_vm1, %v6765_v15 }
 0xefe   :  { %v1611_v24 = vpop.f32.mrf.mxu1 }
 0xf00   :  { %v6032_v58 = vpop.f32.mrf.mxu1 }
 0xf02   :  { %v1614_v60 = vpop.f32.mrf.mxu1 }
 0xf04   :  { %v6033_v50 = vpop.f32.mrf.mxu1 }
 0xf06   :  { %v1722_v61 = vpop.f32.mrf.mxu1 }
 0xf07   :  { %1947 = vrot.lane.b32.xlu0 %v1722_v61, %s6763_s11 }
 0xf08   :  { %v6044_v62 = vpop.f32.mrf.mxu1 }
 0xf0a   :  { %v1725_v63 = vpop.f32.mrf.mxu1 }
 0xf0c   :  { %v6045_v2 = vpop.f32.mrf.mxu1 }
 0xf3b   :  { %v1830_v0 = vpop.f32.mrf.mxu1 }
 0xf3c   :  { %1951 = vrot.lane.b32.xlu0 %v1830_v0, %s6776_s17 }
 0xf3d   :  { %v6056_v28 = vpop.f32.mrf.mxu1 }
 0xf3f   :  { %v1833_v51 = vpop.f32.mrf.mxu1 }
 0xf41   :  { %v6057_v3 = vpop.f32.mrf.mxu1 }
 0xf43   :  { %v1940_v4 = vpop.f32.mrf.mxu1 }
 0xf44   :  { %1955 = vrot.lane.b32.xlu0 %v1940_v4, %s6777_s18 }
 0xf45   :  { %v6068_v6 = vpop.f32.mrf.mxu1 }
 0xf47   :  { %v1943_v7 = vpop.f32.mrf.mxu1 }
 0xf48   :  { %1962 = vrot.lane.b32.xlu0 %v7088_v12, %s6775_s16 }
 0xf49   :  { %v6069_v8 = vpop.f32.mrf.mxu1 }
 0xf4b   :  { %v2052_v11 = vpop.f32.mrf.mxu1 }
 0xf4c   :  { %v2053_v10 = vadd.f32 %v2052_v11, %v7136_v49  ;;  %2313 = vrot.lane.b32.xlu0 %v7182_v17, %s6770_s9 }
 0xf4d   :  { %v6084_v42 = vpop.f32.mrf.mxu1 }
 0xf4e   :  { %2060 = vxpose.xlu1.b32.start [1/2] (short) (narrow) %v2053_v10, 32 }
 0xf4f   :  { %v2055_v1 = vpop.f32.mrf.mxu1 }
 0xf50   :  { %v2056_v13 = vadd.f32 %v2055_v1, %v7136_v49  ;;  %2421 = vrot.lane.b32.xlu0 %v7182_v17, %s6769_s30  ;;  %v2204_v49 = vpop.permute.xlu1 %2203 }
 0xf51   :  { %v6085_v54 = vpop.f32.mrf.mxu1 }
 0xf52   :  { %v7239_v18 = vpack.c.bf16 %v2056_v13, %v2053_v10  ;;  %2061 = vxpose.xlu1.b32.end [2/2] (short) (narrow) %v2056_v13, 32 }
 0xf79   :  { %v1948_v12 = vpop.permute.xlu0 %1947 }
 0xf7a   :  { %v1958_v21 = vsel %vm256_vm7, %v1611_v24, %v1948_v12 }
 0xfae   :  { %v1952_v19 = vpop.permute.xlu0 %1951 }
 0xfaf   :  { %v1959_v22 = vsel %vm706_vm8, %v1958_v21, %v1952_v19 }
 0xfb6   :  { %v1956_v20 = vpop.permute.xlu0 %1955 }
 0xfb7   :  { %v1960_v29 = vsel %vm708_vm9, %v1959_v22, %v1956_v20 }
 0xfb8   :  { %v1961_v23 = vpack.c.bf16 %v1960_v29, %v1960_v29 }
 0xfba   :  { %v1963_v5 = vpop.permute.xlu0 %1962 }
 0xfbb   :  { %6073 = vmatpush3.bf16.msra.mxu0 %v1963_v5 }
 0xfbc   :  { %6086 = vmatprep.subr.bf16.mxu0 %v6765_v15 }
 0xfbe   :  { %6075 = vmatmul.mubr.msk.bf16.vlgmr.msra.gmra.mxu0 %vm100_vm0, %v1961_v23  ;;  %v2314_v16 = vpop.permute.xlu0 %2313 }
 0xfbf   :  { %6088 = vmatprep.mubr.msk.bf16.mxu0 %vm6766_vm1, %v6765_v15 }
 0xfc2   :  { %v2422_v41 = vpop.permute.xlu0 %2421 }
 0xfca   :  { %v2076_v25 = vpop.trf.xlu1 }
 0xfce   :  { %v2077_v27 = vpop.trf.xlu1 }
 0xfcf   :  { %v2092_v31 = vpack.c.bf16 %v2077_v27, %v2076_v25 }
 0xfd1   :  { %v2206_v32 = vrot.slane %v2092_v31, 4  ;;  %v2099_v33 = vsel %vm260_vm6, %v2092_v31, 0 }
 0xfd2   :  { %6087 = vmatpush3.bf16.msra.mxu0 %v2099_v33  ;;  %v2078_v34 = vpop.trf.xlu1 }
 0xfd3   :  { %6098 = vmatprep.subr.bf16.mxu0 %v6765_v15  ;;  %v2211_v36 = vsel %vm260_vm6, %v2206_v32, 0 }
 0xfd5   :  { %6089 = vmatmul.mubr.msk.bf16.vlgmr.msra.gmra.mxu0 %vm256_vm7, %v7182_v17 }
 0xfd6   :  { %6099 = vmatpush3.bf16.msra.mxu0 %v2211_v36  ;;  %6100 = vmatprep.mubr.msk.bf16.mxu0 %vm6766_vm1, %v6765_v15  ;;  %v2079_v14 = vpop.trf.xlu1 }
 0xfd7   :  { %v2093_v37 = vpack.c.bf16 %v2079_v14, %v2078_v34  ;;  %6110 = vmatprep.subr.bf16.mxu0 %v6765_v15 }
 0xfd9   :  { %v2319_v39 = vsel %vm260_vm6, %v2093_v37, 0  ;;  %v2424_v40 = vrot.slane %v2093_v37, 4 }
 0xfdb   :  { %v2429_v17 = vsel %vm260_vm6, %v2424_v40, 0 }
 0xfdd   :  { %6101 = vmatmul.mubr.msk.bf16.vlgmr.msra.gmra.mxu0 %vm256_vm7, %v2204_v49 }
 0xfde   :  { %6111 = vmatpush3.bf16.msra.mxu0 %v2319_v39  ;;  %6112 = vmatprep.mubr.msk.bf16.mxu0 %vm6766_vm1, %v6765_v15 }
 0xfdf   :  { %6122 = vmatprep.subr.bf16.mxu0 %v6765_v15 }
 0xfe5   :  { %6113 = vmatmul.mubr.msk.bf16.vlgmr.msra.gmra.mxu0 %vm256_vm7, %v2314_v16 }
 0xfe6   :  { %6123 = vmatpush3.bf16.msra.mxu0 %v2429_v17  ;;  %6124 = vmatprep.mubr.msk.bf16.mxu0 %vm6766_vm1, %v6765_v15 }
 0xfe7   :  { %6134 = vmatprep.subr.bf16.mxu0 %v6765_v15 }
 0xfed   :  { %6125 = vmatmul.mubr.msk.bf16.vlgmr.msra.gmra.mxu0 %vm256_vm7, %v2422_v41 }
 0xfee   :  { %6135 = vmatpush3.bf16.msra.mxu0 %v7190_v26  ;;  %6138 = vmatprep.mubr.msk.bf16.mxu0 %vm6766_vm1, %v6765_v15 }
 0xfef   :  { %6136 = vmatprep.subr.bf16.mxu0 %v6765_v15 }
 0xff2   :  { %6137 = vmatpush3.bf16.msra.mxu0 %v1963_v5 }
 0xff3   :  { %6150 = vmatprep.subr.bf16.mxu0 %v6765_v15 }
0x107e   :  { %v7272_v43 = vpop.f32.mrf.mxu0 }
0x1080   :  { %v6076_v44 = vpop.f32.mrf.mxu0 }
0x1082   :  { %v2008_v45 = vpop.f32.mrf.mxu0 }
0x1084   :  { %v6077_v46 = vpop.f32.mrf.mxu0 }
0x1095   :  { %v2135_v48 = vpop.f32.mrf.mxu0 }
0x1096   :  { %v2136_v52 = vadd.f32 %v2135_v48, %v73_v47 }
0x1097   :  { %v6090_v53 = vpop.f32.mrf.mxu0 }
0x1098   :  { %v2141_v55 = vsel %vm1554_vm14, %v2136_v52, -inf }
0x1099   :  { %2142 = vmax.xlane.f32.xlu0 %v2141_v55  ;;  %v2138_v26 = vpop.f32.mrf.mxu0 }
0x109b   :  { %v6091_v56 = vpop.f32.mrf.mxu0 }
0x109d   :  { %v2247_v24 = vpop.f32.mrf.mxu0 }
0x109e   :  { %v2248_v58 = vadd.f32 %v2247_v24, %v73_v47 }
0x109f   :  { %v6102_v60 = vpop.f32.mrf.mxu0 }
0x10a0   :  { %v2253_v50 = vsel %vm1554_vm14, %v2248_v58, -inf }
0x10a1   :  { %2254 = vmax.xlane.f32.xlu0 %v2253_v50  ;;  %v2250_v61 = vpop.f32.mrf.mxu0 }
0x10a3   :  { %v6103_v62 = vpop.f32.mrf.mxu0 }
0x10a5   :  { %v2355_v63 = vpop.f32.mrf.mxu0 }
0x10a6   :  { %v2356_v2 = vadd.f32 %v2355_v63, %v73_v47 }
0x10a7   :  { %v6114_v0 = vpop.f32.mrf.mxu0 }
0x10a8   :  { %v2361_v28 = vsel %vm1554_vm14, %v2356_v2, -inf }
0x10a9   :  { %2362 = vmax.xlane.f32.xlu0 %v2361_v28  ;;  %v2358_v51 = vpop.f32.mrf.mxu0 }
0x10ab   :  { %v6115_v3 = vpop.f32.mrf.mxu0 }
0x10ad   :  { %v2465_v4 = vpop.f32.mrf.mxu0 }
0x10ae   :  { %v2466_v6 = vadd.f32 %v2465_v4, %v73_v47 }
0x10af   :  { %v6126_v7 = vpop.f32.mrf.mxu0 }
0x10b0   :  { %v2471_v8 = vsel %vm1554_vm14, %v2466_v6, -inf }
0x10b1   :  { %2472 = vmax.xlane.f32.xlu0 %v2471_v8  ;;  %v2468_v11 = vpop.f32.mrf.mxu0 }
0x10b3   :  { %v6127_v10 = vpop.f32.mrf.mxu0 }
0x10c7   :  { %2154 = vrot.lane.b32.xlu0 %v7239_v18, %s6767_s28 }
0x10cb   :  { %2265 = vrot.lane.b32.xlu0 %v7239_v18, %s6778_s25 }
0x1122   :  { %v2143_v42 = vpop.xlane.xlu0 %2142 }
0x1123   :  { %v2144_v1 = vsub.f32 %v2136_v52, %v2143_v42 }
0x1125   :  { %v2145_v13 = vmul.f32 1.442695, %v2144_v1 }
0x1127   :  { %6548 = vpow2.f32 %v2145_v13 }
0x112a   :  { %v2255_v54 = vpop.xlane.xlu0 %2254 }
0x112b   :  { %v2256_v12 = vsub.f32 %v2248_v58, %v2255_v54  ;;  %v7313_v54 = vld [vmem:[#allocation7] ss:$2 sm:$0x7] }
0x112d   :  { %v2257_v19 = vmul.f32 1.442695, %v2256_v12 }
0x112f   :  { %6550 = vpow2.f32 %v2257_v19 }
0x1132   :  { %v2363_v22 = vpop.xlane.xlu0 %2362 }
0x1133   :  { %v2364_v27 = vsub.f32 %v2356_v2, %v2363_v22 }
0x1134   :  { %v6549_v20 = vpop.eup %6548 }
0x1135   :  { %v2147_v21 = vsel %vm1554_vm14, %v6549_v20, 0.0  ;;  %v2365_v31 = vmul.f32 1.442695, %v2364_v27  ;;  %v2590_v27 = vadd.f32 %v7272_v43, %v7068_v59 }
0x1136   :  { %2148 = vadd.xlane.f32.xlu1 %v2147_v21 }
0x1137   :  { %6552 = vpow2.f32 %v2365_v31 }
0x113a   :  { %v2473_v29 = vpop.xlane.xlu0 %2472 }
0x113b   :  { %v2474_v32 = vsub.f32 %v2466_v6, %v2473_v29 }
0x113c   :  { %v6551_v5 = vpop.eup %6550 }
0x113d   :  { %v2259_v23 = vsel %vm1554_vm14, %v6551_v5, 0.0  ;;  %v2475_v33 = vmul.f32 1.442695, %v2474_v32 }
0x113e   :  { %2260 = vadd.xlane.f32.xlu0 %v2259_v23  ;;  %v2155_v49 = vpop.permute.xlu0 %2154 }
0x113f   :  { %v2160_v25 = vsel %vm1573_vm15, %v2155_v49, 0  ;;  %6554 = vpow2.f32 %v2475_v33 }
0x1140   :  { %6093 = vmatpush3.bf16.msra.mxu1 %v2160_v25 }
0x1141   :  { %6104 = vmatprep.subr.bf16.mxu1 %v6765_v15 }
0x1142   :  { %v2266_v40 = vpop.permute.xlu0 %2265 }
0x1143   :  { %v2271_v45 = vsel %vm1573_vm15, %v2266_v40, 0 }
0x1144   :  { %v6553_v34 = vpop.eup %6552 }
0x1145   :  { %v2367_v36 = vsel %vm1554_vm14, %v6553_v34, 0.0 }
0x114c   :  { %v6555_v14 = vpop.eup %6554 }
0x114d   :  { %v2477_v37 = vsel %vm1554_vm14, %v6555_v14, 0.0 }
0x1154   :  { %2373 = vrot.lane.b32.xlu0 %v7239_v18, %s6779_s26 }
0x1173   :  { %2368 = vadd.xlane.f32.xlu0 %v2367_v36 }
0x1177   :  { %2478 = vadd.xlane.f32.xlu0 %v2477_v37 }
0x118d   :  { %2483 = vrot.lane.b32.xlu0 %v7239_v18, %s6780_s27 }
0x11bf   :  { %v2149_v39 = vpop.xlane.xlu1 %2148 }
0x11c0   :  { %6556 = vrcp.f32 %v2149_v39 }
0x11c7   :  { %v2261_v17 = vpop.xlane.xlu0 %2260 }
0x11c8   :  { %6558 = vrcp.f32 %v2261_v17 }
0x11cb   :  { %v2374_v47 = vpop.permute.xlu0 %2373 }
0x11cc   :  { %v2379_v52 = vsel %vm1573_vm15, %v2374_v47, 0 }
0x11cd   :  { %v6557_v16 = vpop.eup %6556 }
0x11ce   :  { %v2151_v41 = vmul.f32 %v6557_v16, %v6549_v20 }
0x11d0   :  { %v2152_v44 = vpack.c.bf16 %v2151_v41, %v2151_v41 }
0x11d2   :  { %6095 = vmatmul.mubr.msk.bf16.vlgmr.msra.gmra.mxu1 %vm1554_vm14, %v2152_v44 }
0x11d3   :  { %6105 = vmatpush3.bf16.msra.mxu1 %v2271_v45  ;;  %6106 = vmatprep.mubr.msk.bf16.mxu1 %vm6766_vm1, %v6765_v15 }
0x11d4   :  { %6116 = vmatprep.subr.bf16.mxu1 %v6765_v15 }
0x11d5   :  { %v6559_v46 = vpop.eup %6558 }
0x11d6   :  { %v2263_v18 = vmul.f32 %v6559_v46, %v6551_v5 }
0x11d8   :  { %v2264_v48 = vpack.c.bf16 %v2263_v18, %v2263_v18 }
0x11da   :  { %6107 = vmatmul.mubr.msk.bf16.vlgmr.msra.gmra.mxu1 %vm1554_vm14, %v2264_v48 }
0x11db   :  { %6117 = vmatpush3.bf16.msra.mxu1 %v2379_v52  ;;  %6118 = vmatprep.mubr.msk.bf16.mxu1 %vm6766_vm1, %v6765_v15  ;;  %v6467_v52 = vld [vmem:[%s7901_s4 + $0x8] ss:$12 sps:$4 sm:$0xff]  }
0x11dc   :  { %6128 = vmatprep.subr.bf16.mxu1 %v6765_v15 }
0x11fc   :  { %v2369_v53 = vpop.xlane.xlu0 %2368 }
0x11fd   :  { %6560 = vrcp.f32 %v2369_v53  ;;  %v6468_v53 = vld [vmem:[%s7902_s5 + $0x18] sm:$0xff]  }
0x1200   :  { %v2479_v55 = vpop.xlane.xlu0 %2478 }
0x1201   :  { %6562 = vrcp.f32 %v2479_v55 }
0x1204   :  { %v2484_v24 = vpop.permute.xlu0 %2483 }
0x1205   :  { %v2489_v50 = vsel %vm1573_vm15, %v2484_v24, 0 }
0x120a   :  { %v6561_v26 = vpop.eup %6560 }
0x120b   :  { %v2371_v56 = vmul.f32 %v6561_v26, %v6553_v34 }
0x120d   :  { %v2372_v58 = vpack.c.bf16 %v2371_v56, %v2371_v56 }
0x120e   :  { %v6563_v60 = vpop.eup %6562 }
0x120f   :  { %6119 = vmatmul.mubr.msk.bf16.vlgmr.msra.gmra.mxu1 %vm1554_vm14, %v2372_v58  ;;  %v2481_v61 = vmul.f32 %v6563_v60, %v6555_v14 }
0x1210   :  { %6129 = vmatpush3.bf16.msra.mxu1 %v2489_v50  ;;  %6130 = vmatprep.mubr.msk.bf16.mxu1 %vm6766_vm1, %v6765_v15 }
0x1211   :  { %6142 = vmatprep.subr.bf16.mxu1 %v6765_v15  ;;  %v2482_v62 = vpack.c.bf16 %v2481_v61, %v2481_v61 }
0x1217   :  { %6131 = vmatmul.mubr.msk.bf16.vlgmr.msra.gmra.mxu1 %vm1554_vm14, %v2482_v62 }
0x1218   :  { %6146 = vmatprep.mubr.msk.bf16.mxu1 %vm6766_vm1, %v6765_v15 }
0x1292   :  { %v2196_v63 = vpop.f32.mrf.mxu1 }
0x1294   :  { %v6096_v2 = vpop.f32.mrf.mxu1 }
0x1296   :  { %v2199_v0 = vpop.f32.mrf.mxu1 }
0x1298   :  { %v6097_v28 = vpop.f32.mrf.mxu1 }
0x129a   :  { %v2307_v51 = vpop.f32.mrf.mxu1 }
0x129b   :  { %2532 = vrot.lane.b32.xlu1 %v2307_v51, %s6763_s11 }
0x129c   :  { %v6108_v3 = vpop.f32.mrf.mxu1 }
0x129e   :  { %v2310_v4 = vpop.f32.mrf.mxu1 }
0x12a0   :  { %v6109_v6 = vpop.f32.mrf.mxu1 }
0x12a1   :  { %v78_v6 = vld [vmem:[%s7904_s7 + $0x4] sm:$0x3] }
0x12cf   :  { %v2415_v7 = vpop.f32.mrf.mxu1 }
0x12d0   :  { %2536 = vrot.lane.b32.xlu0 %v2415_v7, %s6776_s17  ;;  %v2625_v7 = vrot.slane %v78_v6, %v6880_v35 }
0x12d1   :  { %v6120_v8 = vpop.f32.mrf.mxu1 }
0x12d3   :  { %v2418_v11 = vpop.f32.mrf.mxu1 }
0x12d5   :  { %v6121_v10 = vpop.f32.mrf.mxu1 }
0x12d6   :  { %v2651_v10 = vrot.slane %v78_v6, %v6886_v38 }
0x12d7   :  { %v2525_v42 = vpop.f32.mrf.mxu1 }
0x12d8   :  { %2540 = vrot.lane.b32.xlu0 %v2525_v42, %s6777_s18 }
0x12d9   :  { %v6132_v1 = vpop.f32.mrf.mxu1 }
0x12db   :  { %v2528_v13 = vpop.f32.mrf.mxu1 }
0x12dc   :  { %2592 = vrot.lane.b32.xlu0 %v7313_v54, %s6775_s16 }
0x12dd   :  { %v6133_v12 = vpop.f32.mrf.mxu1 }
0x130d   :  { %v2533_v19 = vpop.permute.xlu1 %2532 }
0x130e   :  { %v2543_v21 = vsel %vm256_vm7, %v2196_v63, %v2533_v19 }
0x1342   :  { %v2537_v20 = vpop.permute.xlu0 %2536 }
0x1343   :  { %v2544_v22 = vsel %vm706_vm8, %v2543_v21, %v2537_v20 }
0x134a   :  { %v2541_v29 = vpop.permute.xlu0 %2540 }
0x134b   :  { %v2545_v5 = vsel %vm708_vm9, %v2544_v22, %v2541_v29  ;;  %v6469_v22 = vld [vmem:[%s7902_s5 + $0x10] sm:$0xff]   ;;  %v6470_v29 = vld [vmem:[%s7902_s5 + $0x8] sm:$0xff]  }
0x134c   :  { %v2546_v23 = vpack.c.bf16 %v2545_v5, %v2545_v5  ;;  %v6471_v5 = vld [vmem:[%s7902_s5] sm:$0xff]  }
0x134e   :  { %6139 = vmatmul.mubr.msk.bf16.vlgmr.msra.gmra.mxu0 %vm100_vm0, %v2546_v23  ;;  %v2593_v49 = vpop.permute.xlu0 %2592  ;;  %v2655_v23 = vrot.slane %v7313_v54, 2 }
0x134f   :  { %v2594_v25 = vrot.slane %v2593_v49, 1  ;;  %6158 = vmatprep.mubr.msk.bf16.mxu0 %vm6766_vm1, %v6765_v15  ;;  %6151 = vmatpush3.bf16.msra.mxu0 %v6468_v53 }
0x1350   :  { %6152 = vmatprep.subr.bf16.mxu0 %v6765_v15  ;;  %v2659_v49 = vrot.slane %v2655_v23, %v6880_v35 }
0x1351   :  { %v2598_v31 = vrot.slane %v2594_v25, %v6880_v35 }
0x1353   :  { %v7326_v32 = vadd.f32 %v2598_v31, %v2590_v27  ;;  %6153 = vmatpush3.bf16.msra.mxu0 %v6469_v22 }
0x1354   :  { %6154 = vmatprep.subr.bf16.mxu0 %v6765_v15 }
0x1355   :  { %v2602_v33 = vsel %vm100_vm0, %v7326_v32, 0.0 }
0x1356   :  { %2603 = vadd.xlane.f32.xlu0 %v2602_v33 }
0x1357   :  { %6155 = vmatpush3.bf16.msra.mxu0 %v6470_v29 }
0x1358   :  { %6156 = vmatprep.subr.bf16.mxu0 %v6765_v15 }
0x135b   :  { %6157 = vmatpush3.bf16.msra.mxu0 %v6471_v5 }
0x135c   :  { %6176 = vmatprep.subr.bf16.mxu0 %v6765_v15 }
0x13df   :  { %v2604_v34 = vpop.xlane.xlu0 %2603 }
0x13e0   :  { %v2608_v36 = vmul.f32 0.03125, %v2604_v34 }
0x13e2   :  { %v2610_v14 = vsub.f32 %v7326_v32, %v2608_v36 }
0x13e4   :  { %v2612_v37 = vmul.f32 %v2610_v14, %v2610_v14  ;;  %v2626_v11 = vmul.f32 %v2625_v7, %v2610_v14 }
0x13e6   :  { %v2614_v39 = vsel %vm100_vm0, %v2612_v37, 0.0 }
0x13e7   :  { %2615 = vadd.xlane.f32.xlu0 %v2614_v39 }
0x140e   :  { %v2584_v40 = vpop.f32.mrf.mxu0 }
0x140f   :  { %v2591_v17 = vadd.f32 %v2584_v40, %v7081_v9  ;;  %v6466_v9 = vld [vmem:[%s7901_s4 + $0x20] ss:$12 sps:$4 sm:$0xff]  }
0x1410   :  { %v6140_v59 = vpop.f32.mrf.mxu0  ;;  %6143 = vmatpush3.bf16.msra.mxu1 %v6466_v9 }
0x1411   :  { %v7333_v43 = vadd.f32 %v2598_v31, %v2591_v17  ;;  %6144 = vmatprep.subr.bf16.mxu1 %v6765_v15 }
0x1412   :  { %v2587_v16 = vpop.f32.mrf.mxu0 }
0x1413   :  { %v2605_v41 = vsel %vm100_vm0, %v7333_v43, 0.0 }
0x1414   :  { %2606 = vadd.xlane.f32.xlu1 %v2605_v41  ;;  %v6141_v44 = vpop.f32.mrf.mxu0  ;;  %6145 = vmatpush3.bf16.msra.mxu1 %v6467_v52 }
0x1415   :  { %6162 = vmatprep.subr.bf16.mxu1 %v6765_v15 }
0x1425   :  { %2791 = vrot.lane.b32.xlu1 %v7313_v54, %s6771_s12 }
0x1470   :  { %v2616_v55 = vpop.xlane.xlu0 %2615 }
0x1471   :  { %v2620_v26 = vmul.f32 0.032258064, %v2616_v55 }
0x1473   :  { %6564 = vrsqrt.f32 %v2620_v26  ;;  %vm2630_vm2 = vcmp.eq.f32.partialorder %v2620_v26, inf  ;;  %v2633_v61 = vand.u32 2147483648, %v2620_v26  ;;  %vm2632_vm3 = vcmp.eq.f32.partialorder %v2620_v26, 0.0 }
0x1480   :  { %v6565_v58 = vpop.eup %6564 }
0x1481   :  { %v2629_v60 = vmul.f32 %v6565_v58, %v2620_v26 }
0x1483   :  { %v2631_v50 = vsel %vm2630_vm2, %v2620_v26, %v2629_v60 }
0x1484   :  { %v2634_v62 = vsel %vm2632_vm3, %v2633_v61, %v2631_v50  ;;  %v7396_v50 = vld [vmem:[%s7901_s4 + $0x48] ss:$12 sps:$4 sm:$0xff]   ;;  %v7402_v61 = vld [vmem:[%s7901_s4 + $0x30] ss:$12 sps:$4 sm:$0xff]  }
0x1485   :  { %v2642_v63 = vadd.f32 1e-06, %v2634_v62 }
0x149d   :  { %v2607_v45 = vpop.xlane.xlu1 %2606 }
0x149e   :  { %v2609_v46 = vmul.f32 0.03125, %v2607_v45 }
0x14a0   :  { %v2611_v18 = vsub.f32 %v7333_v43, %v2609_v46 }
0x14a1   :  { %v2792_v40 = vpop.permute.xlu1 %2791 }
0x14a2   :  { %v2613_v47 = vmul.f32 %v2611_v18, %v2611_v18  ;;  %v2627_v42 = vmul.f32 %v2625_v7, %v2611_v18  ;;  %v2793_v17 = vrot.slane %v2792_v40, 2 }
0x14a4   :  { %v2617_v48 = vsel %vm100_vm0, %v2613_v47, 0.0  ;;  %v2797_v54 = vrot.slane %v2793_v17, %v6880_v35 }
0x14a5   :  { %2618 = vadd.xlane.f32.xlu0 %v2617_v48 }
0x152e   :  { %v2619_v56 = vpop.xlane.xlu0 %2618 }
0x152f   :  { %v2621_v24 = vmul.f32 0.032258064, %v2619_v56 }
0x1531   :  { %6566 = vrsqrt.f32 %v2621_v24  ;;  %vm2637_vm4 = vcmp.eq.f32.partialorder %v2621_v24, inf  ;;  %v2640_v28 = vand.u32 2147483648, %v2621_v24  ;;  %vm2639_vm5 = vcmp.eq.f32.partialorder %v2621_v24, 0.0 }
0x1532   :  { %6568 = vrcp.f32 %v2642_v63 }
0x153e   :  { %v6567_v2 = vpop.eup %6566 }
0x153f   :  { %v2636_v0 = vmul.f32 %v6567_v2, %v2621_v24  ;;  %v6569_v8 = vpop.eup %6568 }
0x1540   :  { %v2645_v1 = vmul.f32 %v6569_v8, %v2626_v11 }
0x1541   :  { %v2638_v51 = vsel %vm2637_vm4, %v2621_v24, %v2636_v0 }
0x1542   :  { %v2641_v3 = vsel %vm2639_vm5, %v2640_v28, %v2638_v51  ;;  %v2652_v19 = vadd.f32 %v2651_v10, %v2645_v1 }
0x1543   :  { %v2643_v4 = vadd.f32 1e-06, %v2641_v3 }
0x1545   :  { %6570 = vrcp.f32 %v2643_v4 }
0x1552   :  { %v6571_v13 = vpop.eup %6570 }
0x1553   :  { %v2647_v12 = vmul.f32 %v6571_v13, %v2627_v42 }
0x1555   :  { %v2653_v20 = vadd.f32 %v2651_v10, %v2647_v12  ;;  %v79_v12 = vld [vmem:[%s7904_s7 + $0x6] sm:$0x3] }
0x1556   :  { %v2870_v22 = vrot.slane %v79_v12, %v6886_v38 }
0x1557   :  { %v2654_v21 = vpack.c.bf16 %v2653_v20, %v2652_v19  ;;  %v2844_v19 = vrot.slane %v79_v12, %v6880_v35 }
0x1559   :  { %6147 = vmatmul.mubr.msk.bf16.vlgmr.msra.gmra.mxu1 %vm100_vm0, %v2654_v21 }
0x155a   :  { %6166 = vmatprep.mubr.msk.bf16.mxu1 %vm6766_vm1, %v6765_v15  ;;  %6163 = vmatpush3.bf16.msra.mxu1 %v7396_v50 }
0x155b   :  { %6164 = vmatprep.subr.bf16.mxu1 %v6765_v15 }
0x155e   :  { %6165 = vmatpush3.bf16.msra.mxu1 %v7402_v61 }
0x155f   :  { %6170 = vmatprep.subr.bf16.mxu1 %v6765_v15 }
0x1619   :  { %v2710_v25 = vpop.f32.mrf.mxu1 }
0x161a   :  { %v2711_v31 = vadd.f32 %v2710_v25, %v2659_v49 }
0x161b   :  { %v6148_v27 = vpop.f32.mrf.mxu1 }
0x161c   :  { %v2717_v14 = vmax.f32 %v2711_v31, 0.0 }
0x161d   :  { %v2713_v33 = vpop.f32.mrf.mxu1 }
0x161e   :  { %v2714_v34 = vadd.f32 %v2713_v33, %v2659_v49  ;;  %v7415_v33 = vld [vmem:[#allocation7 + $0x1] ss:$2 sm:$0x7] }
0x161f   :  { %v6149_v36 = vpop.f32.mrf.mxu1 }
0x1620   :  { %v2718_v37 = vmax.f32 %v2714_v34, 0.0  ;;  %v7419_v34 = vrot.slane %v7415_v33, %v6880_v35 }
0x1622   :  { %v2719_v39 = vpack.c.bf16 %v2718_v37, %v2717_v14 }
0x1624   :  { %6159 = vmatmul.mubr.msk.bf16.vlgmr.msra.gmra.mxu0 %vm2744_vm10, %v2719_v39 }
0x1625   :  { %6178 = vmatprep.mubr.msk.bf16.mxu0 %vm6766_vm1, %v6765_v15 }
0x16e4   :  { %v2782_v59 = vpop.f32.mrf.mxu0 }
0x16e5   :  { %v2789_v16 = vadd.f32 %v2782_v59, %v7326_v32 }
0x16e6   :  { %v6160_v41 = vpop.f32.mrf.mxu0 }
0x16e7   :  { %v7380_v44 = vadd.f32 %v2797_v54, %v2789_v16 }
0x16e8   :  { %v2785_v45 = vpop.f32.mrf.mxu0 }
0x16e9   :  { %v2790_v46 = vadd.f32 %v2785_v45, %v7333_v43  ;;  %v2821_v18 = vsel %vm100_vm0, %v7380_v44, 0.0 }
0x16ea   :  { %2822 = vadd.xlane.f32.xlu0 %v2821_v18  ;;  %v6161_v47 = vpop.f32.mrf.mxu0 }
0x16eb   :  { %v7385_v48 = vadd.f32 %v2797_v54, %v2790_v46 }
0x16ed   :  { %v2824_v9 = vsel %vm100_vm0, %v7385_v48, 0.0 }
0x16ee   :  { %2825 = vadd.xlane.f32.xlu0 %v2824_v9 }
0x1773   :  { %v2823_v52 = vpop.xlane.xlu0 %2822 }
0x1774   :  { %v2827_v53 = vmul.f32 0.03125, %v2823_v52 }
0x1776   :  { %v2829_v32 = vsub.f32 %v7380_v44, %v2827_v53 }
0x1777   :  { %v2826_v55 = vpop.xlane.xlu0 %2825 }
0x1778   :  { %v2828_v26 = vmul.f32 0.03125, %v2826_v55  ;;  %v2831_v56 = vmul.f32 %v2829_v32, %v2829_v32  ;;  %v2845_v21 = vmul.f32 %v2844_v19, %v2829_v32 }
0x177a   :  { %v2830_v43 = vsub.f32 %v7385_v48, %v2828_v26  ;;  %v2833_v24 = vsel %vm100_vm0, %v2831_v56, 0.0 }
0x177b   :  { %2834 = vadd.xlane.f32.xlu0 %v2833_v24 }
0x177c   :  { %v2832_v58 = vmul.f32 %v2830_v43, %v2830_v43  ;;  %v2846_v29 = vmul.f32 %v2844_v19, %v2830_v43 }
0x177e   :  { %v2836_v60 = vsel %vm100_vm0, %v2832_v58, 0.0  ;;  %v6669_v58 = vld [vmem:[#allocation5] sm:$0xff] }
0x177f   :  { %2837 = vadd.xlane.f32.xlu0 %v2836_v60 }
0x1804   :  { %v2835_v62 = vpop.xlane.xlu0 %2834 }
0x1805   :  { %v2839_v63 = vmul.f32 0.032258064, %v2835_v62 }
0x1807   :  { %6572 = vrsqrt.f32 %v2839_v63  ;;  %vm2849_vm11 = vcmp.eq.f32.partialorder %v2839_v63, inf  ;;  %v2852_v3 = vand.u32 2147483648, %v2839_v63  ;;  %vm2851_vm12 = vcmp.eq.f32.partialorder %v2839_v63, 0.0 }
0x1808   :  { %v2838_v2 = vpop.xlane.xlu0 %2837 }
0x1809   :  { %v2840_v0 = vmul.f32 0.032258064, %v2838_v2 }
0x180b   :  { %6574 = vrsqrt.f32 %v2840_v0  ;;  %vm2856_vm13 = vcmp.eq.f32.partialorder %v2840_v0, inf  ;;  %v2859_v10 = vand.u32 2147483648, %v2840_v0  ;;  %vm2858_vm2 = vcmp.eq.f32.partialorder %v2840_v0, 0.0 }
0x1814   :  { %v6573_v28 = vpop.eup %6572 }
0x1815   :  { %v2848_v51 = vmul.f32 %v6573_v28, %v2839_v63 }
0x1817   :  { %v2850_v4 = vsel %vm2849_vm11, %v2839_v63, %v2848_v51 }
0x1818   :  { %v6575_v6 = vpop.eup %6574  ;;  %v2853_v7 = vsel %vm2851_vm12, %v2852_v3, %v2850_v4 }
0x1819   :  { %v2861_v8 = vadd.f32 1e-06, %v2853_v7  ;;  %v2855_v11 = vmul.f32 %v6575_v6, %v2840_v0 }
0x181b   :  { %6576 = vrcp.f32 %v2861_v8  ;;  %v2857_v42 = vsel %vm2856_vm13, %v2840_v0, %v2855_v11 }
0x181c   :  { %v2860_v1 = vsel %vm2858_vm2, %v2859_v10, %v2857_v42 }
0x181d   :  { %v2862_v13 = vadd.f32 1e-06, %v2860_v1 }
0x181f   :  { %6578 = vrcp.f32 %v2862_v13 }
0x1828   :  { %v6577_v20 = vpop.eup %6576 }
0x1829   :  { %v2864_v5 = vmul.f32 %v6577_v20, %v2845_v21 }
0x182b   :  { %v2871_v25 = vadd.f32 %v2870_v22, %v2864_v5 }
0x182c   :  { %v6579_v23 = vpop.eup %6578 }
0x182d   :  { %v2866_v49 = vmul.f32 %v6579_v23, %v2846_v29 }
0x182f   :  { %v2872_v27 = vadd.f32 %v2870_v22, %v2866_v49 }
0x1831   :  { %v2873_v31 = vpack.c.bf16 %v2872_v27, %v2871_v25 }
0x1833   :  { %6167 = vmatmul.mubr.msk.bf16.vlgmr.msra.gmra.mxu1 %vm100_vm0, %v2873_v31 }
0x1834   :  { %6172 = vmatprep.mubr.msk.bf16.mxu1 %vm6766_vm1, %v6765_v15 }
0x18f3   :  { %v2929_v36 = vpop.f32.mrf.mxu1 }
0x18f4   :  { %v2930_v14 = vadd.f32 %v2929_v36, %v7419_v34 }
0x18f5   :  { %v6168_v37 = vpop.f32.mrf.mxu1 }
0x18f6   :  { %v7422_v39 = vpack.c.bf16 %v2930_v14, %v2930_v14  ;;  %2938 = vrot.lane.b32.xlu0 %v2930_v14, %s6767_s28 }
0x18f7   :  { %v7425_v40 = vpop.f32.mrf.mxu1 }
0x18f8   :  { %3082 = vrot.lane.b32.xlu1 %v7422_v39, %s6768_s29  ;;  %v2933_v5 = vadd.f32 %v7425_v40, %v7419_v34 }
0x18f9   :  { %v6169_v17 = vpop.f32.mrf.mxu1 }
0x18fa   :  { %3300 = vrot.lane.b32.xlu0 %v7422_v39, %s6769_s30  ;;  %v7468_v23 = vpack.c.bf16 %v2933_v5, %v2933_v5 }
0x18fc   :  { %3192 = vrot.lane.b32.xlu1 %v7422_v39, %s6770_s9 }
0x1968   :  { %v2939_v54 = vpop.permute.xlu0 %2938 }
0x1969   :  { %2941 = vxpose.xlu1.b32.start.end [1/1] (short) (narrow) %v2939_v54, 32 }
0x196a   :  { %v3083_v59 = vpop.permute.xlu1 %3082 }
0x196c   :  { %v3301_v43 = vpop.permute.xlu0 %3300 }
0x196e   :  { %v3193_v16 = vpop.permute.xlu1 %3192 }
0x19e5   :  { %v2957_v41 = vpop.trf.xlu1 }
0x19e9   :  { %v2958_v45 = vpop.trf.xlu1 }
0x19ea   :  { %v2973_v46 = vpack.c.bf16 %v2958_v45, %v2957_v41 }
0x19ec   :  { %v3085_v18 = vrot.slane %v2973_v46, 4  ;;  %v2979_v47 = vsel %vm260_vm6, %v2973_v46, 0 }
0x19ed   :  { %6171 = vmatpush3.bf16.msra.mxu1 %v2979_v47  ;;  %v2959_v9 = vpop.trf.xlu1 }
0x19ee   :  { %6182 = vmatprep.subr.bf16.mxu1 %v6765_v15  ;;  %v3090_v52 = vsel %vm260_vm6, %v3085_v18, 0 }
0x19f0   :  { %6173 = vmatmul.mubr.msk.bf16.vlgmr.msra.gmra.mxu1 %vm256_vm7, %v7422_v39 }
0x19f1   :  { %6183 = vmatpush3.bf16.msra.mxu1 %v3090_v52  ;;  %v2960_v53 = vpop.trf.xlu1  ;;  %6184 = vmatprep.mubr.msk.bf16.mxu1 %vm6766_vm1, %v6765_v15 }
0x19f2   :  { %v2974_v32 = vpack.c.bf16 %v2960_v53, %v2959_v9  ;;  %6194 = vmatprep.subr.bf16.mxu1 %v6765_v15 }
0x19f4   :  { %v3198_v55 = vsel %vm260_vm6, %v2974_v32, 0  ;;  %v3303_v26 = vrot.slane %v2974_v32, 4 }
0x19f6   :  { %v3308_v56 = vsel %vm260_vm6, %v3303_v26, 0 }
0x19f8   :  { %6185 = vmatmul.mubr.msk.bf16.vlgmr.msra.gmra.mxu1 %vm256_vm7, %v3083_v59 }
0x19f9   :  { %6195 = vmatpush3.bf16.msra.mxu1 %v3198_v55  ;;  %6196 = vmatprep.mubr.msk.bf16.mxu1 %vm6766_vm1, %v6765_v15 }
0x19fa   :  { %6206 = vmatprep.subr.bf16.mxu1 %v6765_v15 }
0x1a00   :  { %6197 = vmatmul.mubr.msk.bf16.vlgmr.msra.gmra.mxu1 %vm256_vm7, %v3193_v16 }
0x1a01   :  { %6207 = vmatpush3.bf16.msra.mxu1 %v3308_v56  ;;  %6208 = vmatprep.mubr.msk.bf16.mxu1 %vm6766_vm1, %v6765_v15 }
0x1a02   :  { %6218 = vmatprep.subr.bf16.mxu1 %v6765_v15 }
0x1a08   :  { %6209 = vmatmul.mubr.msk.bf16.vlgmr.msra.gmra.mxu1 %vm256_vm7, %v3301_v43 }
0x1a09   :  { %6222 = vmatprep.mubr.msk.bf16.mxu1 %vm6766_vm1, %v6765_v15 }
0x1ab0   :  { %v3015_v24 = vpop.f32.mrf.mxu1 }
0x1ab1   :  { %v3016_v60 = vadd.f32 %v6669_v58, %v3015_v24 }
0x1ab2   :  { %v6174_v62 = vpop.f32.mrf.mxu1 }
0x1ab3   :  { %v3021_v63 = vsel %vm256_vm7, %v3016_v60, -inf }
0x1ab4   :  { %3022 = vmax.xlane.f32.xlu0 %v3021_v63  ;;  %v3018_v2 = vpop.f32.mrf.mxu1 }
0x1ab6   :  { %v6175_v0 = vpop.f32.mrf.mxu1 }
0x1ab8   :  { %v3126_v28 = vpop.f32.mrf.mxu1 }
0x1ab9   :  { %v3127_v51 = vadd.f32 %v6669_v58, %v3126_v28 }
0x1aba   :  { %v6186_v3 = vpop.f32.mrf.mxu1 }
0x1abb   :  { %v3132_v4 = vsel %vm256_vm7, %v3127_v51, -inf }
0x1abc   :  { %3133 = vmax.xlane.f32.xlu1 %v3132_v4  ;;  %v3129_v6 = vpop.f32.mrf.mxu1 }
0x1abe   :  { %v6187_v7 = vpop.f32.mrf.mxu1 }
0x1ac0   :  { %v3234_v8 = vpop.f32.mrf.mxu1 }
0x1ac1   :  { %v3235_v11 = vadd.f32 %v6669_v58, %v3234_v8 }
0x1ac2   :  { %v6198_v10 = vpop.f32.mrf.mxu1 }
0x1ac3   :  { %v3240_v42 = vsel %vm256_vm7, %v3235_v11, -inf }
0x1ac4   :  { %3241 = vmax.xlane.f32.xlu0 %v3240_v42  ;;  %v3237_v1 = vpop.f32.mrf.mxu1 }
0x1ac6   :  { %v6199_v13 = vpop.f32.mrf.mxu1 }
0x1ac8   :  { %v3344_v12 = vpop.f32.mrf.mxu1 }
0x1ac9   :  { %v3345_v19 = vadd.f32 %v6669_v58, %v3344_v12 }
0x1aca   :  { %v6210_v20 = vpop.f32.mrf.mxu1 }
0x1acb   :  { %v3350_v21 = vsel %vm256_vm7, %v3345_v19, -inf }
0x1acc   :  { %3351 = vmax.xlane.f32.xlu0 %v3350_v21  ;;  %v3347_v22 = vpop.f32.mrf.mxu1 }
0x1acd   :  { %3034 = vrot.lane.b32.xlu1 %v7422_v39, %s6771_s12 }
0x1ace   :  { %v6211_v29 = vpop.f32.mrf.mxu1 }
0x1ad1   :  { %3144 = vrot.lane.b32.xlu1 %v7422_v39, %s6774_s15 }
0x1ad5   :  { %3252 = vrot.lane.b32.xlu1 %v7422_v39, %s6772_s13 }
0x1ad9   :  { %3362 = vrot.lane.b32.xlu1 %v7422_v39, %s6773_s14 }
0x1add   :  { %3621 = vrot.lane.b32.xlu1 %v7468_v23, %s6768_s29 }
0x1b3d   :  { %v3023_v49 = vpop.xlane.xlu0 %3022 }
0x1b3e   :  { %v3024_v25 = vsub.f32 %v3016_v60, %v3023_v49 }
0x1b40   :  { %v3025_v27 = vmul.f32 1.442695, %v3024_v25 }
0x1b42   :  { %6580 = vpow2.f32 %v3025_v27 }
0x1b45   :  { %v3134_v31 = vpop.xlane.xlu1 %3133 }
0x1b46   :  { %v3135_v36 = vsub.f32 %v3127_v51, %v3134_v31 }
0x1b48   :  { %v3136_v14 = vmul.f32 1.442695, %v3135_v36 }
0x1b49   :  { %v3035_v37 = vpop.permute.xlu1 %3034 }
0x1b4a   :  { %6582 = vpow2.f32 %v3136_v14  ;;  %v3040_v17 = vsel %vm260_vm6, %v3035_v37, 0 }
0x1b4b   :  { %6177 = vmatpush3.bf16.msra.mxu0 %v3040_v17 }
0x1b4c   :  { %6188 = vmatprep.subr.bf16.mxu0 %v6765_v15 }
0x1b4d   :  { %v3242_v39 = vpop.xlane.xlu0 %3241  ;;  %v3145_v24 = vpop.permute.xlu1 %3144 }
0x1b4e   :  { %v3243_v40 = vsub.f32 %v3235_v11, %v3242_v39  ;;  %v3150_v62 = vsel %vm260_vm6, %v3145_v24, 0 }
0x1b4f   :  { %v6581_v54 = vpop.eup %6580 }
0x1b50   :  { %v3244_v59 = vmul.f32 1.442695, %v3243_v40  ;;  %v3027_v16 = vsel %vm256_vm7, %v6581_v54, 0.0 }
0x1b51   :  { %3028 = vadd.xlane.f32.xlu0 %v3027_v16  ;;  %v3253_v28 = vpop.permute.xlu1 %3252 }
0x1b52   :  { %6584 = vpow2.f32 %v3244_v59  ;;  %v3258_v3 = vsel %vm260_vm6, %v3253_v28, 0 }
0x1b55   :  { %v3352_v47 = vpop.xlane.xlu0 %3351  ;;  %v3363_v7 = vpop.permute.xlu1 %3362 }
0x1b56   :  { %v3353_v9 = vsub.f32 %v3345_v19, %v3352_v47  ;;  %v3368_v11 = vsel %vm260_vm6, %v3363_v7, 0 }
0x1b57   :  { %v6583_v41 = vpop.eup %6582 }
0x1b58   :  { %v3138_v45 = vsel %vm256_vm7, %v6583_v41, 0.0  ;;  %v3354_v52 = vmul.f32 1.442695, %v3353_v9 }
0x1b59   :  { %3139 = vadd.xlane.f32.xlu0 %v3138_v45  ;;  %v3622_v12 = vpop.permute.xlu1 %3621 }
0x1b5a   :  { %6586 = vpow2.f32 %v3354_v52 }
0x1b5f   :  { %v6585_v46 = vpop.eup %6584 }
0x1b60   :  { %v3246_v18 = vsel %vm256_vm7, %v6585_v46, 0.0 }
0x1b61   :  { %3247 = vadd.xlane.f32.xlu0 %v3246_v18 }
0x1b67   :  { %v6587_v53 = vpop.eup %6586 }
0x1b68   :  { %v3356_v32 = vsel %vm256_vm7, %v6587_v53, 0.0 }
0x1b77   :  { %3477 = vrot.lane.b32.xlu0 %v2933_v5, %s6767_s28 }
0x1b96   :  { %3357 = vadd.xlane.f32.xlu0 %v3356_v32 }
0x1bac   :  { %3731 = vrot.lane.b32.xlu0 %v7468_v23, %s6770_s9 }
0x1bb0   :  { %3839 = vrot.lane.b32.xlu0 %v7468_v23, %s6769_s30 }
0x1bda   :  { %v3029_v55 = vpop.xlane.xlu0 %3028 }
0x1bdb   :  { %6588 = vrcp.f32 %v3029_v55 }
0x1be2   :  { %v3140_v26 = vpop.xlane.xlu0 %3139 }
0x1be3   :  { %6590 = vrcp.f32 %v3140_v26 }
0x1be8   :  { %v6589_v56 = vpop.eup %6588 }
0x1be9   :  { %v3031_v43 = vmul.f32 %v6589_v56, %v6581_v54 }
0x1bea   :  { %v3248_v58 = vpop.xlane.xlu0 %3247 }
0x1beb   :  { %6592 = vrcp.f32 %v3248_v58  ;;  %v3032_v60 = vpack.c.bf16 %v3031_v43, %v3031_v43  ;;  %v6670_v43 = vld [vmem:[#allocation5 + $0x8] sm:$0xff] }
0x1bed   :  { %6179 = vmatmul.mubr.msk.bf16.vlgmr.msra.gmra.mxu0 %vm256_vm7, %v3032_v60 }
0x1bee   :  { %6189 = vmatpush3.bf16.msra.mxu0 %v3150_v62  ;;  %v3478_v63 = vpop.permute.xlu0 %3477  ;;  %6190 = vmatprep.mubr.msk.bf16.mxu0 %vm6766_vm1, %v6765_v15 }
0x1bef   :  { %3480 = vxpose.xlu1.b32.start.end [1/1] (short) (narrow) %v3478_v63, 32  ;;  %6200 = vmatprep.subr.bf16.mxu0 %v6765_v15 }
0x1bf0   :  { %v6591_v2 = vpop.eup %6590 }
0x1bf1   :  { %v3142_v0 = vmul.f32 %v6591_v2, %v6583_v41 }
0x1bf3   :  { %v3143_v51 = vpack.c.bf16 %v3142_v0, %v3142_v0 }
0x1bf5   :  { %6191 = vmatmul.mubr.msk.bf16.vlgmr.msra.gmra.mxu0 %vm256_vm7, %v3143_v51 }
0x1bf6   :  { %6201 = vmatpush3.bf16.msra.mxu0 %v3258_v3  ;;  %6202 = vmatprep.mubr.msk.bf16.mxu0 %vm6766_vm1, %v6765_v15 }
0x1bf7   :  { %6212 = vmatprep.subr.bf16.mxu0 %v6765_v15 }
0x1bf8   :  { %v6593_v4 = vpop.eup %6592 }
0x1bf9   :  { %v3250_v6 = vmul.f32 %v6593_v4, %v6585_v46 }
0x1bfb   :  { %v3251_v8 = vpack.c.bf16 %v3250_v6, %v3250_v6 }
0x1bfd   :  { %6203 = vmatmul.mubr.msk.bf16.vlgmr.msra.gmra.mxu0 %vm256_vm7, %v3251_v8 }
0x1bfe   :  { %6213 = vmatpush3.bf16.msra.mxu0 %v3368_v11  ;;  %6214 = vmatprep.mubr.msk.bf16.mxu0 %vm6766_vm1, %v6765_v15 }
0x1bff   :  { %6226 = vmatprep.subr.bf16.mxu0 %v6765_v15 }
0x1c1f   :  { %v3358_v10 = vpop.xlane.xlu0 %3357 }
0x1c20   :  { %6594 = vrcp.f32 %v3358_v10 }
0x1c23   :  { %v3732_v14 = vpop.permute.xlu0 %3731 }
0x1c27   :  { %v3840_v17 = vpop.permute.xlu0 %3839 }
0x1c2d   :  { %v6595_v42 = vpop.eup %6594 }
0x1c2e   :  { %v3360_v1 = vmul.f32 %v6595_v42, %v6587_v53 }
0x1c30   :  { %v3361_v13 = vpack.c.bf16 %v3360_v1, %v3360_v1 }
0x1c32   :  { %6215 = vmatmul.mubr.msk.bf16.vlgmr.msra.gmra.mxu0 %vm256_vm7, %v3361_v13 }
0x1c33   :  { %6228 = vmatprep.mubr.msk.bf16.mxu0 %vm6766_vm1, %v6765_v15 }
0x1c6b   :  { %v3496_v19 = vpop.trf.xlu1 }
0x1c6f   :  { %v3497_v20 = vpop.trf.xlu1 }
0x1c70   :  { %v3512_v21 = vpack.c.bf16 %v3497_v20, %v3496_v19 }
0x1c72   :  { %v3624_v22 = vrot.slane %v3512_v21, 4  ;;  %v3518_v29 = vsel %vm260_vm6, %v3512_v21, 0 }
0x1c73   :  { %6227 = vmatpush3.bf16.msra.mxu0 %v3518_v29  ;;  %v3498_v5 = vpop.trf.xlu1 }
0x1c74   :  { %6238 = vmatprep.subr.bf16.mxu0 %v6765_v15  ;;  %v3629_v49 = vsel %vm260_vm6, %v3624_v22, 0 }
0x1c76   :  { %6229 = vmatmul.mubr.msk.bf16.vlgmr.msra.gmra.mxu0 %vm256_vm7, %v7468_v23 }
0x1c77   :  { %6239 = vmatpush3.bf16.msra.mxu0 %v3629_v49  ;;  %v3499_v25 = vpop.trf.xlu1  ;;  %6240 = vmatprep.mubr.msk.bf16.mxu0 %vm6766_vm1, %v6765_v15 }
0x1c78   :  { %v3513_v27 = vpack.c.bf16 %v3499_v25, %v3498_v5  ;;  %6250 = vmatprep.subr.bf16.mxu0 %v6765_v15 }
0x1c7a   :  { %v3737_v31 = vsel %vm260_vm6, %v3513_v27, 0  ;;  %v3842_v36 = vrot.slane %v3513_v27, 4 }
0x1c7c   :  { %v3847_v37 = vsel %vm260_vm6, %v3842_v36, 0 }
0x1c7e   :  { %6241 = vmatmul.mubr.msk.bf16.vlgmr.msra.gmra.mxu0 %vm256_vm7, %v3622_v12 }
0x1c7f   :  { %6251 = vmatpush3.bf16.msra.mxu0 %v3737_v31  ;;  %6252 = vmatprep.mubr.msk.bf16.mxu0 %vm6766_vm1, %v6765_v15 }
0x1c80   :  { %6262 = vmatprep.subr.bf16.mxu0 %v6765_v15 }
0x1c86   :  { %6253 = vmatmul.mubr.msk.bf16.vlgmr.msra.gmra.mxu0 %vm256_vm7, %v3732_v14 }
0x1c87   :  { %6263 = vmatpush3.bf16.msra.mxu0 %v3847_v37  ;;  %6264 = vmatprep.mubr.msk.bf16.mxu0 %vm6766_vm1, %v6765_v15 }
0x1c88   :  { %6274 = vmatprep.subr.bf16.mxu0 %v6765_v15 }
0x1c8e   :  { %6265 = vmatmul.mubr.msk.bf16.vlgmr.msra.gmra.mxu0 %vm256_vm7, %v3840_v17 }
0x1c8f   :  { %6278 = vmatprep.mubr.msk.bf16.mxu0 %vm6766_vm1, %v6765_v15 }
0x1cad   :  { %v7522_v39 = vpop.f32.mrf.mxu0 }
0x1caf   :  { %v6180_v40 = vpop.f32.mrf.mxu0 }
0x1cb1   :  { %v3079_v54 = vpop.f32.mrf.mxu0 }
0x1cb3   :  { %v6181_v59 = vpop.f32.mrf.mxu0 }
0x1cb5   :  { %v3186_v16 = vpop.f32.mrf.mxu0 }
0x1cb7   :  { %v6192_v41 = vpop.f32.mrf.mxu0 }
0x1cb9   :  { %v3189_v45 = vpop.f32.mrf.mxu0 }
0x1cbb   :  { %v6193_v46 = vpop.f32.mrf.mxu0 }
0x1cbd   :  { %v3294_v18 = vpop.f32.mrf.mxu0 }
0x1cbf   :  { %v6204_v47 = vpop.f32.mrf.mxu0 }
0x1cc1   :  { %v3297_v9 = vpop.f32.mrf.mxu0 }
0x1cc3   :  { %v6205_v52 = vpop.f32.mrf.mxu0 }
0x1cf2   :  { %v3404_v53 = vpop.f32.mrf.mxu0 }
0x1cf4   :  { %v6216_v32 = vpop.f32.mrf.mxu0 }
0x1cf6   :  { %v3407_v55 = vpop.f32.mrf.mxu0 }
0x1cf8   :  { %v6217_v26 = vpop.f32.mrf.mxu0 }
0x1d36   :  { %v3554_v56 = vpop.f32.mrf.mxu0 }
0x1d37   :  { %v3555_v24 = vadd.f32 %v6670_v43, %v3554_v56 }
0x1d38   :  { %v6230_v58 = vpop.f32.mrf.mxu0 }
0x1d39   :  { %v3560_v60 = vsel %vm256_vm7, %v3555_v24, -inf }
0x1d3a   :  { %3561 = vmax.xlane.f32.xlu0 %v3560_v60  ;;  %v3557_v62 = vpop.f32.mrf.mxu0 }
0x1d3c   :  { %v6231_v63 = vpop.f32.mrf.mxu0 }
0x1d3e   :  { %v3665_v2 = vpop.f32.mrf.mxu0 }
0x1d3f   :  { %v3666_v0 = vadd.f32 %v6670_v43, %v3665_v2 }
0x1d40   :  { %v6242_v28 = vpop.f32.mrf.mxu0 }
0x1d41   :  { %v3671_v51 = vsel %vm256_vm7, %v3666_v0, -inf }
0x1d42   :  { %3672 = vmax.xlane.f32.xlu1 %v3671_v51  ;;  %v3668_v3 = vpop.f32.mrf.mxu0 }
0x1d44   :  { %v6243_v4 = vpop.f32.mrf.mxu0 }
0x1d46   :  { %v3773_v6 = vpop.f32.mrf.mxu0 }
0x1d47   :  { %v3774_v7 = vadd.f32 %v6670_v43, %v3773_v6 }
0x1d48   :  { %v6254_v8 = vpop.f32.mrf.mxu0 }
0x1d49   :  { %v3779_v11 = vsel %vm256_vm7, %v3774_v7, -inf }
0x1d4a   :  { %3780 = vmax.xlane.f32.xlu0 %v3779_v11  ;;  %v3776_v10 = vpop.f32.mrf.mxu0 }
0x1d4c   :  { %v6255_v42 = vpop.f32.mrf.mxu0 }
0x1d4e   :  { %v3883_v1 = vpop.f32.mrf.mxu0 }
0x1d4f   :  { %v3884_v13 = vadd.f32 %v6670_v43, %v3883_v1 }
0x1d50   :  { %v6266_v12 = vpop.f32.mrf.mxu0 }
0x1d51   :  { %v3889_v19 = vsel %vm256_vm7, %v3884_v13, -inf }
0x1d52   :  { %3890 = vmax.xlane.f32.xlu0 %v3889_v19  ;;  %v3886_v20 = vpop.f32.mrf.mxu0 }
0x1d53   :  { %3411 = vrot.lane.b32.xlu1 %v3186_v16, %s6763_s11 }
0x1d54   :  { %v6267_v21 = vpop.f32.mrf.mxu0 }
0x1d57   :  { %3415 = vrot.lane.b32.xlu1 %v3294_v18, %s6776_s17 }
0x1d5b   :  { %3419 = vrot.lane.b32.xlu1 %v3404_v53, %s6777_s18 }
0x1d5f   :  { %3426 = vrot.lane.b32.xlu1 %v7402_v61, %s6775_s16 }
0x1d68   :  { %3428 = vrot.lane.b32.xlu0 %v7396_v50, %s6775_s16 }
0x1dc3   :  { %v3562_v22 = vpop.xlane.xlu0 %3561 }
0x1dc4   :  { %v3563_v29 = vsub.f32 %v3555_v24, %v3562_v22 }
0x1dc6   :  { %v3564_v5 = vmul.f32 1.442695, %v3563_v29 }
0x1dc8   :  { %6596 = vpow2.f32 %v3564_v5 }
0x1dcb   :  { %v3673_v49 = vpop.xlane.xlu1 %3672 }
0x1dcc   :  { %v3674_v25 = vsub.f32 %v3666_v0, %v3673_v49 }
0x1dce   :  { %v3675_v27 = vmul.f32 1.442695, %v3674_v25 }
0x1dcf   :  { %v3412_v31 = vpop.permute.xlu1 %3411 }
0x1dd0   :  { %6598 = vpow2.f32 %v3675_v27  ;;  %v3422_v18 = vsel %vm256_vm7, %v7522_v39, %v3412_v31 }
0x1dd3   :  { %v3781_v36 = vpop.xlane.xlu0 %3780  ;;  %v3416_v54 = vpop.permute.xlu1 %3415 }
0x1dd4   :  { %v3782_v14 = vsub.f32 %v3774_v7, %v3781_v36  ;;  %v3423_v47 = vsel %vm706_vm8, %v3422_v18, %v3416_v54 }
0x1dd5   :  { %v6597_v37 = vpop.eup %6596 }
0x1dd6   :  { %v3783_v17 = vmul.f32 1.442695, %v3782_v14  ;;  %v3566_v40 = vsel %vm256_vm7, %v6597_v37, 0.0 }
0x1dd7   :  { %3567 = vadd.xlane.f32.xlu0 %v3566_v40  ;;  %v3420_v16 = vpop.permute.xlu1 %3419 }
0x1dd8   :  { %6600 = vpow2.f32 %v3783_v17  ;;  %v3424_v52 = vsel %vm708_vm9, %v3423_v47, %v3420_v16 }
0x1dd9   :  { %v3425_v32 = vpack.c.bf16 %v3424_v52, %v3424_v52 }
0x1ddb   :  { %v3891_v61 = vpop.xlane.xlu0 %3890  ;;  %v3427_v9 = vpop.permute.xlu1 %3426 }
0x1ddc   :  { %v3892_v50 = vsub.f32 %v3884_v13, %v3891_v61 }
0x1ddd   :  { %v6599_v59 = vpop.eup %6598 }
0x1dde   :  { %v3893_v41 = vmul.f32 1.442695, %v3892_v50  ;;  %v3677_v45 = vsel %vm256_vm7, %v6599_v59, 0.0 }
0x1ddf   :  { %3678 = vadd.xlane.f32.xlu0 %v3677_v45  ;;  %v3429_v46 = vpop.permute.xlu0 %3428 }
0x1de0   :  { %6602 = vpow2.f32 %v3893_v41  ;;  %6219 = vmatpush3.bf16.msra.mxu1 %v3429_v46  ;;  %6275 = vmatpush3.bf16.msra.mxu0 %v3429_v46 }
0x1de1   :  { %6220 = vmatprep.subr.bf16.mxu1 %v6765_v15  ;;  %6276 = vmatprep.subr.bf16.mxu0 %v6765_v15 }
0x1de4   :  { %6221 = vmatpush3.bf16.msra.mxu1 %v3427_v9  ;;  %6277 = vmatpush3.bf16.msra.mxu0 %v3427_v9 }
0x1de5   :  { %v6601_v53 = vpop.eup %6600  ;;  %6232 = vmatprep.subr.bf16.mxu1 %v6765_v15  ;;  %6290 = vmatprep.subr.bf16.mxu0 %v6765_v15 }
0x1de6   :  { %v3785_v39 = vsel %vm256_vm7, %v6601_v53, 0.0 }
0x1de7   :  { %3786 = vadd.xlane.f32.xlu0 %v3785_v39  ;;  %6223 = vmatmul.mubr.msk.bf16.vlgmr.msra.gmra.mxu1 %vm100_vm0, %v3425_v32 }
0x1de8   :  { %6234 = vmatprep.mubr.msk.bf16.mxu1 %vm6766_vm1, %v6765_v15 }
0x1ded   :  { %v6603_v55 = vpop.eup %6602 }
0x1dee   :  { %v3895_v26 = vsel %vm256_vm7, %v6603_v55, 0.0 }
0x1def   :  { %3896 = vadd.xlane.f32.xlu1 %v3895_v26 }
0x1dfd   :  { %3573 = vrot.lane.b32.xlu0 %v7468_v23, %s6771_s12 }
0x1e01   :  { %3683 = vrot.lane.b32.xlu0 %v7468_v23, %s6774_s15 }
0x1e05   :  { %3791 = vrot.lane.b32.xlu0 %v7468_v23, %s6772_s13 }
0x1e09   :  { %3901 = vrot.lane.b32.xlu0 %v7468_v23, %s6773_s14 }
0x1e60   :  { %v3568_v56 = vpop.xlane.xlu0 %3567 }
0x1e61   :  { %6604 = vrcp.f32 %v3568_v56 }
0x1e68   :  { %v3679_v43 = vpop.xlane.xlu0 %3678 }
0x1e69   :  { %6606 = vrcp.f32 %v3679_v43 }
0x1e6e   :  { %v6605_v24 = vpop.eup %6604 }
0x1e6f   :  { %v3570_v60 = vmul.f32 %v6605_v24, %v6597_v37 }
0x1e70   :  { %v3787_v58 = vpop.xlane.xlu0 %3786 }
0x1e71   :  { %6608 = vrcp.f32 %v3787_v58  ;;  %v3571_v2 = vpack.c.bf16 %v3570_v60, %v3570_v60 }
0x1e74   :  { %v3574_v62 = vpop.permute.xlu0 %3573 }
0x1e75   :  { %v3579_v63 = vsel %vm260_vm6, %v3574_v62, 0 }
0x1e76   :  { %6233 = vmatpush3.bf16.msra.mxu1 %v3579_v63  ;;  %v6607_v0 = vpop.eup %6606 }
0x1e77   :  { %6244 = vmatprep.subr.bf16.mxu1 %v6765_v15  ;;  %v3681_v3 = vmul.f32 %v6607_v0, %v6599_v59 }
0x1e78   :  { %v3897_v28 = vpop.xlane.xlu1 %3896  ;;  %v3684_v51 = vpop.permute.xlu0 %3683 }
0x1e79   :  { %v3689_v23 = vsel %vm260_vm6, %v3684_v51, 0  ;;  %6235 = vmatmul.mubr.msk.bf16.vlgmr.msra.gmra.mxu1 %vm256_vm7, %v3571_v2  ;;  %6610 = vrcp.f32 %v3897_v28  ;;  %v3682_v6 = vpack.c.bf16 %v3681_v3, %v3681_v3  ;;  %v7604_v51 = vld [vmem:[%s7901_s4 + $0x4c] ss:$12 sps:$4 sm:$0xff]  }
0x1e7a   :  { %6245 = vmatpush3.bf16.msra.mxu1 %v3689_v23  ;;  %6246 = vmatprep.mubr.msk.bf16.mxu1 %vm6766_vm1, %v6765_v15 }
0x1e7b   :  { %6256 = vmatprep.subr.bf16.mxu1 %v6765_v15 }
0x1e7c   :  { %v3792_v4 = vpop.permute.xlu0 %3791 }
0x1e7d   :  { %v3797_v8 = vsel %vm260_vm6, %v3792_v4, 0 }
0x1e7e   :  { %v6609_v7 = vpop.eup %6608 }
0x1e7f   :  { %v3789_v11 = vmul.f32 %v6609_v7, %v6601_v53 }
0x1e80   :  { %v3902_v10 = vpop.permute.xlu0 %3901 }
0x1e81   :  { %6247 = vmatmul.mubr.msk.bf16.vlgmr.msra.gmra.mxu1 %vm256_vm7, %v3682_v6  ;;  %v3790_v42 = vpack.c.bf16 %v3789_v11, %v3789_v11  ;;  %v3907_v13 = vsel %vm260_vm6, %v3902_v10, 0 }
0x1e82   :  { %6257 = vmatpush3.bf16.msra.mxu1 %v3797_v8  ;;  %6258 = vmatprep.mubr.msk.bf16.mxu1 %vm6766_vm1, %v6765_v15 }
0x1e83   :  { %6268 = vmatprep.subr.bf16.mxu1 %v6765_v15 }
0x1e86   :  { %v6611_v1 = vpop.eup %6610 }
0x1e87   :  { %v3899_v12 = vmul.f32 %v6611_v1, %v6603_v55 }
0x1e89   :  { %6259 = vmatmul.mubr.msk.bf16.vlgmr.msra.gmra.mxu1 %vm256_vm7, %v3790_v42  ;;  %v3900_v19 = vpack.c.bf16 %v3899_v12, %v3899_v12 }
0x1e8a   :  { %6269 = vmatpush3.bf16.msra.mxu1 %v3907_v13  ;;  %6270 = vmatprep.mubr.msk.bf16.mxu1 %vm6766_vm1, %v6765_v15 }
0x1e8b   :  { %6282 = vmatprep.subr.bf16.mxu1 %v6765_v15 }
0x1e91   :  { %6271 = vmatmul.mubr.msk.bf16.vlgmr.msra.gmra.mxu1 %vm256_vm7, %v3900_v19 }
0x1e92   :  { %6286 = vmatprep.mubr.msk.bf16.mxu1 %vm6766_vm1, %v6765_v15  ;;  %6283 = vmatpush3.bf16.msra.mxu1 %v7604_v51 }
0x1e93   :  { %6284 = vmatprep.subr.bf16.mxu1 %v6765_v15 }
0x1ea7   :  { %v3469_v20 = vpop.f32.mrf.mxu1 }
0x1ea8   :  { %v4008_v32 = vadd.f32 %v3469_v20, %v7380_v44 }
0x1ea9   :  { %v6224_v21 = vpop.f32.mrf.mxu1 }
0x1eab   :  { %v3472_v22 = vpop.f32.mrf.mxu1 }
0x1ead   :  { %v6225_v29 = vpop.f32.mrf.mxu1 }
0x1f39   :  { %v3615_v5 = vpop.f32.mrf.mxu1 }
0x1f3b   :  { %v6236_v49 = vpop.f32.mrf.mxu1 }
0x1f3d   :  { %v3618_v25 = vpop.f32.mrf.mxu1 }
0x1f3f   :  { %v6237_v27 = vpop.f32.mrf.mxu1 }
0x1f41   :  { %v3725_v31 = vpop.f32.mrf.mxu1 }
0x1f42   :  { %3950 = vrot.lane.b32.xlu0 %v3725_v31, %s6763_s11 }
0x1f43   :  { %v6248_v36 = vpop.f32.mrf.mxu1 }
0x1f45   :  { %v3728_v14 = vpop.f32.mrf.mxu1 }
0x1f46   :  { %v80_v14 = vld [vmem:[%s7904_s7 + $0x8] sm:$0x3] }
0x1f47   :  { %v6249_v37 = vpop.f32.mrf.mxu1 }
0x1f49   :  { %v3833_v17 = vpop.f32.mrf.mxu1 }
0x1f4a   :  { %3954 = vrot.lane.b32.xlu1 %v3833_v17, %s6776_s17 }
0x1f4b   :  { %v6260_v40 = vpop.f32.mrf.mxu1 }
0x1f4c   :  { %v4064_v40 = vrot.slane %v80_v14, %v6886_v38 }
0x1f4d   :  { %v3836_v54 = vpop.f32.mrf.mxu1 }
0x1f4f   :  { %v6261_v61 = vpop.f32.mrf.mxu1 }
0x1f51   :  { %v3943_v50 = vpop.f32.mrf.mxu1 }
0x1f52   :  { %3958 = vrot.lane.b32.xlu0 %v3943_v50, %s6777_s18 }
0x1f53   :  { %v6272_v59 = vpop.f32.mrf.mxu1 }
0x1f55   :  { %v3946_v16 = vpop.f32.mrf.mxu1 }
0x1f56   :  { %4010 = vrot.lane.b32.xlu0 %v7419_v34, %s6775_s16 }
0x1f57   :  { %v6273_v41 = vpop.f32.mrf.mxu1 }
0x1fb4   :  { %v3951_v45 = vpop.permute.xlu0 %3950 }
0x1fb5   :  { %v3961_v18 = vsel %vm256_vm7, %v3615_v5, %v3951_v45 }
0x1fbc   :  { %v3955_v46 = vpop.permute.xlu1 %3954 }
0x1fbd   :  { %v3962_v47 = vsel %vm706_vm8, %v3961_v18, %v3955_v46 }
0x1fc4   :  { %v3959_v9 = vpop.permute.xlu0 %3958 }
0x1fc5   :  { %v3963_v52 = vsel %vm708_vm9, %v3962_v47, %v3959_v9 }
0x1fc6   :  { %v3964_v53 = vpack.c.bf16 %v3963_v52, %v3963_v52 }
0x1fc8   :  { %6279 = vmatmul.mubr.msk.bf16.vlgmr.msra.gmra.mxu0 %vm100_vm0, %v3964_v53  ;;  %v4011_v39 = vpop.permute.xlu0 %4010 }
0x1fc9   :  { %v7588_v55 = vadd.f32 %v4011_v39, %v4008_v32  ;;  %6294 = vmatprep.mubr.msk.bf16.mxu0 %vm6766_vm1, %v6765_v15 }
0x1fcb   :  { %v4015_v34 = vsel %vm100_vm0, %v7588_v55, 0.0 }
0x1fcc   :  { %4016 = vadd.xlane.f32.xlu0 %v4015_v34 }
0x2055   :  { %v4017_v26 = vpop.xlane.xlu0 %4016 }
0x2056   :  { %v4021_v56 = vmul.f32 0.03125, %v4017_v26 }
0x2058   :  { %v4023_v43 = vsub.f32 %v7588_v55, %v4021_v56  ;;  %v4068_v56 = vrot.slane %v7415_v33, 1 }
0x205a   :  { %v4025_v24 = vmul.f32 %v4023_v43, %v4023_v43 }
0x205c   :  { %v4027_v58 = vsel %vm100_vm0, %v4025_v24, 0.0 }
0x205d   :  { %4028 = vadd.xlane.f32.xlu0 %v4027_v58 }
0x2088   :  { %v4002_v44 = vpop.f32.mrf.mxu0 }
0x2089   :  { %v4009_v60 = vadd.f32 %v4002_v44, %v7385_v48  ;;  %v7611_v48 = vld [vmem:[%s7901_s4 + $0x34] ss:$12 sps:$4 sm:$0xff]  }
0x208a   :  { %v6280_v62 = vpop.f32.mrf.mxu0  ;;  %6285 = vmatpush3.bf16.msra.mxu1 %v7611_v48 }
0x208b   :  { %v7597_v63 = vadd.f32 %v4011_v39, %v4009_v60  ;;  %6298 = vmatprep.subr.bf16.mxu1 %v6765_v15 }
0x208c   :  { %v4005_v2 = vpop.f32.mrf.mxu0 }
0x208d   :  { %v4018_v0 = vsel %vm100_vm0, %v7597_v63, 0.0 }
0x208e   :  { %4019 = vadd.xlane.f32.xlu1 %v4018_v0  ;;  %v6281_v28 = vpop.f32.mrf.mxu0 }
0x209f   :  { %4134 = vrot.lane.b32.xlu1 %v7611_v48, %s6767_s28 }
0x20a3   :  { %4126 = vrot.lane.b32.xlu1 %v7415_v33, %s6767_s28 }
0x20e6   :  { %v4029_v8 = vpop.xlane.xlu0 %4028 }
0x20e7   :  { %v4033_v11 = vmul.f32 0.032258064, %v4029_v8 }
0x20e9   :  { %6612 = vrsqrt.f32 %v4033_v11  ;;  %vm4043_vm3 = vcmp.eq.f32.partialorder %v4033_v11, inf  ;;  %v4046_v21 = vand.u32 2147483648, %v4033_v11  ;;  %vm4045_vm4 = vcmp.eq.f32.partialorder %v4033_v11, 0.0 }
0x20f6   :  { %v6613_v1 = vpop.eup %6612 }
0x20f7   :  { %v4042_v12 = vmul.f32 %v6613_v1, %v4033_v11 }
0x20f9   :  { %v4044_v20 = vsel %vm4043_vm3, %v4033_v11, %v4042_v12 }
0x20fa   :  { %v4047_v22 = vsel %vm4045_vm4, %v4046_v21, %v4044_v20 }
0x20fb   :  { %v4055_v29 = vadd.f32 1e-06, %v4047_v22 }
0x2117   :  { %v4020_v23 = vpop.xlane.xlu1 %4019 }
0x2118   :  { %v4022_v3 = vmul.f32 0.03125, %v4020_v23 }
0x211a   :  { %v4024_v4 = vsub.f32 %v7597_v63, %v4022_v3 }
0x211b   :  { %v7627_v19 = vpop.permute.xlu1 %4134 }
0x211c   :  { %v4026_v6 = vmul.f32 %v4024_v4, %v4024_v4 }
0x211e   :  { %v4030_v7 = vsel %vm100_vm0, %v4026_v6, 0.0 }
0x211f   :  { %4031 = vadd.xlane.f32.xlu0 %v4030_v7  ;;  %v4127_v46 = vpop.permute.xlu1 %4126 }
0x2120   :  { %v4128_v18 = vrot.slane %v4127_v46, 1 }
0x2122   :  { %v7644_v47 = vrot.slane %v4128_v18, %v6880_v35 }
0x2135   :  { %4136 = vrot.lane.b32.xlu0 %v7604_v51, %s6767_s28 }
0x21a8   :  { %v4032_v10 = vpop.xlane.xlu0 %4031 }
0x21a9   :  { %v4034_v42 = vmul.f32 0.032258064, %v4032_v10 }
0x21ab   :  { %6614 = vrsqrt.f32 %v4034_v42  ;;  %vm4050_vm5 = vcmp.eq.f32.partialorder %v4034_v42, inf  ;;  %v4053_v25 = vand.u32 2147483648, %v4034_v42  ;;  %vm4052_vm11 = vcmp.eq.f32.partialorder %v4034_v42, 0.0 }
0x21ac   :  { %v7623_v13 = vpop.permute.xlu0 %4136  ;;  %6616 = vrcp.f32 %v4055_v29  ;;  %v6671_v29 = vld [vmem:[#allocation2] sm:$0xff] }
0x21ad   :  { %6291 = vmatpush3.bf16.msra.mxu0 %v7623_v13 }
0x21ae   :  { %6292 = vmatprep.subr.bf16.mxu0 %v6765_v15 }
0x21b1   :  { %6293 = vmatpush3.bf16.msra.mxu0 %v7627_v19 }
0x21b2   :  { %6304 = vmatprep.subr.bf16.mxu0 %v6765_v15 }
0x21b4   :  { %6295 = vmatmul.mubr.msk.bf16.vlgmr.msra.gmra.mxu0 %vm100_vm0, %v7112_v30  ;;  %v4038_v30 = vrot.slane %v80_v14, %v6880_v35 }
0x21b5   :  { %6306 = vmatprep.mubr.msk.bf16.mxu0 %vm6766_vm1, %v6765_v15 }
0x21b6   :  { %v4039_v17 = vmul.f32 %v4038_v30, %v4023_v43  ;;  %v4040_v54 = vmul.f32 %v4038_v30, %v4024_v4  ;;  %v4072_v43 = vrot.slane %v4068_v56, %v6880_v35 }
0x21b8   :  { %v6615_v5 = vpop.eup %6614 }
0x21b9   :  { %v4049_v49 = vmul.f32 %v6615_v5, %v4034_v42  ;;  %v6617_v37 = vpop.eup %6616 }
0x21ba   :  { %v4058_v61 = vmul.f32 %v6617_v37, %v4039_v17 }
0x21bb   :  { %v4051_v27 = vsel %vm4050_vm5, %v4034_v42, %v4049_v49 }
0x21bc   :  { %v4054_v31 = vsel %vm4052_vm11, %v4053_v25, %v4051_v27  ;;  %v4065_v16 = vadd.f32 %v4064_v40, %v4058_v61 }
0x21bd   :  { %v4056_v36 = vadd.f32 1e-06, %v4054_v31 }
0x21bf   :  { %6618 = vrcp.f32 %v4056_v36 }
0x21cc   :  { %v6619_v50 = vpop.eup %6618 }
0x21cd   :  { %v4060_v59 = vmul.f32 %v6619_v50, %v4040_v54 }
0x21cf   :  { %v4066_v41 = vadd.f32 %v4064_v40, %v4060_v59 }
0x21d1   :  { %v4067_v45 = vpack.c.bf16 %v4066_v41, %v4065_v16 }
0x21d3   :  { %6287 = vmatmul.mubr.msk.bf16.vlgmr.msra.gmra.mxu1 %vm100_vm0, %v4067_v45 }
0x21d4   :  { %6300 = vmatprep.mubr.msk.bf16.mxu1 %vm6766_vm1, %v6765_v15 }
0x2274   :  { %v4174_v9 = vpop.f32.mrf.mxu0 }
0x2275   :  { %v4175_v53 = vadd.f32 %v4174_v9, %v7644_v47 }
0x2276   :  { %v6296_v52 = vpop.f32.mrf.mxu0 }
0x2278   :  { %v4177_v32 = vpop.f32.mrf.mxu0 }
0x2279   :  { %v4178_v39 = vadd.f32 %v4177_v32, %v7644_v47 }
0x227a   :  { %v6297_v34 = vpop.f32.mrf.mxu0 }
0x227b   :  { %v7648_v26 = vpack.c.bf16 %v4178_v39, %v4175_v53 }
0x2293   :  { %v4119_v24 = vpop.f32.mrf.mxu1 }
0x2294   :  { %v4120_v58 = vadd.f32 %v4119_v24, %v4072_v43 }
0x2295   :  { %v6288_v44 = vpop.f32.mrf.mxu1 }
0x2296   :  { %v4181_v60 = vpack.c.bf16 %v4120_v58, %v4120_v58 }
0x2297   :  { %v4122_v62 = vpop.f32.mrf.mxu1 }
0x2298   :  { %v7652_v2 = vadd.f32 %v4122_v62, %v4072_v43  ;;  %4435 = vrot.lane.b32.xlu1 %v4181_v60, %s6770_s9  ;;  %4325 = vrot.lane.b32.xlu0 %v4181_v60, %s6768_s29 }
0x2299   :  { %v6289_v0 = vpop.f32.mrf.mxu1 }
0x229a   :  { %v7685_v32 = vpack.c.bf16 %v7652_v2, %v7652_v2 }
0x229c   :  { %4543 = vrot.lane.b32.xlu1 %v4181_v60, %s6769_s30 }
0x22b6   :  { %4182 = vxpose.xlu0.b32.start [1/2] (short) (narrow) %v4175_v53, 32 }
0x22ba   :  { %4183 = vxpose.xlu0.b32.end [2/2] (short) (narrow) %v4178_v39, 32 }
0x230a   :  { %v4326_v28 = vpop.permute.xlu0 %4325  ;;  %v4436_v12 = vpop.permute.xlu1 %4435 }
0x230e   :  { %v4544_v21 = vpop.permute.xlu1 %4543 }
0x2332   :  { %v4198_v33 = vpop.trf.xlu0 }
0x2336   :  { %v4199_v23 = vpop.trf.xlu0 }
0x2337   :  { %v4214_v3 = vpack.c.bf16 %v4199_v23, %v4198_v33 }
0x2339   :  { %v4221_v4 = vsel %vm260_vm6, %v4214_v3, 0  ;;  %v4328_v6 = vrot.slane %v4214_v3, 4 }
0x233a   :  { %6299 = vmatpush3.bf16.msra.mxu1 %v4221_v4  ;;  %v4200_v7 = vpop.trf.xlu0 }
0x233b   :  { %6310 = vmatprep.subr.bf16.mxu1 %v6765_v15  ;;  %v4333_v8 = vsel %vm260_vm6, %v4328_v6, 0 }
0x233d   :  { %6301 = vmatmul.mubr.msk.bf16.vlgmr.msra.gmra.mxu1 %vm256_vm7, %v4181_v60 }
0x233e   :  { %6311 = vmatpush3.bf16.msra.mxu1 %v4333_v8  ;;  %v4201_v11 = vpop.trf.xlu0  ;;  %6312 = vmatprep.mubr.msk.bf16.mxu1 %vm6766_vm1, %v6765_v15 }
0x233f   :  { %v4215_v10 = vpack.c.bf16 %v4201_v11, %v4200_v7  ;;  %6322 = vmatprep.subr.bf16.mxu1 %v6765_v15 }
0x2341   :  { %v4441_v42 = vsel %vm260_vm6, %v4215_v10, 0  ;;  %v4546_v1 = vrot.slane %v4215_v10, 4 }
0x2343   :  { %v4551_v20 = vsel %vm260_vm6, %v4546_v1, 0 }
0x2345   :  { %6313 = vmatmul.mubr.msk.bf16.vlgmr.msra.gmra.mxu1 %vm256_vm7, %v4326_v28 }
0x2346   :  { %6323 = vmatpush3.bf16.msra.mxu1 %v4441_v42  ;;  %6324 = vmatprep.mubr.msk.bf16.mxu1 %vm6766_vm1, %v6765_v15 }
0x2347   :  { %6334 = vmatprep.subr.bf16.mxu1 %v6765_v15 }
0x234d   :  { %6325 = vmatmul.mubr.msk.bf16.vlgmr.msra.gmra.mxu1 %vm256_vm7, %v4436_v12 }
0x234e   :  { %6335 = vmatpush3.bf16.msra.mxu1 %v4551_v20  ;;  %6336 = vmatprep.mubr.msk.bf16.mxu1 %vm6766_vm1, %v6765_v15 }
0x234f   :  { %6346 = vmatprep.subr.bf16.mxu1 %v6765_v15 }
0x2355   :  { %6337 = vmatmul.mubr.msk.bf16.vlgmr.msra.gmra.mxu1 %vm256_vm7, %v4544_v21 }
0x2356   :  { %6350 = vmatprep.mubr.msk.bf16.mxu1 %vm6766_vm1, %v6765_v15 }
0x23fd   :  { %v4257_v22 = vpop.f32.mrf.mxu1 }
0x23fe   :  { %v4258_v5 = vadd.f32 %v6671_v29, %v4257_v22 }
0x23ff   :  { %v6302_v49 = vpop.f32.mrf.mxu1 }
0x2400   :  { %v4263_v25 = vsel %vm1554_vm14, %v4258_v5, -inf }
0x2401   :  { %4264 = vmax.xlane.f32.xlu1 %v4263_v25  ;;  %v4260_v27 = vpop.f32.mrf.mxu1 }
0x2403   :  { %v6303_v31 = vpop.f32.mrf.mxu1 }
0x2405   :  { %v4369_v36 = vpop.f32.mrf.mxu1 }
0x2406   :  { %v4370_v14 = vadd.f32 %v6671_v29, %v4369_v36 }
0x2407   :  { %v6314_v30 = vpop.f32.mrf.mxu1 }
0x2408   :  { %v4375_v37 = vsel %vm1554_vm14, %v4370_v14, -inf }
0x2409   :  { %4376 = vmax.xlane.f32.xlu0 %v4375_v37  ;;  %v4372_v17 = vpop.f32.mrf.mxu1 }
0x240b   :  { %v6315_v40 = vpop.f32.mrf.mxu1 }
0x240d   :  { %v4477_v54 = vpop.f32.mrf.mxu1 }
0x240e   :  { %v4478_v61 = vadd.f32 %v6671_v29, %v4477_v54 }
0x240f   :  { %v6326_v50 = vpop.f32.mrf.mxu1 }
0x2410   :  { %v4483_v59 = vsel %vm1554_vm14, %v4478_v61, -inf }
0x2411   :  { %4484 = vmax.xlane.f32.xlu1 %v4483_v59  ;;  %v4480_v16 = vpop.f32.mrf.mxu1 }
0x2413   :  { %v6327_v41 = vpop.f32.mrf.mxu1 }
0x2415   :  { %v4587_v45 = vpop.f32.mrf.mxu1 }
0x2416   :  { %v4588_v46 = vadd.f32 %v6671_v29, %v4587_v45 }
0x2417   :  { %v6338_v18 = vpop.f32.mrf.mxu1 }
0x2418   :  { %v4593_v9 = vsel %vm1554_vm14, %v4588_v46, -inf }
0x2419   :  { %4594 = vmax.xlane.f32.xlu1 %v4593_v9  ;;  %v4590_v52 = vpop.f32.mrf.mxu1 }
0x241b   :  { %v6339_v53 = vpop.f32.mrf.mxu1 }
0x241f   :  { %4605 = vrot.lane.b32.xlu0 %v7648_v26, %s6780_s27 }
0x2423   :  { %4903 = vrot.lane.b32.xlu0 %v7685_v32, %s6768_s29 }
0x242a   :  { %4276 = vrot.lane.b32.xlu1 %v7648_v26, %s6767_s28 }
0x242e   :  { %4387 = vrot.lane.b32.xlu1 %v7648_v26, %s6778_s25 }
0x248a   :  { %v4265_v39 = vpop.xlane.xlu1 %4264 }
0x248b   :  { %v4266_v34 = vsub.f32 %v4258_v5, %v4265_v39 }
0x248d   :  { %v4267_v56 = vmul.f32 1.442695, %v4266_v34 }
0x248f   :  { %6620 = vpow2.f32 %v4267_v56 }
0x2492   :  { %v4377_v43 = vpop.xlane.xlu0 %4376 }
0x2493   :  { %v4378_v24 = vsub.f32 %v4370_v14, %v4377_v43 }
0x2495   :  { %v4379_v58 = vmul.f32 1.442695, %v4378_v24 }
0x2496   :  { %v4606_v37 = vpop.permute.xlu0 %4605 }
0x2497   :  { %6622 = vpow2.f32 %v4379_v58  ;;  %v4611_v40 = vsel %vm1573_vm15, %v4606_v37, 0 }
0x249a   :  { %v4485_v44 = vpop.xlane.xlu1 %4484 }
0x249b   :  { %v4486_v60 = vsub.f32 %v4478_v61, %v4485_v44 }
0x249c   :  { %v6621_v62 = vpop.eup %6620 }
0x249d   :  { %v4487_v2 = vmul.f32 1.442695, %v4486_v60  ;;  %v4269_v0 = vsel %vm1554_vm14, %v6621_v62, 0.0 }
0x249e   :  { %4270 = vadd.xlane.f32.xlu1 %v4269_v0 }
0x249f   :  { %6624 = vpow2.f32 %v4487_v2 }
0x24a2   :  { %v4595_v28 = vpop.xlane.xlu1 %4594 }
0x24a3   :  { %v4596_v33 = vsub.f32 %v4588_v46, %v4595_v28 }
0x24a4   :  { %v6623_v23 = vpop.eup %6622 }
0x24a5   :  { %v4597_v3 = vmul.f32 1.442695, %v4596_v33  ;;  %v4381_v4 = vsel %vm1554_vm14, %v6623_v23, 0.0 }
0x24a6   :  { %4382 = vadd.xlane.f32.xlu1 %v4381_v4  ;;  %v4277_v6 = vpop.permute.xlu1 %4276 }
0x24a7   :  { %6626 = vpow2.f32 %v4597_v3  ;;  %v4282_v7 = vsel %vm1573_vm15, %v4277_v6, 0 }
0x24a8   :  { %6305 = vmatpush3.bf16.msra.mxu0 %v4282_v7 }
0x24a9   :  { %6316 = vmatprep.subr.bf16.mxu0 %v6765_v15 }
0x24aa   :  { %v4388_v1 = vpop.permute.xlu1 %4387 }
0x24ab   :  { %v4393_v49 = vsel %vm1573_vm15, %v4388_v1, 0 }
0x24ac   :  { %v6625_v8 = vpop.eup %6624 }
0x24ad   :  { %v4489_v11 = vsel %vm1554_vm14, %v6625_v8, 0.0 }
0x24ae   :  { %4490 = vadd.xlane.f32.xlu1 %v4489_v11 }
0x24b4   :  { %v6627_v10 = vpop.eup %6626 }
0x24b5   :  { %v4599_v42 = vsel %vm1554_vm14, %v6627_v10, 0.0 }
0x24b6   :  { %4600 = vadd.xlane.f32.xlu1 %v4599_v42 }
0x24c7   :  { %4495 = vrot.lane.b32.xlu1 %v7648_v26, %s6779_s26 }
0x24cb   :  { %4671 = vrot.lane.b32.xlu1 %v7604_v51, %s6775_s16 }
0x2527   :  { %v4271_v12 = vpop.xlane.xlu1 %4270 }
0x2528   :  { %6628 = vrcp.f32 %v4271_v12 }
0x252f   :  { %v4383_v20 = vpop.xlane.xlu1 %4382 }
0x2530   :  { %6630 = vrcp.f32 %v4383_v20 }
0x2535   :  { %v6629_v21 = vpop.eup %6628 }
0x2536   :  { %v4273_v22 = vmul.f32 %v6629_v21, %v6621_v62 }
0x2537   :  { %v4491_v29 = vpop.xlane.xlu1 %4490 }
0x2538   :  { %v4274_v5 = vpack.c.bf16 %v4273_v22, %v4273_v22  ;;  %6632 = vrcp.f32 %v4491_v29 }
0x253a   :  { %6307 = vmatmul.mubr.msk.bf16.vlgmr.msra.gmra.mxu0 %vm1554_vm14, %v4274_v5 }
0x253b   :  { %6317 = vmatpush3.bf16.msra.mxu0 %v4393_v49  ;;  %6318 = vmatprep.mubr.msk.bf16.mxu0 %vm6766_vm1, %v6765_v15 }
0x253c   :  { %6328 = vmatprep.subr.bf16.mxu0 %v6765_v15 }
0x253d   :  { %v6631_v51 = vpop.eup %6630 }
0x253e   :  { %v4385_v26 = vmul.f32 %v6631_v51, %v6623_v23 }
0x253f   :  { %v4601_v25 = vpop.xlane.xlu1 %4600 }
0x2540   :  { %v4386_v27 = vpack.c.bf16 %v4385_v26, %v4385_v26  ;;  %6634 = vrcp.f32 %v4601_v25 }
0x2542   :  { %6319 = vmatmul.mubr.msk.bf16.vlgmr.msra.gmra.mxu0 %vm1554_vm14, %v4386_v27 }
0x2543   :  { %v4496_v31 = vpop.permute.xlu1 %4495  ;;  %6330 = vmatprep.mubr.msk.bf16.mxu0 %vm6766_vm1, %v6765_v15 }
0x2544   :  { %v4501_v36 = vsel %vm1573_vm15, %v4496_v31, 0 }
0x2545   :  { %v6633_v14 = vpop.eup %6632  ;;  %6329 = vmatpush3.bf16.msra.mxu0 %v4501_v36 }
0x2546   :  { %v4493_v30 = vmul.f32 %v6633_v14, %v6625_v8  ;;  %6340 = vmatprep.subr.bf16.mxu0 %v6765_v15 }
0x2547   :  { %v7729_v59 = vpop.permute.xlu1 %4671 }
0x2548   :  { %v4494_v17 = vpack.c.bf16 %v4493_v30, %v4493_v30  ;;  %6347 = vmatpush3.bf16.msra.mxu1 %v7729_v59  ;;  %v6672_v30 = vld [vmem:[#allocation2 + $0x8] sm:$0xff] }
0x2549   :  { %6348 = vmatprep.subr.bf16.mxu1 %v6765_v15 }
0x254a   :  { %6331 = vmatmul.mubr.msk.bf16.vlgmr.msra.gmra.mxu0 %vm1554_vm14, %v4494_v17 }
0x254b   :  { %6341 = vmatpush3.bf16.msra.mxu0 %v4611_v40  ;;  %6342 = vmatprep.mubr.msk.bf16.mxu0 %vm6766_vm1, %v6765_v15 }
0x254c   :  { %6354 = vmatprep.subr.bf16.mxu0 %v6765_v15 }
0x254d   :  { %v6635_v54 = vpop.eup %6634 }
0x254e   :  { %v4603_v61 = vmul.f32 %v6635_v54, %v6627_v10 }
0x2550   :  { %v4604_v50 = vpack.c.bf16 %v4603_v61, %v4603_v61 }
0x2552   :  { %6343 = vmatmul.mubr.msk.bf16.vlgmr.msra.gmra.mxu0 %vm1554_vm14, %v4604_v50 }
0x2553   :  { %6355 = vmatpush3.bf16.msra.mxu0 %v7623_v13  ;;  %6358 = vmatprep.mubr.msk.bf16.mxu0 %vm6766_vm1, %v6765_v15 }
0x2554   :  { %6356 = vmatprep.subr.bf16.mxu0 %v6765_v15 }
0x2557   :  { %6357 = vmatpush3.bf16.msra.mxu0 %v7627_v19 }
0x2558   :  { %6368 = vmatprep.subr.bf16.mxu0 %v6765_v15 }
0x255a   :  { %6359 = vmatmul.mubr.msk.bf16.vlgmr.msra.gmra.mxu0 %vm100_vm0, %v7220_v57 }
0x255b   :  { %6370 = vmatprep.mubr.msk.bf16.mxu0 %vm6766_vm1, %v6765_v15 }
0x25fa   :  { %v4318_v13 = vpop.f32.mrf.mxu0 }
0x25fc   :  { %v6308_v16 = vpop.f32.mrf.mxu0 }
0x25fe   :  { %v4321_v41 = vpop.f32.mrf.mxu0 }
0x2600   :  { %v6309_v45 = vpop.f32.mrf.mxu0 }
0x2602   :  { %v4429_v46 = vpop.f32.mrf.mxu0 }
0x2603   :  { %4654 = vrot.lane.b32.xlu1 %v4429_v46, %s6763_s11 }
0x2604   :  { %v6320_v19 = vpop.f32.mrf.mxu0 }
0x2606   :  { %v4432_v18 = vpop.f32.mrf.mxu0 }
0x2608   :  { %v6321_v9 = vpop.f32.mrf.mxu0 }
0x260a   :  { %v4537_v57 = vpop.f32.mrf.mxu0 }
0x260b   :  { %4658 = vrot.lane.b32.xlu1 %v4537_v57, %s6776_s17 }
0x260c   :  { %v6332_v52 = vpop.f32.mrf.mxu0 }
0x260e   :  { %v4540_v53 = vpop.f32.mrf.mxu0 }
0x2610   :  { %v6333_v39 = vpop.f32.mrf.mxu0 }
0x2612   :  { %v4647_v34 = vpop.f32.mrf.mxu0 }
0x2613   :  { %4662 = vrot.lane.b32.xlu1 %v4647_v34, %s6777_s18 }
0x2614   :  { %v6344_v56 = vpop.f32.mrf.mxu0 }
0x2616   :  { %v4650_v43 = vpop.f32.mrf.mxu0 }
0x2617   :  { %4669 = vrot.lane.b32.xlu1 %v7611_v48, %s6775_s16 }
0x2618   :  { %v6345_v24 = vpop.f32.mrf.mxu0 }
0x261a   :  { %v4752_v58 = vpop.f32.mrf.mxu0 }
0x261b   :  { %v4753_v44 = vadd.f32 %v4752_v58, %v7644_v47  ;;  %5013 = vrot.lane.b32.xlu1 %v7685_v32, %s6770_s9 }
0x261c   :  { %v6360_v60 = vpop.f32.mrf.mxu0 }
0x261d   :  { %4760 = vxpose.xlu0.b32.start [1/2] (short) (narrow) %v4753_v44, 32 }
0x261e   :  { %v4755_v62 = vpop.f32.mrf.mxu0 }
0x261f   :  { %v4756_v2 = vadd.f32 %v4755_v62, %v7644_v47  ;;  %5121 = vrot.lane.b32.xlu1 %v7685_v32, %s6769_s30  ;;  %v4904_v47 = vpop.permute.xlu0 %4903 }
0x2620   :  { %v6361_v0 = vpop.f32.mrf.mxu0 }
0x2621   :  { %v7744_v28 = vpack.c.bf16 %v4756_v2, %v4753_v44  ;;  %4761 = vxpose.xlu0.b32.end [2/2] (short) (narrow) %v4756_v2, 32 }
0x2675   :  { %v4655_v48 = vpop.permute.xlu1 %4654 }
0x2676   :  { %v4665_v3 = vsel %vm256_vm7, %v4318_v13, %v4655_v48 }
0x267d   :  { %v4659_v33 = vpop.permute.xlu1 %4658 }
0x267e   :  { %v4666_v4 = vsel %vm706_vm8, %v4665_v3, %v4659_v33 }
0x2685   :  { %v4663_v23 = vpop.permute.xlu1 %4662 }
0x2686   :  { %v4667_v6 = vsel %vm708_vm9, %v4666_v4, %v4663_v23 }
0x2687   :  { %v4668_v8 = vpack.c.bf16 %v4667_v6, %v4667_v6 }
0x2689   :  { %v4670_v7 = vpop.permute.xlu1 %4669 }
0x268a   :  { %6349 = vmatpush3.bf16.msra.mxu1 %v4670_v7 }
0x268b   :  { %6362 = vmatprep.subr.bf16.mxu1 %v6765_v15 }
0x268d   :  { %6351 = vmatmul.mubr.msk.bf16.vlgmr.msra.gmra.mxu1 %vm100_vm0, %v4668_v8  ;;  %v5014_v49 = vpop.permute.xlu1 %5013 }
0x268e   :  { %6364 = vmatprep.mubr.msk.bf16.mxu1 %vm6766_vm1, %v6765_v15 }
0x2691   :  { %v5122_v26 = vpop.permute.xlu1 %5121 }
0x2699   :  { %v4776_v11 = vpop.trf.xlu0 }
0x269d   :  { %v4777_v10 = vpop.trf.xlu0 }
0x269e   :  { %v4792_v42 = vpack.c.bf16 %v4777_v10, %v4776_v11 }
0x26a0   :  { %v4799_v1 = vsel %vm260_vm6, %v4792_v42, 0  ;;  %v4906_v12 = vrot.slane %v4792_v42, 4 }
0x26a1   :  { %6363 = vmatpush3.bf16.msra.mxu1 %v4799_v1  ;;  %v4778_v20 = vpop.trf.xlu0 }
0x26a2   :  { %6374 = vmatprep.subr.bf16.mxu1 %v6765_v15  ;;  %v4911_v21 = vsel %vm260_vm6, %v4906_v12, 0 }
0x26a4   :  { %6365 = vmatmul.mubr.msk.bf16.vlgmr.msra.gmra.mxu1 %vm256_vm7, %v7685_v32 }
0x26a5   :  { %6375 = vmatpush3.bf16.msra.mxu1 %v4911_v21  ;;  %v4779_v22 = vpop.trf.xlu0  ;;  %6376 = vmatprep.mubr.msk.bf16.mxu1 %vm6766_vm1, %v6765_v15 }
0x26a6   :  { %v4793_v29 = vpack.c.bf16 %v4779_v22, %v4778_v20  ;;  %6386 = vmatprep.subr.bf16.mxu1 %v6765_v15 }
0x26a8   :  { %v5019_v5 = vsel %vm260_vm6, %v4793_v29, 0  ;;  %v5124_v32 = vrot.slane %v4793_v29, 4 }
0x26aa   :  { %v5129_v51 = vsel %vm260_vm6, %v5124_v32, 0 }
0x26ac   :  { %6377 = vmatmul.mubr.msk.bf16.vlgmr.msra.gmra.mxu1 %vm256_vm7, %v4904_v47 }
0x26ad   :  { %6387 = vmatpush3.bf16.msra.mxu1 %v5019_v5  ;;  %6388 = vmatprep.mubr.msk.bf16.mxu1 %vm6766_vm1, %v6765_v15 }
0x26ae   :  { %6398 = vmatprep.subr.bf16.mxu1 %v6765_v15 }
0x26b4   :  { %6389 = vmatmul.mubr.msk.bf16.vlgmr.msra.gmra.mxu1 %vm256_vm7, %v5014_v49 }
0x26b5   :  { %6399 = vmatpush3.bf16.msra.mxu1 %v5129_v51  ;;  %6400 = vmatprep.mubr.msk.bf16.mxu1 %vm6766_vm1, %v6765_v15 }
0x26b6   :  { %6410 = vmatprep.subr.bf16.mxu1 %v6765_v15 }
0x26bc   :  { %6401 = vmatmul.mubr.msk.bf16.vlgmr.msra.gmra.mxu1 %vm256_vm7, %v5122_v26 }
0x26bd   :  { %6411 = vmatpush3.bf16.msra.mxu1 %v7729_v59  ;;  %6414 = vmatprep.mubr.msk.bf16.mxu1 %vm6766_vm1, %v6765_v15 }
0x26be   :  { %6412 = vmatprep.subr.bf16.mxu1 %v6765_v15 }
0x26c1   :  { %6413 = vmatpush3.bf16.msra.mxu1 %v4670_v7 }
0x26c2   :  { %6426 = vmatprep.subr.bf16.mxu1 %v6765_v15 }
0x274d   :  { %v7777_v25 = vpop.f32.mrf.mxu1 }
0x274f   :  { %v6352_v27 = vpop.f32.mrf.mxu1 }
0x2751   :  { %v4715_v31 = vpop.f32.mrf.mxu1 }
0x2753   :  { %v6353_v36 = vpop.f32.mrf.mxu1 }
0x2764   :  { %v4835_v14 = vpop.f32.mrf.mxu1 }
0x2765   :  { %v4836_v37 = vadd.f32 %v6672_v30, %v4835_v14 }
0x2766   :  { %v6366_v17 = vpop.f32.mrf.mxu1 }
0x2767   :  { %v4841_v40 = vsel %vm1554_vm14, %v4836_v37, -inf }
0x2768   :  { %4842 = vmax.xlane.f32.xlu1 %v4841_v40  ;;  %v4838_v54 = vpop.f32.mrf.mxu1 }
0x276a   :  { %v6367_v61 = vpop.f32.mrf.mxu1 }
0x276c   :  { %v4947_v50 = vpop.f32.mrf.mxu1 }
0x276d   :  { %v4948_v59 = vadd.f32 %v6672_v30, %v4947_v50 }
0x276e   :  { %v6378_v13 = vpop.f32.mrf.mxu1 }
0x276f   :  { %v4953_v16 = vsel %vm1554_vm14, %v4948_v59, -inf }
0x2770   :  { %4954 = vmax.xlane.f32.xlu0 %v4953_v16  ;;  %v4950_v41 = vpop.f32.mrf.mxu1 }
0x2772   :  { %v6379_v45 = vpop.f32.mrf.mxu1 }
0x2774   :  { %v5055_v46 = vpop.f32.mrf.mxu1 }
0x2775   :  { %v5056_v19 = vadd.f32 %v6672_v30, %v5055_v46 }
0x2776   :  { %v6390_v18 = vpop.f32.mrf.mxu1 }
0x2777   :  { %v5061_v9 = vsel %vm1554_vm14, %v5056_v19, -inf }
0x2778   :  { %5062 = vmax.xlane.f32.xlu1 %v5061_v9  ;;  %v5058_v57 = vpop.f32.mrf.mxu1 }
0x277a   :  { %v6391_v52 = vpop.f32.mrf.mxu1 }
0x277c   :  { %v5165_v53 = vpop.f32.mrf.mxu1 }
0x277d   :  { %v5166_v39 = vadd.f32 %v6672_v30, %v5165_v53 }
0x277e   :  { %v6402_v34 = vpop.f32.mrf.mxu1 }
0x277f   :  { %v5171_v56 = vsel %vm1554_vm14, %v5166_v39, -inf }
0x2780   :  { %5172 = vmax.xlane.f32.xlu1 %v5171_v56  ;;  %v5168_v43 = vpop.f32.mrf.mxu1 }
0x2782   :  { %v6403_v24 = vpop.f32.mrf.mxu1 }
0x2786   :  { %5183 = vrot.lane.b32.xlu0 %v7744_v28, %s6780_s27 }
0x2791   :  { %4854 = vrot.lane.b32.xlu1 %v7744_v28, %s6767_s28 }
0x2795   :  { %4965 = vrot.lane.b32.xlu1 %v7744_v28, %s6778_s25 }
0x27f1   :  { %v4843_v58 = vpop.xlane.xlu1 %4842 }
0x27f2   :  { %v4844_v44 = vsub.f32 %v4836_v37, %v4843_v58 }
0x27f4   :  { %v4845_v60 = vmul.f32 1.442695, %v4844_v44  ;;  %v7818_v44 = vld [vmem:[#allocation7 + $0x1] ss:$2 sm:$0x7] }
0x27f6   :  { %6636 = vpow2.f32 %v4845_v60 }
0x27f9   :  { %v4955_v62 = vpop.xlane.xlu0 %4954 }
0x27fa   :  { %v4956_v2 = vsub.f32 %v4948_v59, %v4955_v62 }
0x27fc   :  { %v4957_v0 = vmul.f32 1.442695, %v4956_v2 }
0x27fd   :  { %v5184_v54 = vpop.permute.xlu0 %5183 }
0x27fe   :  { %6638 = vpow2.f32 %v4957_v0  ;;  %v5189_v50 = vsel %vm1573_vm15, %v5184_v54, 0 }
0x2801   :  { %v5063_v48 = vpop.xlane.xlu1 %5062 }
0x2802   :  { %v5064_v33 = vsub.f32 %v5056_v19, %v5063_v48 }
0x2803   :  { %v6637_v23 = vpop.eup %6636 }
0x2804   :  { %v5065_v3 = vmul.f32 1.442695, %v5064_v33  ;;  %v4847_v4 = vsel %vm1554_vm14, %v6637_v23, 0.0 }
0x2805   :  { %4848 = vadd.xlane.f32.xlu1 %v4847_v4 }
0x2806   :  { %6640 = vpow2.f32 %v5065_v3 }
0x2809   :  { %v5173_v6 = vpop.xlane.xlu1 %5172 }
0x280a   :  { %v5174_v7 = vsub.f32 %v5166_v39, %v5173_v6 }
0x280b   :  { %v6639_v8 = vpop.eup %6638 }
0x280c   :  { %v5175_v47 = vmul.f32 1.442695, %v5174_v7  ;;  %v4959_v11 = vsel %vm1554_vm14, %v6639_v8, 0.0  ;;  %v5290_v7 = vadd.f32 %v7777_v25, %v7588_v55 }
0x280d   :  { %4960 = vadd.xlane.f32.xlu1 %v4959_v11  ;;  %v4855_v10 = vpop.permute.xlu1 %4854 }
0x280e   :  { %6642 = vpow2.f32 %v5175_v47  ;;  %v4860_v42 = vsel %vm1573_vm15, %v4855_v10, 0 }
0x280f   :  { %6369 = vmatpush3.bf16.msra.mxu0 %v4860_v42 }
0x2810   :  { %6380 = vmatprep.subr.bf16.mxu0 %v6765_v15 }
0x2811   :  { %v4966_v22 = vpop.permute.xlu1 %4965 }
0x2812   :  { %v4971_v27 = vsel %vm1573_vm15, %v4966_v22, 0 }
0x2813   :  { %v6641_v1 = vpop.eup %6640 }
0x2814   :  { %v5067_v12 = vsel %vm1554_vm14, %v6641_v1, 0.0 }
0x2815   :  { %5068 = vadd.xlane.f32.xlu1 %v5067_v12 }
0x281b   :  { %v6643_v20 = vpop.eup %6642 }
0x281c   :  { %v5177_v21 = vsel %vm1554_vm14, %v6643_v20, 0.0 }
0x281d   :  { %5178 = vadd.xlane.f32.xlu1 %v5177_v21 }
0x282e   :  { %5073 = vrot.lane.b32.xlu1 %v7744_v28, %s6779_s26 }
0x288e   :  { %v4849_v29 = vpop.xlane.xlu1 %4848 }
0x288f   :  { %6644 = vrcp.f32 %v4849_v29 }
0x2896   :  { %v4961_v5 = vpop.xlane.xlu1 %4960 }
0x2897   :  { %6646 = vrcp.f32 %v4961_v5 }
0x289c   :  { %v6645_v32 = vpop.eup %6644 }
0x289d   :  { %v4851_v49 = vmul.f32 %v6645_v32, %v6637_v23 }
0x289e   :  { %v5069_v51 = vpop.xlane.xlu1 %5068 }
0x289f   :  { %v4852_v26 = vpack.c.bf16 %v4851_v49, %v4851_v49  ;;  %6648 = vrcp.f32 %v5069_v51 }
0x28a1   :  { %6371 = vmatmul.mubr.msk.bf16.vlgmr.msra.gmra.mxu0 %vm1554_vm14, %v4852_v26 }
0x28a2   :  { %6381 = vmatpush3.bf16.msra.mxu0 %v4971_v27  ;;  %6382 = vmatprep.mubr.msk.bf16.mxu0 %vm6766_vm1, %v6765_v15 }
0x28a3   :  { %6392 = vmatprep.subr.bf16.mxu0 %v6765_v15 }
0x28a4   :  { %v6647_v28 = vpop.eup %6646 }
0x28a5   :  { %v4963_v31 = vmul.f32 %v6647_v28, %v6639_v8  ;;  %v6478_v28 = vld [vmem:[%s7901_s4 + $0x50] ss:$12 sps:$4 sm:$0xff]  }
0x28a6   :  { %v5179_v36 = vpop.xlane.xlu1 %5178 }
0x28a7   :  { %v4964_v14 = vpack.c.bf16 %v4963_v31, %v4963_v31  ;;  %6650 = vrcp.f32 %v5179_v36  ;;  %v6479_v31 = vld [vmem:[%s7901_s4 + $0x38] ss:$12 sps:$4 sm:$0xff]  }
0x28a8   :  { %v6480_v36 = vld [vmem:[%s7902_s5 + $0x38] sm:$0xff]  }
0x28a9   :  { %6383 = vmatmul.mubr.msk.bf16.vlgmr.msra.gmra.mxu0 %vm1554_vm14, %v4964_v14 }
0x28aa   :  { %v5074_v30 = vpop.permute.xlu1 %5073  ;;  %6394 = vmatprep.mubr.msk.bf16.mxu0 %vm6766_vm1, %v6765_v15 }
0x28ab   :  { %v5079_v37 = vsel %vm1573_vm15, %v5074_v30, 0 }
0x28ac   :  { %v6649_v17 = vpop.eup %6648  ;;  %6393 = vmatpush3.bf16.msra.mxu0 %v5079_v37 }
0x28ad   :  { %v5071_v40 = vmul.f32 %v6649_v17, %v6641_v1  ;;  %6404 = vmatprep.subr.bf16.mxu0 %v6765_v15 }
0x28af   :  { %v5072_v61 = vpack.c.bf16 %v5071_v40, %v5071_v40 }
0x28b1   :  { %6395 = vmatmul.mubr.msk.bf16.vlgmr.msra.gmra.mxu0 %vm1554_vm14, %v5072_v61 }
0x28b2   :  { %6405 = vmatpush3.bf16.msra.mxu0 %v5189_v50  ;;  %6406 = vmatprep.mubr.msk.bf16.mxu0 %vm6766_vm1, %v6765_v15 }
0x28b3   :  { %6418 = vmatprep.subr.bf16.mxu0 %v6765_v15 }
0x28b4   :  { %v6651_v59 = vpop.eup %6650 }
0x28b5   :  { %v5181_v13 = vmul.f32 %v6651_v59, %v6643_v20 }
0x28b7   :  { %v5182_v16 = vpack.c.bf16 %v5181_v13, %v5181_v13 }
0x28b9   :  { %6407 = vmatmul.mubr.msk.bf16.vlgmr.msra.gmra.mxu0 %vm1554_vm14, %v5182_v16 }
0x28ba   :  { %6422 = vmatprep.mubr.msk.bf16.mxu0 %vm6766_vm1, %v6765_v15  ;;  %6419 = vmatpush3.bf16.msra.mxu0 %v6478_v28 }
0x28bb   :  { %6420 = vmatprep.subr.bf16.mxu0 %v6765_v15 }
0x28be   :  { %6421 = vmatpush3.bf16.msra.mxu0 %v6479_v31 }
0x2961   :  { %v4896_v41 = vpop.f32.mrf.mxu0 }
0x2963   :  { %v6372_v45 = vpop.f32.mrf.mxu0 }
0x2965   :  { %v4899_v46 = vpop.f32.mrf.mxu0 }
0x2967   :  { %v6373_v19 = vpop.f32.mrf.mxu0 }
0x2969   :  { %v5007_v18 = vpop.f32.mrf.mxu0 }
0x296a   :  { %5232 = vrot.lane.b32.xlu1 %v5007_v18, %s6763_s11 }
0x296b   :  { %v6384_v9 = vpop.f32.mrf.mxu0 }
0x296c   :  { %v81_v9 = vld [vmem:[%s7904_s7 + $0xa] sm:$0x3] }
0x296d   :  { %v5010_v57 = vpop.f32.mrf.mxu0 }
0x296e   :  { %v5325_v57 = vrot.slane %v81_v9, %v6880_v35 }
0x296f   :  { %v6385_v52 = vpop.f32.mrf.mxu0 }
0x2971   :  { %v5115_v53 = vpop.f32.mrf.mxu0 }
0x2972   :  { %5236 = vrot.lane.b32.xlu1 %v5115_v53, %s6776_s17 }
0x2973   :  { %v6396_v39 = vpop.f32.mrf.mxu0 }
0x2974   :  { %v5351_v39 = vrot.slane %v81_v9, %v6886_v38 }
0x2975   :  { %v5118_v34 = vpop.f32.mrf.mxu0 }
0x2977   :  { %v6397_v56 = vpop.f32.mrf.mxu0 }
0x2979   :  { %v5225_v43 = vpop.f32.mrf.mxu0 }
0x297a   :  { %5240 = vrot.lane.b32.xlu1 %v5225_v43, %s6777_s18 }
0x297b   :  { %v6408_v24 = vpop.f32.mrf.mxu0 }
0x297d   :  { %v5228_v58 = vpop.f32.mrf.mxu0 }
0x297e   :  { %5292 = vrot.lane.b32.xlu1 %v7818_v44, %s6775_s16 }
0x297f   :  { %v6409_v60 = vpop.f32.mrf.mxu0 }
0x29dc   :  { %v5233_v62 = vpop.permute.xlu1 %5232 }
0x29dd   :  { %v5243_v0 = vsel %vm256_vm7, %v4896_v41, %v5233_v62 }
0x29e4   :  { %v5237_v2 = vpop.permute.xlu1 %5236 }
0x29e5   :  { %v5244_v48 = vsel %vm706_vm8, %v5243_v0, %v5237_v2  ;;  %v6481_v2 = vld [vmem:[%s7902_s5 + $0x30] sm:$0xff]   ;;  %v6482_v0 = vld [vmem:[%s7902_s5 + $0x28] sm:$0xff]  }
0x29ec   :  { %v5241_v33 = vpop.permute.xlu1 %5240 }
0x29ed   :  { %v5245_v23 = vsel %vm708_vm9, %v5244_v48, %v5241_v33  ;;  %v6483_v48 = vld [vmem:[%s7902_s5 + $0x20] sm:$0xff]   ;;  %v5355_v33 = vrot.slane %v7818_v44, 2 }
0x29ee   :  { %v5246_v3 = vpack.c.bf16 %v5245_v23, %v5245_v23 }
0x29ef   :  { %v5359_v23 = vrot.slane %v5355_v33, %v6880_v35 }
0x29f0   :  { %6415 = vmatmul.mubr.msk.bf16.vlgmr.msra.gmra.mxu1 %vm100_vm0, %v5246_v3  ;;  %v5293_v4 = vpop.permute.xlu1 %5292 }
0x29f1   :  { %v5294_v6 = vrot.slane %v5293_v4, 1  ;;  %6434 = vmatprep.mubr.msk.bf16.mxu1 %vm6766_vm1, %v6765_v15  ;;  %6427 = vmatpush3.bf16.msra.mxu1 %v6480_v36 }
0x29f2   :  { %6428 = vmatprep.subr.bf16.mxu1 %v6765_v15 }
0x29f3   :  { %v5298_v8 = vrot.slane %v5294_v6, %v6880_v35 }
0x29f5   :  { %v7831_v47 = vadd.f32 %v5298_v8, %v5290_v7  ;;  %6429 = vmatpush3.bf16.msra.mxu1 %v6481_v2 }
0x29f6   :  { %6430 = vmatprep.subr.bf16.mxu1 %v6765_v15 }
0x29f7   :  { %v5302_v11 = vsel %vm100_vm0, %v7831_v47, 0.0 }
0x29f8   :  { %5303 = vadd.xlane.f32.xlu1 %v5302_v11 }
0x29f9   :  { %6431 = vmatpush3.bf16.msra.mxu1 %v6482_v0 }
0x29fa   :  { %6432 = vmatprep.subr.bf16.mxu1 %v6765_v15 }
0x29fd   :  { %6433 = vmatpush3.bf16.msra.mxu1 %v6483_v48 }
0x2a81   :  { %v5304_v10 = vpop.xlane.xlu1 %5303 }
0x2a82   :  { %v5308_v42 = vmul.f32 0.03125, %v5304_v10 }
0x2a84   :  { %v5310_v12 = vsub.f32 %v7831_v47, %v5308_v42 }
0x2a86   :  { %v5312_v25 = vmul.f32 %v5310_v12, %v5310_v12  ;;  %v5326_v53 = vmul.f32 %v5325_v57, %v5310_v12 }
0x2a88   :  { %v5314_v32 = vsel %vm100_vm0, %v5312_v25, 0.0 }
0x2ab0   :  { %v5284_v1 = vpop.f32.mrf.mxu1 }
0x2ab1   :  { %v5291_v20 = vadd.f32 %v5284_v1, %v7597_v63 }
0x2ab2   :  { %v6416_v21 = vpop.f32.mrf.mxu1 }
0x2ab3   :  { %v7837_v22 = vadd.f32 %v5298_v8, %v5291_v20 }
0x2ab4   :  { %v5287_v29 = vpop.f32.mrf.mxu1 }
0x2ab5   :  { %v5305_v55 = vsel %vm100_vm0, %v7837_v22, 0.0 }
0x2ab6   :  { %v6417_v5 = vpop.f32.mrf.mxu1  ;;  %5306 = vadd.xlane.f32.xlu0 %v5305_v55 }
0x2aba   :  { %5315 = vadd.xlane.f32.xlu0 %v5314_v32 }
0x2ad0   :  { %5490 = vrot.lane.b32.xlu0 %v7818_v44, %s6771_s12 }
0x2b3f   :  { %v5307_v49 = vpop.xlane.xlu0 %5306 }
0x2b40   :  { %v5309_v51 = vmul.f32 0.03125, %v5307_v49 }
0x2b42   :  { %v5311_v63 = vsub.f32 %v7837_v22, %v5309_v51 }
0x2b43   :  { %v5316_v14 = vpop.xlane.xlu0 %5315 }
0x2b44   :  { %v5313_v26 = vmul.f32 %v5311_v63, %v5311_v63  ;;  %v5320_v30 = vmul.f32 0.032258064, %v5316_v14  ;;  %v5327_v34 = vmul.f32 %v5325_v57, %v5311_v63 }
0x2b46   :  { %v5317_v27 = vsel %vm100_vm0, %v5313_v26, 0.0  ;;  %6652 = vrsqrt.f32 %v5320_v30  ;;  %vm5330_vm1 = vcmp.eq.f32.partialorder %v5320_v30, inf  ;;  %v5333_v50 = vand.u32 2147483648, %v5320_v30 }
0x2b47   :  { %5318 = vadd.xlane.f32.xlu1 %v5317_v27  ;;  %vm5332_vm6 = vcmp.eq.f32.partialorder %v5320_v30, 0.0  ;;  %v5491_v15 = vpop.permute.xlu0 %5490 }
0x2b48   :  { %v5492_v12 = vrot.slane %v5491_v15, 2 }
0x2b4a   :  { %v5496_v20 = vrot.slane %v5492_v12, %v6880_v35 }
0x2b53   :  { %v6653_v40 = vpop.eup %6652 }
0x2b54   :  { %v5329_v54 = vmul.f32 %v6653_v40, %v5320_v30 }
0x2b56   :  { %v5331_v61 = vsel %vm5330_vm1, %v5320_v30, %v5329_v54 }
0x2b57   :  { %v5334_v59 = vsel %vm5332_vm6, %v5333_v50, %v5331_v61 }
0x2b58   :  { %v5342_v13 = vadd.f32 1e-06, %v5334_v59 }
0x2bd0   :  { %v5319_v37 = vpop.xlane.xlu1 %5318 }
0x2bd1   :  { %v5321_v17 = vmul.f32 0.032258064, %v5319_v37 }
0x2bd3   :  { %6654 = vrsqrt.f32 %v5321_v17  ;;  %vm5337_vm7 = vcmp.eq.f32.partialorder %v5321_v17, inf  ;;  %v5340_v45 = vand.u32 2147483648, %v5321_v17  ;;  %vm5339_vm8 = vcmp.eq.f32.partialorder %v5321_v17, 0.0 }
0x2bd4   :  { %6656 = vrcp.f32 %v5342_v13 }
0x2be0   :  { %v6655_v16 = vpop.eup %6654 }
0x2be1   :  { %v5336_v41 = vmul.f32 %v6655_v16, %v5321_v17  ;;  %v6657_v52 = vpop.eup %6656 }
0x2be2   :  { %v5345_v56 = vmul.f32 %v6657_v52, %v5326_v53  ;;  %v82_v53 = vld [vmem:[%s7904_s7 + $0xc] sm:$0x3]  ;;  %s6734_s7 = scalar_lea.vmem %s5560_s6, 256 }
0x2be3   :  { %v5338_v46 = vsel %vm5337_vm7, %v5321_v17, %v5336_v41  ;;  %p6735_p1 = scmp.ne.s32.totalorder %s5560_s6, %s6734_s7  ;;  %p6740_p3 = scmp.lt.s32.totalorder %s6734_s7, %s6734_s7 }
0x2be4   :  { %v5341_v19 = vsel %vm5339_vm8, %v5340_v45, %v5338_v46  ;;  %v5352_v58 = vadd.f32 %v5351_v39, %v5345_v56 }
0x2be5   :  { %v5343_v18 = vadd.f32 1e-06, %v5341_v19  ;;  %p6741_p4 = por %p6740_p3, %p6739_p2 }
0x2be7   :  { %6658 = vrcp.f32 %v5343_v18  ;;  %p6742_p5 = pnand %p6741_p4, %p6735_p1 }
0x2bf4   :  { %v6659_v43 = vpop.eup %6658 }
0x2bf5   :  { %v5347_v24 = vmul.f32 %v6659_v43, %v5327_v34  ;;  %v5549_v34 = vrot.slane %v82_v53, %v6886_v38 }
0x2bf7   :  { %v5353_v60 = vadd.f32 %v5351_v39, %v5347_v24  ;;  %v5523_v39 = vrot.slane %v82_v53, %v6880_v35 }
0x2bf9   :  { %v5354_v62 = vpack.c.bf16 %v5353_v60, %v5352_v58 }
0x2bfb   :  { %6423 = vmatmul.mubr.msk.bf16.vlgmr.msra.gmra.mxu0 %vm100_vm0, %v5354_v62 }
0x2cbb   :  { %v5410_v3 = vpop.f32.mrf.mxu0 }
0x2cbc   :  { %v5411_v6 = vadd.f32 %v5410_v3, %v5359_v23 }
0x2cbd   :  { %v6424_v4 = vpop.f32.mrf.mxu0 }
0x2cbe   :  { %v5417_v10 = vmax.f32 %v5411_v6, 0.0 }
0x2cbf   :  { %v5413_v7 = vpop.f32.mrf.mxu0 }
0x2cc0   :  { %v5414_v8 = vadd.f32 %v5413_v7, %v5359_v23 }
0x2cc1   :  { %v6425_v11 = vpop.f32.mrf.mxu0 }
0x2cc2   :  { %v5418_v42 = vmax.f32 %v5414_v8, 0.0 }
0x2cc4   :  { %v5419_v1 = vpack.c.bf16 %v5418_v42, %v5417_v10 }
0x2cc6   :  { %6435 = vmatmul.mubr.msk.bf16.vlgmr.msra.gmra.mxu1 %vm2744_vm10, %v5419_v1 }
0x2d86   :  { %v5481_v21 = vpop.f32.mrf.mxu1 }
0x2d87   :  { %v5488_v44 = vadd.f32 %v5481_v21, %v7831_v47 }
0x2d88   :  { %v6436_v29 = vpop.f32.mrf.mxu1 }
0x2d89   :  { %v5498_v55 = vadd.f32 %v5496_v20, %v5488_v44 }
0x2d8a   :  { %v5484_v25 = vpop.f32.mrf.mxu1 }
0x2d8b   :  { %v5489_v5 = vadd.f32 %v5484_v25, %v7837_v22  ;;  %v5500_v32 = vsel %vm100_vm0, %v5498_v55, 0.0 }
0x2d8c   :  { %5501 = vadd.xlane.f32.xlu1 %v5500_v32  ;;  %v6437_v49 = vpop.f32.mrf.mxu1 }
0x2d8d   :  { %v5499_v51 = vadd.f32 %v5496_v20, %v5489_v5 }
0x2d8f   :  { %v5503_v63 = vsel %vm100_vm0, %v5499_v51, 0.0 }
0x2d90   :  { %5504 = vadd.xlane.f32.xlu1 %v5503_v63 }
0x2e15   :  { %v5502_v26 = vpop.xlane.xlu1 %5501 }
0x2e16   :  { %v5506_v27 = vmul.f32 0.03125, %v5502_v26 }
0x2e18   :  { %v5508_v28 = vsub.f32 %v5498_v55, %v5506_v27 }
0x2e19   :  { %v5505_v31 = vpop.xlane.xlu1 %5504 }
0x2e1a   :  { %v5507_v36 = vmul.f32 0.03125, %v5505_v31  ;;  %v5510_v14 = vmul.f32 %v5508_v28, %v5508_v28  ;;  %v5524_v56 = vmul.f32 %v5523_v39, %v5508_v28 }
0x2e1c   :  { %v5509_v47 = vsub.f32 %v5499_v51, %v5507_v36  ;;  %v5512_v30 = vsel %vm100_vm0, %v5510_v14, 0.0 }
0x2e1d   :  { %5513 = vadd.xlane.f32.xlu1 %v5512_v30 }
0x2e1e   :  { %v5511_v37 = vmul.f32 %v5509_v47, %v5509_v47  ;;  %v5525_v58 = vmul.f32 %v5523_v39, %v5509_v47 }
0x2e20   :  { %v5515_v22 = vsel %vm100_vm0, %v5511_v37, 0.0 }
0x2e21   :  { %5516 = vadd.xlane.f32.xlu1 %v5515_v22 }
0x2ea6   :  { %v5514_v17 = vpop.xlane.xlu1 %5513 }
0x2ea7   :  { %v5518_v40 = vmul.f32 0.032258064, %v5514_v17 }
0x2ea9   :  { %6660 = vrsqrt.f32 %v5518_v40  ;;  %vm5528_vm9 = vcmp.eq.f32.partialorder %v5518_v40, inf  ;;  %v5531_v13 = vand.u32 2147483648, %v5518_v40  ;;  %vm5530_vm14 = vcmp.eq.f32.partialorder %v5518_v40, 0.0 }
0x2eaa   :  { %v5517_v54 = vpop.xlane.xlu1 %5516 }
0x2eab   :  { %v5519_v61 = vmul.f32 0.032258064, %v5517_v54 }
0x2ead   :  { %6662 = vrsqrt.f32 %v5519_v61  ;;  %vm5535_vm15 = vcmp.eq.f32.partialorder %v5519_v61, inf  ;;  %v5538_v18 = vand.u32 2147483648, %v5519_v61  ;;  %vm5537_vm10 = vcmp.eq.f32.partialorder %v5519_v61, 0.0 }
0x2eb6   :  { %v6661_v50 = vpop.eup %6660 }
0x2eb7   :  { %v5527_v59 = vmul.f32 %v6661_v50, %v5518_v40 }
0x2eb9   :  { %v5529_v16 = vsel %vm5528_vm9, %v5518_v40, %v5527_v59 }
0x2eba   :  { %v6663_v41 = vpop.eup %6662  ;;  %v5532_v45 = vsel %vm5530_vm14, %v5531_v13, %v5529_v16 }
0x2ebb   :  { %v5540_v46 = vadd.f32 1e-06, %v5532_v45  ;;  %v5534_v19 = vmul.f32 %v6663_v41, %v5519_v61 }
0x2ebd   :  { %6664 = vrcp.f32 %v5540_v46  ;;  %v5536_v9 = vsel %vm5535_vm15, %v5519_v61, %v5534_v19 }
0x2ebe   :  { %v5539_v57 = vsel %vm5537_vm10, %v5538_v18, %v5536_v9 }
0x2ebf   :  { %v5541_v52 = vadd.f32 1e-06, %v5539_v57 }
0x2ec1   :  { %6666 = vrcp.f32 %v5541_v52 }
0x2eca   :  { %v6665_v43 = vpop.eup %6664 }
0x2ecb   :  { %v5543_v24 = vmul.f32 %v6665_v43, %v5524_v56 }
0x2ecd   :  { %v5550_v60 = vadd.f32 %v5549_v34, %v5543_v24 }
0x2ece   :  { %v6667_v62 = vpop.eup %6666 }
0x2ecf   :  { %v5545_v2 = vmul.f32 %v6667_v62, %v5525_v58  ;;  %5552 = vst.msk [vmem:[#allocation8] sm:$0xff] %vm100_vm0, %v5550_v60 }
0x2ed1   :  { %v5551_v0 = vadd.f32 %v5549_v34, %v5545_v2 }
0x2ed3   :  { %5553 = vst.msk [vmem:[#allocation8 + $0x8] sm:$0xff] %vm100_vm0, %v5551_v0 }
0x2ed4   :  { %6745 = shalt.err (!%p6742_p5)
}
0x2ed5   :  { %5565 = dma.vmem_to_hbm [thread:$0]  %s5560_s6, 256, %s7905_s8, [#allocation4], %s6762_s10, %s6762_s10, %s6763_s11  }
0x2ed6   :  { %6758 = dma.done.wait [#allocation4], 256  }
0x2ed7   :  { %6759 = vsyncadd [#allocation4], 4294967040 }
0x2ed8   :  { %5569 = vsyncpa [#allocation3], 1 }
0x2ed9   :  { %5570 = vsyncpa [#allocation6], 1 }
0x2eda   :  { %5571 = vsyncpa [#allocation4], 1 }

</bundles_post_ra>
